<compile_context>
chip_gen: v6e
topology: v6e:2x2x1
jax: 0.10.0
libtpu: 0.0.40
codegen_flags: <defaults>
</compile_context>

<pallas_src>
import functools

import jax
import jax.numpy as jnp
from jax.experimental import pallas as pl
from jax.experimental.pallas import tpu as pltpu

# Logical (PyTorch) dims and lane-aligned padded dims.
D_IN, D_IN_PAD = 100, 128            # layer-0 contraction dim (pad 100 -> 128)
D_H0, D_H1, D_H2 = 256, 512, 1024
D_OUT, D_OUT_PAD = 784, 896          # 896 = 7*128 -> lane-dense output stores
TM_MAX = 256                         # max batch tile


def _generator_kernel(x_ref,                 # (tm, 128)  f32  VMEM
                      w0_ref, b0_ref,        # (128, 256) bf16, (1, 256)  f32
                      w1_ref, b1_ref,        # (256, 512) bf16, (1, 512)  f32
                      w2_ref, b2_ref,        # (512,1024) bf16, (1,1024)  f32
                      w3_ref, b3_ref,        # (1024,896) bf16, (1, 896)  f32
                      o_ref,                 # (tm, 896)  f32  VMEM
                      *, slope):
    """One batch tile of the full 4-layer generator; weights are VMEM-resident
    across all grid steps (constant-index BlockSpecs -> fetched once)."""

    def leaky(h):
        return jnp.where(h > 0, h, slope * h)

    # Layer 0: 128 -> 256, LeakyReLU(0.2)   (x zero-padded 100 -> 128)
    x = x_ref[...].astype(jnp.bfloat16)
    h = jnp.dot(x, w0_ref[...], preferred_element_type=jnp.float32) + b0_ref[...]
    h = leaky(h)

    # Layer 1: 256 -> 512, LeakyReLU(0.2)
    h = jnp.dot(h.astype(jnp.bfloat16), w1_ref[...],
                preferred_element_type=jnp.float32) + b1_ref[...]
    h = leaky(h)

    # Layer 2: 512 -> 1024, LeakyReLU(0.2)
    h = jnp.dot(h.astype(jnp.bfloat16), w2_ref[...],
                preferred_element_type=jnp.float32) + b2_ref[...]
    h = leaky(h)

    # Layer 3: 1024 -> 896 (= 784 zero-padded), Tanh
    h = jnp.dot(h.astype(jnp.bfloat16), w3_ref[...],
                preferred_element_type=jnp.float32) + b3_ref[...]
    o_ref[...] = jnp.tanh(h).astype(o_ref.dtype)


def _round_up(x, m):
    return ((x + m - 1) // m) * m


def generator_forward(x, params, *, tm=None):
    """x: (B, 100) f32; params: padded (w bf16 (Din,Dout), b f32 (1,Dout))."""
    (w0, b0), (w1, b1), (w2, b2), (w3, b3) = params
    B = x.shape[0]

    # Lane-align the layer-0 contraction dim (100 -> 128) with zeros.
    x = jnp.pad(x, ((0, 0), (0, D_IN_PAD - D_IN)))

    # Batch tile: <= TM_MAX, multiple of 16 (bf16 sublane packing).  Always run
    # >= 2 grid steps so both v7x TensorCores get work on the "parallel" axis.
    if tm is None:
        if B >= 2 * TM_MAX:
            tm = TM_MAX
        else:
            tm = min(TM_MAX, max(16, _round_up(pl.cdiv(B, 2), 16)))
    n_blk = max(2, pl.cdiv(B, tm))
    b_pad = n_blk * tm
    if b_pad != B:
        x = jnp.pad(x, ((0, b_pad - B), (0, 0)))

    kernel = functools.partial(_generator_kernel, slope=0.2)

    # Advisory cost so XLA can overlap this tiny kernel with surrounding ops.
    mm_macs = D_IN_PAD * D_H0 + D_H0 * D_H1 + D_H1 * D_H2 + D_H2 * D_OUT_PAD
    cost = pl.CostEstimate(
        flops=int(2 * b_pad * mm_macs),
        transcendentals=int(b_pad * D_OUT_PAD),
        bytes_accessed=int(2 * mm_macs                               # bf16 weights (once)
                           + 4 * (D_H0 + D_H1 + D_H2 + D_OUT_PAD)    # f32 biases
                           + 4 * b_pad * (D_IN_PAD + D_OUT_PAD)),    # x in + out
    )

    def const_spec(shape):
        # Grid-invariant block: fetched from HBM once, resident in VMEM.
        return pl.BlockSpec(shape, lambda i: (0, 0))

    out = pl.pallas_call(
        kernel,
        out_shape=jax.ShapeDtypeStruct((b_pad, D_OUT_PAD), jnp.float32),
        grid_spec=pltpu.PrefetchScalarGridSpec(
            num_scalar_prefetch=0,
            grid=(n_blk,),
            in_specs=[
                pl.BlockSpec((tm, D_IN_PAD), lambda i: (i, 0)),   # x tile
                const_spec(w0.shape), const_spec(b0.shape),
                const_spec(w1.shape), const_spec(b1.shape),
                const_spec(w2.shape), const_spec(b2.shape),
                const_spec(w3.shape), const_spec(b3.shape),
            ],
            out_specs=pl.BlockSpec((tm, D_OUT_PAD), lambda i: (i, 0)),
        ),
        compiler_params=pltpu.CompilerParams(
            dimension_semantics=("parallel",),
            vmem_limit_bytes=32 << 20,
        ),
        cost_estimate=cost,
    )(x, w0, b0, w1, b1, w2, b2, w3, b3)

    return out[:B, :D_OUT]


def init_params(key):
    """PyTorch nn.Linear-style init, U[-1/sqrt(fan_in), +1/sqrt(fan_in)], on
    the logical dims, then zero-padded to lane-aligned kernel shapes.
    Weights -> bfloat16 (MXU input dtype), biases stay float32 rows."""
    logical = [(D_IN, D_H0), (D_H0, D_H1), (D_H1, D_H2), (D_H2, D_OUT)]
    padded = [(D_IN_PAD, D_H0), (D_H0, D_H1), (D_H1, D_H2), (D_H2, D_OUT_PAD)]
    params = []
    for (fi, fo), (pi, po) in zip(logical, padded):
        key, kw, kb = jax.random.split(key, 3)
        bound = 1.0 / jnp.sqrt(fi)
        w = jax.random.uniform(kw, (fi, fo), jnp.float32, -bound, bound)
        b = jax.random.uniform(kb, (1, fo), jnp.float32, -bound, bound)
        w = jnp.pad(w, ((0, pi - fi), (0, po - fo)))
        b = jnp.pad(b, ((0, 0), (0, po - fo)))
        params.append((w.astype(jnp.bfloat16), b))
    return params


@jax.jit
def generate_forward(x, params):
    return generator_forward(x, params)


def _reference(x, params):
    """Pure-JAX reference mirroring the kernel's bf16 matmul / f32 accumulation."""
    h = jnp.pad(x, ((0, 0), (0, D_IN_PAD - D_IN)))
    for i, (w, b) in enumerate(params):
        h = jnp.dot(h.astype(jnp.bfloat16), w,
                    preferred_element_type=jnp.float32) + b
        h = jnp.where(h > 0, h, 0.2 * h) if i < 3 else jnp.tanh(h)
    return h[:, :D_OUT]


if __name__ == "__main__":
    key = jax.random.PRNGKey(0)
    kp, kx = jax.random.split(key)
    params = init_params(kp)

    B = 8  # small demo batch; kernel scales to larger batches via the grid
    x = jax.random.normal(kx, (B, D_IN), jnp.float32)

    out = generate_forward(x, params)
    out = jax.block_until_ready(out)

    assert out.shape == (B, D_OUT), out.shape
    assert bool(jnp.all(jnp.isfinite(out)))
    ref = _reference(x, params)
    assert jnp.allclose(out, ref, atol=2e-2, rtol=2e-2), "mismatch vs reference"

    print("KERNEL_OK")
</pallas_src>

<mosaic_0001>
module attributes {stable_mosaic.version = 11 : i64} {
  func.func @_generator_kernel(%arg0: i32, %arg1: memref<16x128xf32, #tpu.memory_space<vmem>>, %arg2: memref<128x256xbf16, #tpu.memory_space<vmem>>, %arg3: memref<1x256xf32, #tpu.memory_space<vmem>>, %arg4: memref<256x512xbf16, #tpu.memory_space<vmem>>, %arg5: memref<1x512xf32, #tpu.memory_space<vmem>>, %arg6: memref<512x1024xbf16, #tpu.memory_space<vmem>>, %arg7: memref<1x1024xf32, #tpu.memory_space<vmem>>, %arg8: memref<1024x896xbf16, #tpu.memory_space<vmem>>, %arg9: memref<1x896xf32, #tpu.memory_space<vmem>>, %arg10: memref<16x896xf32, #tpu.memory_space<vmem>>) attributes {dimension_semantics = [#tpu.dimension_semantics<parallel>], iteration_bounds = array<i64: 2>, scalar_prefetch = 0 : i64, scratch_operands = 0 : i64, tpu.core_type = #tpu.core_type<tc>, window_params = [{transform_indices = @transform_0, window_bounds = array<i64: 16, 128>}, {pipeline_mode = #tpu.pipeline_mode<synchronous>, transform_indices = @transform_1, window_bounds = array<i64: 128, 256>}, {pipeline_mode = #tpu.pipeline_mode<synchronous>, transform_indices = @transform_2, window_bounds = array<i64: 1, 256>}, {pipeline_mode = #tpu.pipeline_mode<synchronous>, transform_indices = @transform_3, window_bounds = array<i64: 256, 512>}, {pipeline_mode = #tpu.pipeline_mode<synchronous>, transform_indices = @transform_4, window_bounds = array<i64: 1, 512>}, {pipeline_mode = #tpu.pipeline_mode<synchronous>, transform_indices = @transform_5, window_bounds = array<i64: 512, 1024>}, {pipeline_mode = #tpu.pipeline_mode<synchronous>, transform_indices = @transform_6, window_bounds = array<i64: 1, 1024>}, {pipeline_mode = #tpu.pipeline_mode<synchronous>, transform_indices = @transform_7, window_bounds = array<i64: 1024, 896>}, {pipeline_mode = #tpu.pipeline_mode<synchronous>, transform_indices = @transform_8, window_bounds = array<i64: 1, 896>}, {transform_indices = @transform_9, window_bounds = array<i64: 16, 896>}]} {
    %c0 = arith.constant 0 : index
    %c0_0 = arith.constant 0 : index
    %0 = vector.load %arg1[%c0, %c0_0] : memref<16x128xf32, #tpu.memory_space<vmem>>, vector<16x128xf32>
    %1 = arith.truncf %0 : vector<16x128xf32> to vector<16x128xbf16>
    %c0_1 = arith.constant 0 : index
    %c0_2 = arith.constant 0 : index
    %2 = vector.load %arg2[%c0_1, %c0_2] : memref<128x256xbf16, #tpu.memory_space<vmem>>, vector<128x256xbf16>
    %cst = arith.constant dense<0.000000e+00> : vector<16x256xf32>
    %3 = tpu.matmul %1, %2, %cst {dimension_numbers = #tpu.dot_dimension_numbers<[1], [0], [0], [1], [0, 0, 1, 1], [], []>} : vector<16x128xbf16>, vector<128x256xbf16>, vector<16x256xf32> -> vector<16x256xf32>
    %c0_3 = arith.constant 0 : index
    %c0_4 = arith.constant 0 : index
    %4 = vector.load %arg3[%c0_3, %c0_4] : memref<1x256xf32, #tpu.memory_space<vmem>>, vector<1x256xf32>
    %5 = vector.broadcast %4 : vector<1x256xf32> to vector<16x256xf32>
    %6 = arith.addf %3, %5 : vector<16x256xf32>
    %cst_5 = arith.constant 0.000000e+00 : f32
    %7 = vector.broadcast %cst_5 : f32 to vector<16x256xf32>
    %8 = arith.cmpf ogt, %6, %7 : vector<16x256xf32>
    %cst_6 = arith.constant 2.000000e-01 : f32
    %9 = vector.broadcast %cst_6 : f32 to vector<16x256xf32>
    %10 = arith.mulf %9, %6 : vector<16x256xf32>
    %11 = arith.select %8, %6, %10 : vector<16x256xi1>, vector<16x256xf32>
    %12 = arith.truncf %11 : vector<16x256xf32> to vector<16x256xbf16>
    %c0_7 = arith.constant 0 : index
    %c0_8 = arith.constant 0 : index
    %13 = vector.load %arg4[%c0_7, %c0_8] : memref<256x512xbf16, #tpu.memory_space<vmem>>, vector<256x512xbf16>
    %cst_9 = arith.constant dense<0.000000e+00> : vector<16x512xf32>
    %14 = tpu.matmul %12, %13, %cst_9 {dimension_numbers = #tpu.dot_dimension_numbers<[1], [0], [0], [1], [0, 0, 1, 1], [], []>} : vector<16x256xbf16>, vector<256x512xbf16>, vector<16x512xf32> -> vector<16x512xf32>
    %c0_10 = arith.constant 0 : index
    %c0_11 = arith.constant 0 : index
    %15 = vector.load %arg5[%c0_10, %c0_11] : memref<1x512xf32, #tpu.memory_space<vmem>>, vector<1x512xf32>
    %16 = vector.broadcast %15 : vector<1x512xf32> to vector<16x512xf32>
    %17 = arith.addf %14, %16 : vector<16x512xf32>
    %cst_12 = arith.constant 0.000000e+00 : f32
    %18 = vector.broadcast %cst_12 : f32 to vector<16x512xf32>
    %19 = arith.cmpf ogt, %17, %18 : vector<16x512xf32>
    %cst_13 = arith.constant 2.000000e-01 : f32
    %20 = vector.broadcast %cst_13 : f32 to vector<16x512xf32>
    %21 = arith.mulf %20, %17 : vector<16x512xf32>
    %22 = arith.select %19, %17, %21 : vector<16x512xi1>, vector<16x512xf32>
    %23 = arith.truncf %22 : vector<16x512xf32> to vector<16x512xbf16>
    %c0_14 = arith.constant 0 : index
    %c0_15 = arith.constant 0 : index
    %24 = vector.load %arg6[%c0_14, %c0_15] : memref<512x1024xbf16, #tpu.memory_space<vmem>>, vector<512x1024xbf16>
    %cst_16 = arith.constant dense<0.000000e+00> : vector<16x1024xf32>
    %25 = tpu.matmul %23, %24, %cst_16 {dimension_numbers = #tpu.dot_dimension_numbers<[1], [0], [0], [1], [0, 0, 1, 1], [], []>} : vector<16x512xbf16>, vector<512x1024xbf16>, vector<16x1024xf32> -> vector<16x1024xf32>
    %c0_17 = arith.constant 0 : index
    %c0_18 = arith.constant 0 : index
    %26 = vector.load %arg7[%c0_17, %c0_18] : memref<1x1024xf32, #tpu.memory_space<vmem>>, vector<1x1024xf32>
    %27 = vector.broadcast %26 : vector<1x1024xf32> to vector<16x1024xf32>
    %28 = arith.addf %25, %27 : vector<16x1024xf32>
    %cst_19 = arith.constant 0.000000e+00 : f32
    %29 = vector.broadcast %cst_19 : f32 to vector<16x1024xf32>
    %30 = arith.cmpf ogt, %28, %29 : vector<16x1024xf32>
    %cst_20 = arith.constant 2.000000e-01 : f32
    %31 = vector.broadcast %cst_20 : f32 to vector<16x1024xf32>
    %32 = arith.mulf %31, %28 : vector<16x1024xf32>
    %33 = arith.select %30, %28, %32 : vector<16x1024xi1>, vector<16x1024xf32>
    %34 = arith.truncf %33 : vector<16x1024xf32> to vector<16x1024xbf16>
    %c0_21 = arith.constant 0 : index
    %c0_22 = arith.constant 0 : index
    %35 = vector.load %arg8[%c0_21, %c0_22] : memref<1024x896xbf16, #tpu.memory_space<vmem>>, vector<1024x896xbf16>
    %cst_23 = arith.constant dense<0.000000e+00> : vector<16x896xf32>
    %36 = tpu.matmul %34, %35, %cst_23 {dimension_numbers = #tpu.dot_dimension_numbers<[1], [0], [0], [1], [0, 0, 1, 1], [], []>} : vector<16x1024xbf16>, vector<1024x896xbf16>, vector<16x896xf32> -> vector<16x896xf32>
    %c0_24 = arith.constant 0 : index
    %c0_25 = arith.constant 0 : index
    %37 = vector.load %arg9[%c0_24, %c0_25] : memref<1x896xf32, #tpu.memory_space<vmem>>, vector<1x896xf32>
    %38 = vector.broadcast %37 : vector<1x896xf32> to vector<16x896xf32>
    %39 = arith.addf %36, %38 : vector<16x896xf32>
    %40 = math.tanh %39 : vector<16x896xf32>
    %c0_26 = arith.constant 0 : index
    %c0_27 = arith.constant 0 : index
    %41 = vector.load %arg10[%c0_26, %c0_27] : memref<16x896xf32, #tpu.memory_space<vmem>>, vector<16x896xf32>
    tpu.vector_store %arg10[%c0_26, %c0_27], %40 {strides = array<i32>} : memref<16x896xf32, #tpu.memory_space<vmem>>, vector<16x896xf32>,
    return
  }
  func.func @transform_0(%arg0: i32) -> (i32, i32) {
    %c0_i32 = arith.constant 0 : i32
    %c0_i32_0 = arith.constant 0 : i32
    return %arg0, %c0_i32 : i32, i32
  }
  func.func @transform_1(%arg0: i32) -> (i32, i32) {
    %c0_i32 = arith.constant 0 : i32
    %c0_i32_0 = arith.constant 0 : i32
    %c0_i32_1 = arith.constant 0 : i32
    return %c0_i32, %c0_i32_0 : i32, i32
  }
  func.func @transform_2(%arg0: i32) -> (i32, i32) {
    %c0_i32 = arith.constant 0 : i32
    %c0_i32_0 = arith.constant 0 : i32
    %c0_i32_1 = arith.constant 0 : i32
    return %c0_i32, %c0_i32_0 : i32, i32
  }
  func.func @transform_3(%arg0: i32) -> (i32, i32) {
    %c0_i32 = arith.constant 0 : i32
    %c0_i32_0 = arith.constant 0 : i32
    %c0_i32_1 = arith.constant 0 : i32
    return %c0_i32, %c0_i32_0 : i32, i32
  }
  func.func @transform_4(%arg0: i32) -> (i32, i32) {
    %c0_i32 = arith.constant 0 : i32
    %c0_i32_0 = arith.constant 0 : i32
    %c0_i32_1 = arith.constant 0 : i32
    return %c0_i32, %c0_i32_0 : i32, i32
  }
  func.func @transform_5(%arg0: i32) -> (i32, i32) {
    %c0_i32 = arith.constant 0 : i32
    %c0_i32_0 = arith.constant 0 : i32
    %c0_i32_1 = arith.constant 0 : i32
    return %c0_i32, %c0_i32_0 : i32, i32
  }
  func.func @transform_6(%arg0: i32) -> (i32, i32) {
    %c0_i32 = arith.constant 0 : i32
    %c0_i32_0 = arith.constant 0 : i32
    %c0_i32_1 = arith.constant 0 : i32
    return %c0_i32, %c0_i32_0 : i32, i32
  }
  func.func @transform_7(%arg0: i32) -> (i32, i32) {
    %c0_i32 = arith.constant 0 : i32
    %c0_i32_0 = arith.constant 0 : i32
    %c0_i32_1 = arith.constant 0 : i32
    return %c0_i32, %c0_i32_0 : i32, i32
  }
  func.func @transform_8(%arg0: i32) -> (i32, i32) {
    %c0_i32 = arith.constant 0 : i32
    %c0_i32_0 = arith.constant 0 : i32
    %c0_i32_1 = arith.constant 0 : i32
    return %c0_i32, %c0_i32_0 : i32, i32
  }
  func.func @transform_9(%arg0: i32) -> (i32, i32) {
    %c0_i32 = arith.constant 0 : i32
    %c0_i32_0 = arith.constant 0 : i32
    return %arg0, %c0_i32 : i32, i32
  }
}

</mosaic_0001>

<bundles_post_ra>
// kernel: generate_forward.1
= control target key start
LH: loop header
LB: loop body
LE: loop exit
PB: predicated region body
PF: predicated region fallthrough
CT: control target
= control target key end

     0   :  { %14 = vsyncpa [#allocation3], 0  ;;  %s9226_s0 = inlined_call_operand.vmem [shape: f32[32,128], index: 0, kind: input, shape index: {}]   ;;  %s9227_s1 = inlined_call_operand.hbm [shape: bf16[128,256], index: 1, kind: input, shape index: {}]   ;;  %s9228_s2 = inlined_call_operand.hbm [shape: f32[1,256], index: 2, kind: input, shape index: {}]   ;;  %s9229_s3 = inlined_call_operand.hbm [shape: bf16[256,512], index: 3, kind: input, shape index: {}]   ;;  %s9230_s4 = inlined_call_operand.hbm [shape: f32[1,512], index: 4, kind: input, shape index: {}]   ;;  %s9231_s5 = inlined_call_operand.hbm [shape: bf16[512,1024], index: 5, kind: input, shape index: {}]   ;;  %s9232_s6 = inlined_call_operand.hbm [shape: f32[1,1024], index: 6, kind: input, shape index: {}]   ;;  %s9233_s7 = inlined_call_operand.hbm [shape: bf16[1024,896], index: 7, kind: input, shape index: {}]   ;;  %s9234_s8 = inlined_call_operand.hbm [shape: f32[1,896], index: 8, kind: input, shape index: {}]   ;;  %s9235_s9 = inlined_call_operand.vmem [shape: f32[32,896], index: 9, kind: output, shape index: {}]  }
   0x1   :  { %15 = vsyncpa [#allocation5], 0 }
   0x2   :  { %16 = vsyncpa [#allocation8], 0 }
   0x3   :  { %17 = vsyncpa [#allocation11], 0 }
   0x4   :  { %18 = vsyncpa [#allocation14], 0  ;;  %s8901_s30 = smov 0  }
   0x5 LB: > { %s8834_s10 = smov [#allocation4]   ;;  %s6812_s12 = sadd.s32 4294967295, %s8832_s30   ;;  %s8832_s30 = sphi %s8901_s30, %s24_s30  }
   0x6   : > { %s275_s11 = sshll.u32 %s8834_s10, 4  ;;  %p6814_p0 = scmp.ge.s32.totalorder %s8832_s30, 1  ;;  %s276_s11 = int_to_ptr.vmem [resolvable:$true] %s275_s11 }
   0x7   : > { %p249_p1 = scmp.lt.s32.totalorder %s8832_s30, 3  ;;  %p8911_p2 = scmp.eq.s32.totalorder %s6812_s12, 0 }
   0x8   : > { %s8835_s15 = smov [#allocation7]   ;;  %s8836_s17 = smov [#allocation10]  }
   0x9   : > { %s9239_s13 = scalar_select %p8911_p2, 1, 0 }
   0xa   : > { %p8915_p3 = pnand %p6814_p0, %p249_p1  ;;  %s299_s16 = sshll.u32 %s8835_s15, 4  ;;  %s300_s16 = int_to_ptr.vmem [resolvable:$true] %s299_s16 }
   0xb   : > { %s323_s18 = sshll.u32 %s8836_s17, 4  ;;  %s8837_s20 = smov [#allocation2]   ;;  %s8927_s18 = int_to_ptr.vmem [resolvable:$true] %s323_s18 }
   0xc   : > { %s9240_s14 = scalar_select %p8915_p3, 1, 0 }
   0xd   : > { %p7744_p4 = pneg %p8915_p3  ;;  %s261_s21 = sshll.u32 %s8837_s20, 4  ;;  %s8929_s21 = int_to_ptr.vmem [resolvable:$true] %s261_s21 }
   0xe   : > { %s8609_s23 = scalar_lea.vmem %s276_s11, 32  ;;  %p8617_p10 = scmp.lt.s32.totalorder %s276_s11, %s276_s11 }
   0xf   : > { %p8923_p5 = pnand %p8911_p2, %p7744_p4  ;;  %p8610_p7 = scmp.ne.s32.totalorder %s276_s11, %s8609_s23 }
  0x10   : > { %p8618_p11 = scmp.lt.s32.totalorder %s8609_s23, %s8609_s23 }
  0x11   : > { %p8933_p6 = pneg %p8923_p5 }
  0x12   : > { %p8619_p12 = por %p8618_p11, %p8617_p10 }
  0x13   : > { %p8612_p8 = pnand %p8610_p7, %p8933_p6 }
  0x15   : > { %p8613_p9 = pneg %p8612_p8 }
  0x17   : > { %p8620_p13 = pnand %p8619_p12, %p8613_p9 }
  0x19   : > { %8623 = shalt.err (!%p8620_p13)
}
  0x1a   : > { %7750 = dma.hbm_to_vmem [thread:$0]  (!%p8923_p5), %s9228_s2, 32, %s276_s11, [#allocation5]  }
  0x1b   : > { %s8635_s26 = scalar_lea.vmem %s300_s16, 64  ;;  %p8643_p2 = scmp.lt.s32.totalorder %s300_s16, %s300_s16 }
  0x1c   : > { %p8636_p0 = scmp.ne.s32.totalorder %s300_s16, %s8635_s26  ;;  %p8644_p7 = scmp.lt.s32.totalorder %s8635_s26, %s8635_s26 }
  0x1e   : > { %p8638_p1 = pnand %p8636_p0, %p8933_p6  ;;  %p8645_p8 = por %p8644_p7, %p8643_p2 }
  0x20   : > { %p8639_p4 = pneg %p8638_p1 }
  0x22   : > { %p8646_p3 = pnand %p8645_p8, %p8639_p4 }
  0x24   : > { %8649 = shalt.err (!%p8646_p3)
}
  0x25   : > { %7756 = dma.hbm_to_vmem [thread:$0]  (!%p8923_p5), %s9230_s4, 64, %s300_s16, [#allocation8]  }
  0x26   : > { %s8661_s29 = scalar_lea.vmem %s8927_s18, 128  ;;  %p8669_p12 = scmp.lt.s32.totalorder %s8927_s18, %s8927_s18 }
  0x27   : > { %p8662_p9 = scmp.ne.s32.totalorder %s8927_s18, %s8661_s29  ;;  %p8670_p2 = scmp.lt.s32.totalorder %s8661_s29, %s8661_s29 }
  0x29   : > { %p8664_p10 = pnand %p8662_p9, %p8933_p6  ;;  %p8671_p13 = por %p8670_p2, %p8669_p12 }
  0x2b   : > { %p8665_p11 = pneg %p8664_p10 }
  0x2d   : > { %p8672_p3 = pnand %p8671_p13, %p8665_p11 }
  0x2f   : > { %8675 = shalt.err (!%p8672_p3)
}
  0x30   : > { %7762 = dma.hbm_to_vmem [thread:$0]  (!%p8923_p5), %s9232_s6, 128, %s8927_s18, [#allocation11]  }
  0x31   : > { %s8687_s15 = scalar_lea.vmem %s8929_s21, 2048  ;;  %p8695_p7 = scmp.lt.s32.totalorder %s8929_s21, %s8929_s21 }
  0x32   : > { %p8688_p0 = scmp.ne.s32.totalorder %s8929_s21, %s8687_s15  ;;  %p8696_p8 = scmp.lt.s32.totalorder %s8687_s15, %s8687_s15 }
  0x34   : > { %p8690_p1 = pnand %p8688_p0, %p8933_p6  ;;  %p8697_p9 = por %p8696_p8, %p8695_p7 }
  0x36   : > { %p8691_p4 = pneg %p8690_p1 }
  0x38   : > { %p8698_p10 = pnand %p8697_p9, %p8691_p4 }
  0x3a   : > { %8701 = shalt.err (!%p8698_p10)
}
  0x3b   : > { %s8838_s16 = smov 128   ;;  %s8839_s17 = smov 8  }
  0x3c   : > { %7747 = dma.hbm_to_vmem [thread:$0]  (!%p8923_p5), %s9227_s1, 2048, %s8929_s21, [#allocation3], %s8838_s16, %s8838_s16, %s8839_s17  }
  0x3d   : > { %s8840_s18 = smov [#allocation6]  }
  0x3e   : > { %s285_s24 = sshll.u32 %s8840_s18, 4  ;;  %s286_s24 = int_to_ptr.vmem [resolvable:$true] %s285_s24 }
  0x3f   : > { %s8713_s25 = scalar_lea.vmem %s286_s24, 8192  ;;  %p8721_p13 = scmp.lt.s32.totalorder %s286_s24, %s286_s24 }
  0x40   : > { %p8714_p11 = scmp.ne.s32.totalorder %s286_s24, %s8713_s25  ;;  %p8722_p3 = scmp.lt.s32.totalorder %s8713_s25, %s8713_s25 }
  0x42   : > { %p8716_p12 = pnand %p8714_p11, %p8933_p6  ;;  %p8723_p0 = por %p8722_p3, %p8721_p13 }
  0x44   : > { %p8717_p2 = pneg %p8716_p12 }
  0x46   : > { %p8724_p1 = pnand %p8723_p0, %p8717_p2 }
  0x48   : > { %8727 = shalt.err (!%p8724_p1)
}
  0x49   : > { %s8841_s26 = smov 256   ;;  %s8842_s27 = smov 16  }
  0x4a   : > { %7753 = dma.hbm_to_vmem [thread:$0]  (!%p8923_p5), %s9229_s3, 8192, %s286_s24, [#allocation5], %s8841_s26, %s8841_s26, %s8842_s27  }
  0x4b   : > { %s8843_s29 = smov [#allocation9]  }
  0x4c   : > { %s309_s10 = sshll.u32 %s8843_s29, 4  ;;  %s310_s10 = int_to_ptr.vmem [resolvable:$true] %s309_s10 }
  0x4d   : > { %s8739_s11 = scalar_lea.vmem %s310_s10, 32768  ;;  %p8747_p9 = scmp.lt.s32.totalorder %s310_s10, %s310_s10 }
  0x4e   : > { %p8740_p4 = scmp.ne.s32.totalorder %s310_s10, %s8739_s11  ;;  %p8748_p10 = scmp.lt.s32.totalorder %s8739_s11, %s8739_s11 }
  0x50   : > { %p8742_p7 = pnand %p8740_p4, %p8933_p6  ;;  %p8749_p11 = por %p8748_p10, %p8747_p9 }
  0x52   : > { %p8743_p8 = pneg %p8742_p7 }
  0x54   : > { %p8750_p12 = pnand %p8749_p11, %p8743_p8 }
  0x56   : > { %8753 = shalt.err (!%p8750_p12)
}
  0x57   : > { %s8844_s15 = smov 512   ;;  %s8845_s16 = smov 32  }
  0x58   : > { %7759 = dma.hbm_to_vmem [thread:$0]  (!%p8923_p5), %s9231_s5, 32768, %s310_s10, [#allocation8], %s8844_s15, %s8844_s15, %s8845_s16  }
  0x59   : > { %s8846_s23 = smov [#allocation12]  }
  0x5a   : > { %s333_s18 = sshll.u32 %s8846_s23, 4  ;;  %s334_s18 = int_to_ptr.vmem [resolvable:$true] %s333_s18 }
  0x5b   : > { %s8765_s24 = scalar_lea.vmem %s334_s18, 57344  ;;  %p8773_p0 = scmp.lt.s32.totalorder %s334_s18, %s334_s18 }
  0x5c   : > { %p8766_p2 = scmp.ne.s32.totalorder %s334_s18, %s8765_s24  ;;  %p8774_p1 = scmp.lt.s32.totalorder %s8765_s24, %s8765_s24 }
  0x5e   : > { %p8768_p13 = pnand %p8766_p2, %p8933_p6  ;;  %p8775_p4 = por %p8774_p1, %p8773_p0 }
  0x60   : > { %p8769_p3 = pneg %p8768_p13 }
  0x62   : > { %p8776_p7 = pnand %p8775_p4, %p8769_p3 }
  0x64   : > { %8779 = shalt.err (!%p8776_p7)
}
  0x65   : > { %s8847_s25 = smov 448   ;;  %s8848_s26 = smov 28  }
  0x66   : > { %7765 = dma.hbm_to_vmem [thread:$0]  (!%p8923_p5), %s9233_s7, 57344, %s334_s18, [#allocation11], %s8847_s25, %s8847_s25, %s8848_s26  }
  0x67   : > { %s8849_s21 = smov [#allocation13]  }
  0x68   : > { %s347_s29 = sshll.u32 %s8849_s21, 4  ;;  %s348_s29 = int_to_ptr.vmem [resolvable:$true] %s347_s29 }
  0x69   : > { %s8791_s10 = scalar_lea.vmem %s348_s29, 112  ;;  %s8798_s11 = scalar_lea.vmem %s348_s29, 128 }
  0x6a   : > { %p8792_p8 = scmp.ne.s32.totalorder %s348_s29, %s8791_s10  ;;  %p8799_p11 = scmp.lt.s32.totalorder %s348_s29, %s348_s29 }
  0x6b   : > { %p8800_p12 = scmp.lt.s32.totalorder %s8798_s11, %s8791_s10 }
  0x6c   : > { %p8794_p9 = pnand %p8792_p8, %p8933_p6 }
  0x6d   : > { %p8801_p2 = por %p8800_p12, %p8799_p11 }
  0x6e   : > { %p8795_p10 = pneg %p8794_p9 }
  0x70   : > { %p8802_p13 = pnand %p8801_p2, %p8795_p10 }
  0x72   : > { %8805 = shalt.err (!%p8802_p13)
}
  0x73   : > { %7768 = dma.hbm_to_vmem [thread:$0]  (!%p8923_p5), %s9234_s8, 112, %s348_s29, [#allocation14]  }
  0x74   : > { %p9243_p3 = scmp.ne.s32.totalorder %s9240_s14, 0 }
  0x75   : > { %p9244_p0 = scmp.ne.s32.totalorder (!%p9243_p3), %s9239_s13, 0 }
  0x76   : > { %369 = sbr.rel (%p9243_p3) target bundleno = 1518 (0x5ee), region = 56 }
  0x7b   : > { %8811 = dma.done.wait (%p9244_p0), [#allocation3], 2048  }
  0x7c   : > { %8813 = vsyncadd (%p9244_p0), [#allocation3], 4294965248 }
  0x7d   : > { %8815 = dma.done.wait (%p9244_p0), [#allocation5], 8224  }
  0x7e   : > { %8817 = vsyncadd (%p9244_p0), [#allocation5], 4294959072 }
  0x7f   : > { %8819 = dma.done.wait (%p9244_p0), [#allocation8], 32832  }
  0x80   : > { %8821 = vsyncadd (%p9244_p0), [#allocation8], 4294934464 }
  0x81   : > { %8823 = dma.done.wait (%p9244_p0), [#allocation11], 57472  }
  0x82   : > { %8825 = vsyncadd (%p9244_p0), [#allocation11], 4294909824 }
  0x83   : > { %8827 = dma.done.wait (%p9244_p0), [#allocation14], 112  }
  0x84   : > { %8829 = vsyncadd (%p9244_p0), [#allocation14], 4294967184  ;;  %v8850_v0 = vmov 0   ;;  %v7810_v1 = vld [vmem:[#allocation2 + $0x74] ss:$8 sps:$4 sm:$0xff]   ;;  %s6833_s14 = sshll.u32 %s6812_s12, 1 }
  0x85   : > { %591 = vmatprep.mubr.bf16.mxu0 %v8850_v0  ;;  %v7812_v2 = vld [vmem:[#allocation2 + $0x70] ss:$8 sps:$4 sm:$0xff]   ;;  %559 = vmatprep.subr.bf16.mxu0 %v7810_v1  ;;  %v7813_v3 = vld [vmem:[#allocation2 + $0x64] ss:$8 sps:$4 sm:$0xff]   ;;  %v7815_v4 = vld [vmem:[#allocation2 + $0x60] ss:$8 sps:$4 sm:$0xff]  }
  0x86   : > { %560 = vmatpush1.bf16.msra.mxu0 %v7812_v2  ;;  %v7816_v5 = vld [vmem:[#allocation2 + $0x54] ss:$8 sps:$4 sm:$0xff]   ;;  %v7818_v6 = vld [vmem:[#allocation2 + $0x50] ss:$8 sps:$4 sm:$0xff]   ;;  %v7819_v7 = vld [vmem:[#allocation2 + $0x44] ss:$8 sps:$4 sm:$0xff]  }
  0x87   : > { %561 = vmatprep.subr.bf16.mxu0 %v7813_v3  ;;  %v7821_v8 = vld [vmem:[#allocation2 + $0x40] ss:$8 sps:$4 sm:$0xff]   ;;  %v7822_v9 = vld [vmem:[#allocation2 + $0x34] ss:$8 sps:$4 sm:$0xff]   ;;  %p435_p5 = scmp.lt.s32.totalorder %s6833_s14, 3 }
  0x88   : > { %v7834_v10 = vld [vmem:[#allocation6 + $0xe4] ss:$16 sps:$4 sm:$0xff]   ;;  %v7839_v11 = vld [vmem:[#allocation6 + $0xe0] ss:$16 sps:$4 sm:$0xff]   ;;  %v7838_v28 = vld [vmem:[#allocation6 + $0xec] ss:$16 sps:$4 sm:$0xff]  }
  0x89   : > { %1022 = vmatprep.subr.bf16.mxu1 %v7834_v10  ;;  %v7840_v12 = vld [vmem:[#allocation6 + $0xc4] ss:$16 sps:$4 sm:$0xff]   ;;  %s9246_s14 = smov (!%p435_p5, %s6833_s14), 3  ;;  %v7845_v15 = vld [vmem:[#allocation6 + $0xc0] ss:$16 sps:$4 sm:$0xff]  }
  0x8a   : > { %562 = vmatpush1.bf16.msra.mxu0 %v7815_v4  ;;  %v7824_v13 = vld [vmem:[#allocation2 + $0x30] ss:$8 sps:$4 sm:$0xff]   ;;  %1023 = vmatpush1.bf16.msra.mxu1 %v7839_v11  ;;  %v7825_v14 = vld [vmem:[#allocation2 + $0x24] ss:$8 sps:$4 sm:$0xff]   ;;  %v7827_v17 = vld [vmem:[#allocation2 + $0x20] ss:$8 sps:$4 sm:$0xff]  }
  0x8b   : > { %563 = vmatprep.subr.bf16.mxu0 %v7816_v5  ;;  %1024 = vmatprep.subr.bf16.mxu1 %v7840_v12  ;;  %v7846_v16 = vld [vmem:[#allocation6 + $0xa4] ss:$16 sps:$4 sm:$0xff]   ;;  %s6834_s12 = sshll.u32 %s9246_s14, 3  ;;  %v7851_v19 = vld [vmem:[#allocation6 + $0xa0] ss:$16 sps:$4 sm:$0xff]   ;;  %s7711_s17 = smul.u32 56, %s9246_s14 }
  0x8c   : > { %v7828_v18 = vld [vmem:[#allocation2 + $0x14] ss:$8 sps:$4 sm:$0xff]   ;;  %v7830_v21 = vld [vmem:[#allocation2 + $0x10] ss:$8 sps:$4 sm:$0xff]   ;;  %s438_s22 = scalar_lea.vmem %s9226_s0, %s6834_s12  ;;  %v7831_v23 = vld [vmem:[#allocation2 + $0x4] ss:$8 sps:$4 sm:$0xff]  }
  0x8d   : > { %v7852_v20 = vld [vmem:[#allocation6 + $0x84] ss:$16 sps:$4 sm:$0xff]   ;;  %v7857_v22 = vld [vmem:[#allocation6 + $0x80] ss:$16 sps:$4 sm:$0xff]   ;;  %v7836_v32 = vld [vmem:[#allocation6 + $0xe8] ss:$16 sps:$4 sm:$0xff]   ;;  %s9186_s18 = scalar_lea.vmem %s9235_s9, %s7711_s17 }
  0x8e   : > { %564 = vmatpush1.bf16.msra.mxu0 %v7818_v6  ;;  %1025 = vmatpush1.bf16.msra.mxu1 %v7845_v15  ;;  %v7858_v24 = vld [vmem:[#allocation6 + $0x64] ss:$16 sps:$4 sm:$0xff]   ;;  %v7863_v29 = vld [vmem:[#allocation6 + $0x60] ss:$16 sps:$4 sm:$0xff]   ;;  %v7844_v34 = vld [vmem:[#allocation6 + $0xcc] ss:$16 sps:$4 sm:$0xff]  }
  0x8f   : > { %565 = vmatprep.subr.bf16.mxu0 %v7819_v7  ;;  %1026 = vmatprep.subr.bf16.mxu1 %v7846_v16  ;;  %v7833_v25 = vld [vmem:[#allocation2] ss:$8 sps:$4 sm:$0xff]  }
  0x90   : > { %v448_v26 = vld [vmem:[%s438_s22] sm:$0xff]  ;;  %v449_v27 = vld [vmem:[%s438_s22 + $0x8] sm:$0xff] }
  0x91   : > { %v7864_v30 = vld [vmem:[#allocation6 + $0x44] ss:$16 sps:$4 sm:$0xff]   ;;  %v450_v31 = vpack.c.bf16 %v449_v27, %v448_v26  ;;  %v7869_v33 = vld [vmem:[#allocation6 + $0x40] ss:$16 sps:$4 sm:$0xff]   ;;  %v7842_v36 = vld [vmem:[#allocation6 + $0xc8] ss:$16 sps:$4 sm:$0xff]  }
  0x92   : > { %566 = vmatpush1.bf16.msra.mxu0 %v7821_v8  ;;  %1027 = vmatpush1.bf16.msra.mxu1 %v7851_v19  ;;  %v7870_v35 = vld [vmem:[#allocation6 + $0x24] ss:$16 sps:$4 sm:$0xff]   ;;  %v7850_v37 = vld [vmem:[#allocation6 + $0xac] ss:$16 sps:$4 sm:$0xff]   ;;  %v7875_v38 = vld [vmem:[#allocation6 + $0x20] ss:$16 sps:$4 sm:$0xff]  }
  0x93   : > { %567 = vmatprep.subr.bf16.mxu0 %v7822_v9  ;;  %1028 = vmatprep.subr.bf16.mxu1 %v7852_v20  ;;  %v7876_v39 = vld [vmem:[#allocation6 + $0x4] ss:$16 sps:$4 sm:$0xff]   ;;  %v7848_v40 = vld [vmem:[#allocation6 + $0xa8] ss:$16 sps:$4 sm:$0xff]   ;;  %v7881_v41 = vld [vmem:[#allocation6] ss:$16 sps:$4 sm:$0xff]  }
  0x94   : > { %v7856_v42 = vld [vmem:[#allocation6 + $0x8c] ss:$16 sps:$4 sm:$0xff]   ;;  %v7882_v43 = vld [vmem:[#allocation6 + $0x1e4] ss:$16 sps:$4 sm:$0xff]   ;;  %v7854_v44 = vld [vmem:[#allocation6 + $0x88] ss:$16 sps:$4 sm:$0xff]  }
  0x95   : > { %v7862_v45 = vld [vmem:[#allocation6 + $0x6c] ss:$16 sps:$4 sm:$0xff]   ;;  %v7887_v46 = vld [vmem:[#allocation6 + $0x1e0] ss:$16 sps:$4 sm:$0xff]   ;;  %v7888_v47 = vld [vmem:[#allocation6 + $0x1c4] ss:$16 sps:$4 sm:$0xff]  }
  0x96   : > { %568 = vmatpush1.bf16.msra.mxu0 %v7824_v13  ;;  %1029 = vmatpush1.bf16.msra.mxu1 %v7857_v22  ;;  %v7860_v48 = vld [vmem:[#allocation6 + $0x68] ss:$16 sps:$4 sm:$0xff]   ;;  %v7893_v49 = vld [vmem:[#allocation6 + $0x1c0] ss:$16 sps:$4 sm:$0xff]   ;;  %v7868_v50 = vld [vmem:[#allocation6 + $0x4c] ss:$16 sps:$4 sm:$0xff]  }
  0x97   : > { %569 = vmatprep.subr.bf16.mxu0 %v7825_v14  ;;  %1030 = vmatprep.subr.bf16.mxu1 %v7858_v24  ;;  %v7894_v51 = vld [vmem:[#allocation6 + $0x1a4] ss:$16 sps:$4 sm:$0xff]   ;;  %v7866_v52 = vld [vmem:[#allocation6 + $0x48] ss:$16 sps:$4 sm:$0xff]   ;;  %v7899_v53 = vld [vmem:[#allocation6 + $0x1a0] ss:$16 sps:$4 sm:$0xff]  }
  0x98   : > { %v7874_v54 = vld [vmem:[#allocation6 + $0x2c] ss:$16 sps:$4 sm:$0xff]   ;;  %v7900_v55 = vld [vmem:[#allocation6 + $0x184] ss:$16 sps:$4 sm:$0xff]   ;;  %v7872_v56 = vld [vmem:[#allocation6 + $0x28] ss:$16 sps:$4 sm:$0xff]  }
  0x99   : > { %v7905_v57 = vld [vmem:[#allocation6 + $0x180] ss:$16 sps:$4 sm:$0xff]   ;;  %v7880_v58 = vld [vmem:[#allocation6 + $0xc] ss:$16 sps:$4 sm:$0xff]   ;;  %v7906_v59 = vld [vmem:[#allocation6 + $0x164] ss:$16 sps:$4 sm:$0xff]  }
  0x9a   : > { %570 = vmatpush1.bf16.msra.mxu0 %v7827_v17  ;;  %1031 = vmatpush1.bf16.msra.mxu1 %v7863_v29  ;;  %v7878_v60 = vld [vmem:[#allocation6 + $0x8] ss:$16 sps:$4 sm:$0xff]   ;;  %v7886_v61 = vld [vmem:[#allocation6 + $0x1ec] ss:$16 sps:$4 sm:$0xff]   ;;  %v7911_v7 = vld [vmem:[#allocation6 + $0x160] ss:$16 sps:$4 sm:$0xff]  }
  0x9b   : > { %571 = vmatprep.subr.bf16.mxu0 %v7828_v18  ;;  %1032 = vmatprep.subr.bf16.mxu1 %v7864_v30  ;;  %v7884_v62 = vld [vmem:[#allocation6 + $0x1e8] ss:$16 sps:$4 sm:$0xff]   ;;  %v7892_v63 = vld [vmem:[#allocation6 + $0x1cc] ss:$16 sps:$4 sm:$0xff]   ;;  %v7912_v8 = vld [vmem:[#allocation6 + $0x144] ss:$16 sps:$4 sm:$0xff]  }
  0x9c   : > { %v7890_v0 = vld [vmem:[#allocation6 + $0x1c8] ss:$16 sps:$4 sm:$0xff]   ;;  %v7898_v1 = vld [vmem:[#allocation6 + $0x1ac] ss:$16 sps:$4 sm:$0xff]   ;;  %v7917_v11 = vld [vmem:[#allocation6 + $0x140] ss:$16 sps:$4 sm:$0xff]  }
  0x9d   : > { %v7896_v2 = vld [vmem:[#allocation6 + $0x1a8] ss:$16 sps:$4 sm:$0xff]   ;;  %v7904_v3 = vld [vmem:[#allocation6 + $0x18c] ss:$16 sps:$4 sm:$0xff]   ;;  %v7918_v12 = vld [vmem:[#allocation6 + $0x124] ss:$16 sps:$4 sm:$0xff]  }
  0x9e   : > { %572 = vmatpush1.bf16.msra.mxu0 %v7830_v21  ;;  %1033 = vmatpush1.bf16.msra.mxu1 %v7869_v33  ;;  %v7902_v4 = vld [vmem:[#allocation6 + $0x188] ss:$16 sps:$4 sm:$0xff]   ;;  %v7910_v5 = vld [vmem:[#allocation6 + $0x16c] ss:$16 sps:$4 sm:$0xff]   ;;  %v7923_v15 = vld [vmem:[#allocation6 + $0x120] ss:$16 sps:$4 sm:$0xff]  }
  0x9f   : > { %573 = vmatprep.subr.bf16.mxu0 %v7831_v23  ;;  %1034 = vmatprep.subr.bf16.mxu1 %v7870_v35  ;;  %v7908_v6 = vld [vmem:[#allocation6 + $0x168] ss:$16 sps:$4 sm:$0xff]   ;;  %v7916_v9 = vld [vmem:[#allocation6 + $0x14c] ss:$16 sps:$4 sm:$0xff]   ;;  %v7924_v16 = vld [vmem:[#allocation6 + $0x104] ss:$16 sps:$4 sm:$0xff]  }
  0xa0   : > { %v7914_v10 = vld [vmem:[#allocation6 + $0x148] ss:$16 sps:$4 sm:$0xff]   ;;  %v7922_v13 = vld [vmem:[#allocation6 + $0x12c] ss:$16 sps:$4 sm:$0xff]   ;;  %v7929_v19 = vld [vmem:[#allocation6 + $0x100] ss:$16 sps:$4 sm:$0xff]  }
  0xa1   : > { %v7920_v14 = vld [vmem:[#allocation6 + $0x128] ss:$16 sps:$4 sm:$0xff]   ;;  %v7928_v18 = vld [vmem:[#allocation6 + $0x10c] ss:$16 sps:$4 sm:$0xff]  }
  0xa2   : > { %574 = vmatpush1.bf16.msra.mxu0 %v7833_v25  ;;  %1035 = vmatpush1.bf16.msra.mxu1 %v7875_v38  ;;  %v7926_v17 = vld [vmem:[#allocation6 + $0x108] ss:$16 sps:$4 sm:$0xff]   ;;  %v467_v30 = vld [vmem:[#allocation4] sm:$0x3] }
  0xa3   : > { %1065 = vmatprep.subr.bf16.mxu0 %v7838_v28  ;;  %1036 = vmatprep.subr.bf16.mxu1 %v7876_v39  ;;  %v1192_v20 = vld [vmem:[#allocation9 + $0x1c0] sm:$0xff]  ;;  %v469_v28 = vlaneseq }
  0xa4   : > { %v1196_v21 = vld [vmem:[#allocation9 + $0x1e0] sm:$0xff] }
  0xa5   : > { %592 = vmatmul.mubr.bf16.vlgmr.msra.gmra.mxu0 %v450_v31  ;;  %v1320_v22 = vld [vmem:[#allocation9 + $0x5c0] sm:$0xff]  ;;  %v6973_v23 = vcombine.low %v1192_v20, %v1196_v21  ;;  %v6974_v24 = vcombine.high %v1192_v20, %v1196_v21  ;;  %v9033_v29 = vshrl.u32 %v469_v28, 7 }
  0xa6   : > { %1066 = vmatpush1.bf16.msra.mxu0 %v7836_v32  ;;  %1037 = vmatpush1.bf16.msra.mxu1 %v7881_v41  ;;  %v1324_v25 = vld [vmem:[#allocation9 + $0x5e0] sm:$0xff] }
  0xa7   : > { %1067 = vmatprep.subr.bf16.mxu0 %v7844_v34  ;;  %1038 = vmatprep.subr.bf16.mxu1 %v7882_v43  ;;  %v7101_v26 = vcombine.low %v1320_v22, %v1324_v25  ;;  %v7102_v27 = vcombine.high %v1320_v22, %v1324_v25  ;;  %v9036_v31 = vsub.s32 0, %v9033_v29  ;;  %v9039_v32 = vsub.s32 1, %v9033_v29  ;;  %v1156_v20 = vld [vmem:[#allocation9 + $0xa0] sm:$0xff] }
  0xa8   : > { %v1280_v21 = vld [vmem:[#allocation9 + $0x480] sm:$0xff] }
  0xa9   : > { %v472_v33 = vrot.slane %v467_v30, %v9036_v31  ;;  %v476_v34 = vrot.slane %v467_v30, %v9039_v32  ;;  %v1284_v22 = vld [vmem:[#allocation9 + $0x4a0] sm:$0xff] }
  0xaa   : > { %1068 = vmatpush1.bf16.msra.mxu0 %v7842_v36  ;;  %1039 = vmatpush2.bf16.msra.mxu1 %v7887_v46  ;;  %v1184_v46 = vld [vmem:[#allocation9 + $0x180] sm:$0xff] }
  0xab   : > { %1069 = vmatprep.subr.bf16.mxu0 %v7850_v37  ;;  %1040 = vmatprep.subr.bf16.mxu1 %v7888_v47  ;;  %v1188_v47 = vld [vmem:[#allocation9 + $0x1a0] sm:$0xff] }
  0xac   : > { %v1148_v28 = vld [vmem:[#allocation9 + $0x60] sm:$0xff] }
  0xad   : > { %v1272_v30 = vld [vmem:[#allocation9 + $0x440] sm:$0xff] }
  0xae   : > { %1070 = vmatpush1.bf16.msra.mxu0 %v7848_v40  ;;  %1041 = vmatpush2.bf16.msra.mxu1 %v7893_v49  ;;  %v1316_v49 = vld [vmem:[#allocation9 + $0x5a0] sm:$0xff] }
  0xaf   : > { %1071 = vmatprep.subr.bf16.mxu0 %v7856_v42  ;;  %1042 = vmatprep.subr.bf16.mxu1 %v7894_v51 }
  0xb2   : > { %1072 = vmatpush1.bf16.msra.mxu0 %v7854_v44  ;;  %1043 = vmatpush2.bf16.msra.mxu1 %v7899_v53 }
  0xb3   : > { %1073 = vmatprep.subr.bf16.mxu0 %v7862_v45  ;;  %1044 = vmatprep.subr.bf16.mxu1 %v7900_v55 }
  0xb6   : > { %1074 = vmatpush1.bf16.msra.mxu0 %v7860_v48  ;;  %1045 = vmatpush2.bf16.msra.mxu1 %v7905_v57  ;;  %v1312_v48 = vld [vmem:[#allocation9 + $0x580] sm:$0xff] }
  0xb7   : > { %1075 = vmatprep.subr.bf16.mxu0 %v7868_v50  ;;  %1046 = vmatprep.subr.bf16.mxu1 %v7906_v59  ;;  %v1180_v57 = vld [vmem:[#allocation9 + $0x160] sm:$0xff] }
  0xb8   : > { %v1308_v59 = vld [vmem:[#allocation9 + $0x560] sm:$0xff] }
  0xba   : > { %1076 = vmatpush1.bf16.msra.mxu0 %v7866_v52  ;;  %1047 = vmatpush2.bf16.msra.mxu1 %v7911_v7 }
  0xbb   : > { %1077 = vmatprep.subr.bf16.mxu0 %v7874_v54  ;;  %1048 = vmatprep.subr.bf16.mxu1 %v7912_v8 }
  0xbe   : > { %1078 = vmatpush1.bf16.msra.mxu0 %v7872_v56  ;;  %1049 = vmatpush2.bf16.msra.mxu1 %v7917_v11  ;;  %v1176_v56 = vld [vmem:[#allocation9 + $0x140] sm:$0xff] }
  0xbf   : > { %1079 = vmatprep.subr.bf16.mxu0 %v7880_v58  ;;  %1050 = vmatprep.subr.bf16.mxu1 %v7918_v12  ;;  %v1304_v58 = vld [vmem:[#allocation9 + $0x540] sm:$0xff]  ;;  %v6957_v7 = vcombine.low %v1176_v56, %v1180_v57 }
  0xc0   : > { %v7085_v8 = vcombine.low %v1304_v58, %v1308_v59  ;;  %v1160_v11 = vld [vmem:[#allocation9 + $0xc0] sm:$0xff] }
  0xc1   : > { %v1164_v12 = vld [vmem:[#allocation9 + $0xe0] sm:$0xff] }
  0xc2   : > { %1080 = vmatpush1.bf16.msra.mxu0 %v7878_v60  ;;  %1051 = vmatpush2.bf16.msra.mxu1 %v7923_v15 }
  0xc3   : > { %1081 = vmatprep.subr.bf16.mxu0 %v7886_v61  ;;  %1052 = vmatprep.subr.bf16.mxu1 %v7924_v16  ;;  %v6966_v61 = vcombine.high %v1184_v46, %v1188_v47 }
  0xc6   : > { %1082 = vmatpush2.bf16.msra.mxu0 %v7884_v62  ;;  %1053 = vmatpush2.bf16.msra.mxu1 %v7929_v19  ;;  %v7094_v62 = vcombine.high %v1312_v48, %v1316_v49  ;;  %v1152_v19 = vld [vmem:[#allocation9 + $0x80] sm:$0xff] }
  0xc7   : > { %1083 = vmatprep.subr.bf16.mxu0 %v7892_v63  ;;  %2714 = vmatprep.subr.bf16.mxu1 %v6974_v24  ;;  %v6965_v63 = vcombine.low %v1184_v46, %v1188_v47  ;;  %v6934_v25 = vcombine.high %v1152_v19, %v1156_v20  ;;  %v1256_v46 = vld [vmem:[#allocation9 + $0x3c0] sm:$0xff] }
  0xc8   : > { %v1260_v47 = vld [vmem:[#allocation9 + $0x3e0] sm:$0xff] }
  0xca   : > { %1084 = vmatpush2.bf16.msra.mxu0 %v7890_v0  ;;  %v7093_v0 = vcombine.low %v1312_v48, %v1316_v49  ;;  %v1384_v48 = vld [vmem:[#allocation9 + $0x7c0] sm:$0xff] }
  0xcb   : > { %1085 = vmatprep.subr.bf16.mxu0 %v7898_v1  ;;  %v1168_v1 = vld [vmem:[#allocation9 + $0x100] sm:$0xff] }
  0xcc   : > { %v1388_v49 = vld [vmem:[#allocation9 + $0x7e0] sm:$0xff] }
  0xce   : > { %1086 = vmatpush2.bf16.msra.mxu0 %v7896_v2  ;;  %v1172_v2 = vld [vmem:[#allocation9 + $0x120] sm:$0xff] }
  0xcf   : > { %1087 = vmatprep.subr.bf16.mxu0 %v7904_v3  ;;  %v1296_v3 = vld [vmem:[#allocation9 + $0x500] sm:$0xff]  ;;  %v6949_v15 = vcombine.low %v1168_v1, %v1172_v2 }
  0xd2   : > { %1088 = vmatpush2.bf16.msra.mxu0 %v7902_v4  ;;  %v1300_v4 = vld [vmem:[#allocation9 + $0x520] sm:$0xff] }
  0xd3   : > { %1089 = vmatprep.subr.bf16.mxu0 %v7910_v5  ;;  %v6958_v5 = vcombine.high %v1176_v56, %v1180_v57  ;;  %v7077_v16 = vcombine.low %v1296_v3, %v1300_v4  ;;  %v1376_v56 = vld [vmem:[#allocation9 + $0x780] sm:$0xff] }
  0xd4   : > { %v1380_v57 = vld [vmem:[#allocation9 + $0x7a0] sm:$0xff] }
  0xd6   : > { %1090 = vmatpush2.bf16.msra.mxu0 %v7908_v6  ;;  %v7086_v6 = vcombine.high %v1304_v58, %v1308_v59  ;;  %v7037_v58 = vcombine.low %v1256_v46, %v1260_v47  ;;  %v7165_v59 = vcombine.low %v1384_v48, %v1388_v49 }
  0xd7   : > { %1091 = vmatprep.subr.bf16.mxu0 %v7916_v9  ;;  %v6950_v9 = vcombine.high %v1168_v1, %v1172_v2  ;;  %v1372_v1 = vld [vmem:[#allocation9 + $0x760] sm:$0xff] }
  0xda   : > { %1092 = vmatpush2.bf16.msra.mxu0 %v7914_v10  ;;  %v7078_v10 = vcombine.high %v1296_v3, %v1300_v4  ;;  %v7157_v3 = vcombine.low %v1376_v56, %v1380_v57 }
  0xdb   : > { %1093 = vmatprep.subr.bf16.mxu0 %v7922_v13  ;;  %v1288_v13 = vld [vmem:[#allocation9 + $0x4c0] sm:$0xff] }
  0xde   : > { %1094 = vmatpush2.bf16.msra.mxu0 %v7920_v14  ;;  %v1292_v14 = vld [vmem:[#allocation9 + $0x4e0] sm:$0xff] }
  0xdf   : > { %1095 = vmatprep.subr.bf16.mxu0 %v7928_v18  ;;  %v7070_v18 = vcombine.high %v1288_v13, %v1292_v14  ;;  %v7069_v24 = vcombine.low %v1288_v13, %v1292_v14  ;;  %v1224_v14 = vld [vmem:[#allocation9 + $0x2c0] sm:$0xff] }
  0xe2   : > { %1096 = vmatpush2.bf16.msra.mxu0 %v7926_v17  ;;  %v6942_v17 = vcombine.high %v1160_v11, %v1164_v12 }
  0xe3   : > { %2757 = vmatprep.subr.bf16.mxu0 %v7102_v27  ;;  %v1144_v27 = vld [vmem:[#allocation9 + $0x40] sm:$0xff] }
 0x165   : > { %v593_v35 = vpop.f32.mrf.mxu0 }
 0x166   : > { %v594_v36 = vadd.f32 %v593_v35, %v472_v33  ;;  %v7061_v35 = vcombine.low %v1280_v21, %v1284_v22 }
 0x167   : > { %v595_v37 = vpop.f32.mrf.mxu0 }
 0x168   : > { %v596_v38 = vadd.f32 %v595_v37, %v476_v34  ;;  %v606_v40 = vmul.f32 0.2, %v594_v36  ;;  %vm602_vm2 = vcmp.gt.f32.partialorder %v594_v36, 0.0 }
 0x169   : > { %v597_v39 = vpop.f32.mrf.mxu0 }
 0x16a   : > { %v607_v41 = vmul.f32 0.2, %v596_v38  ;;  %v598_v42 = vadd.f32 %v597_v39, %v472_v33  ;;  %vm603_vm1 = vcmp.gt.f32.partialorder %v596_v38, 0.0  ;;  %v610_v55 = vsel %vm602_vm2, %v594_v36, %v606_v40  ;;  %v1276_v33 = vld [vmem:[#allocation9 + $0x460] sm:$0xff] }
 0x16b   : > { %v599_v43 = vpop.f32.mrf.mxu0  ;;  %v6926_v36 = vcombine.high %v1144_v27, %v1148_v28  ;;  %v7054_v37 = vcombine.high %v1272_v30, %v1276_v33  ;;  %v1140_v39 = vld [vmem:[#allocation9 + $0x20] sm:$0xff] }
 0x16c   : > { %vm604_vm0 = vcmp.gt.f32.partialorder %v598_v42, 0.0  ;;  %v608_v44 = vmul.f32 0.2, %v598_v42  ;;  %v600_v45 = vadd.f32 %v599_v43, %v476_v34  ;;  %v611_v52 = vsel %vm603_vm1, %v596_v38, %v607_v41  ;;  %v1136_v38 = vld [vmem:[#allocation9] sm:$0xff] }
 0x16d   : > { %v6933_v34 = vcombine.low %v1152_v19, %v1156_v20  ;;  %v1264_v40 = vld [vmem:[#allocation9 + $0x400] sm:$0xff]  ;;  %v7053_v43 = vcombine.low %v1272_v30, %v1276_v33 }
 0x16e   : > { %v609_v50 = vmul.f32 0.2, %v600_v45  ;;  %vm605_vm3 = vcmp.gt.f32.partialorder %v600_v45, 0.0  ;;  %v612_v51 = vsel %vm604_vm0, %v598_v42, %v608_v44  ;;  %v1268_v41 = vld [vmem:[#allocation9 + $0x420] sm:$0xff]  ;;  %v6925_v42 = vcombine.low %v1144_v27, %v1148_v28 }
 0x16f   : > { %v614_v60 = vpack.c.bf16 %v612_v51, %v610_v55  ;;  %v6918_v44 = vcombine.high %v1136_v38, %v1140_v39  ;;  %v7045_v51 = vcombine.low %v1264_v40, %v1268_v41  ;;  %v1252_v55 = vld [vmem:[#allocation9 + $0x3a0] sm:$0xff] }
 0x170   : > { %v613_v53 = vsel %vm605_vm3, %v600_v45, %v609_v50  ;;  %v7046_v45 = vcombine.high %v1264_v40, %v1268_v41  ;;  %v6917_v50 = vcombine.low %v1136_v38, %v1140_v39  ;;  %v1348_v28 = vld [vmem:[#allocation9 + $0x6a0] sm:$0xff] }
 0x171   : > { %v615_v54 = vpack.c.bf16 %v613_v53, %v611_v52  ;;  %v7038_v52 = vcombine.high %v1256_v46, %v1260_v47  ;;  %v7166_v53 = vcombine.high %v1384_v48, %v1388_v49  ;;  %v1340_v39 = vld [vmem:[#allocation9 + $0x660] sm:$0xff] }
 0x172   : > { %v1332_v47 = vld [vmem:[#allocation9 + $0x620] sm:$0xff] }
 0x173   : > { %1054 = vmatprep.mubr.bf16.mxu1 %v615_v54  ;;  %1097 = vmatprep.mubr.bf16.mxu0 %v615_v54  ;;  %v1248_v54 = vld [vmem:[#allocation9 + $0x380] sm:$0xff] }
 0x174   : > { %1055 = vmatmul.mubr.bf16.vlgmr.msra.gmra.mxu1 %v614_v60  ;;  %1098 = vmatmul.mubr.bf16.vlgmr.msra.gmra.mxu0 %v614_v60  ;;  %v7030_v60 = vcombine.high %v1248_v54, %v1252_v55  ;;  %v7029_v2 = vcombine.low %v1248_v54, %v1252_v55  ;;  %v9051_v55 = vld [vmem:[#allocation9 + $0x5e8] sm:$0xff] }
 0x175   : > { %2715 = vmatpush1.bf16.msra.mxu1 %v6973_v23  ;;  %2758 = vmatpush1.bf16.msra.mxu0 %v7101_v26  ;;  %v6941_v23 = vcombine.low %v1160_v11, %v1164_v12  ;;  %v7062_v26 = vcombine.high %v1280_v21, %v1284_v22 }
 0x176   : > { %2716 = vmatprep.subr.bf16.mxu1 %v6966_v61  ;;  %2759 = vmatprep.subr.bf16.mxu0 %v7094_v62  ;;  %v7158_v61 = vcombine.high %v1376_v56, %v1380_v57  ;;  %v1240_v62 = vld [vmem:[#allocation9 + $0x340] sm:$0xff] }
 0x179   : > { %2717 = vmatpush1.bf16.msra.mxu1 %v6965_v63  ;;  %2760 = vmatpush1.bf16.msra.mxu0 %v7093_v0  ;;  %v1244_v63 = vld [vmem:[#allocation9 + $0x360] sm:$0xff] }
 0x17a   : > { %2718 = vmatprep.subr.bf16.mxu1 %v6958_v5  ;;  %2761 = vmatprep.subr.bf16.mxu0 %v7086_v6  ;;  %v1368_v0 = vld [vmem:[#allocation9 + $0x740] sm:$0xff]  ;;  %v7022_v4 = vcombine.high %v1240_v62, %v1244_v63 }
 0x17b   : > { %v7150_v5 = vcombine.high %v1368_v0, %v1372_v1  ;;  %v1232_v6 = vld [vmem:[#allocation9 + $0x300] sm:$0xff]  ;;  %v7149_v11 = vcombine.low %v1368_v0, %v1372_v1 }
 0x17d   : > { %2719 = vmatpush1.bf16.msra.mxu1 %v6957_v7  ;;  %2762 = vmatpush1.bf16.msra.mxu0 %v7085_v8  ;;  %v1236_v7 = vld [vmem:[#allocation9 + $0x320] sm:$0xff] }
 0x17e   : > { %2720 = vmatprep.subr.bf16.mxu1 %v6950_v9  ;;  %2763 = vmatprep.subr.bf16.mxu0 %v7078_v10  ;;  %v1360_v8 = vld [vmem:[#allocation9 + $0x700] sm:$0xff]  ;;  %v7021_v10 = vcombine.low %v1240_v62, %v1244_v63  ;;  %v7014_v12 = vcombine.high %v1232_v6, %v1236_v7 }
 0x17f   : > { %v1364_v9 = vld [vmem:[#allocation9 + $0x720] sm:$0xff] }
 0x180   : > { %v7142_v13 = vcombine.high %v1360_v8, %v1364_v9  ;;  %v7141_v19 = vcombine.low %v1360_v8, %v1364_v9 }
 0x181   : > { %2721 = vmatpush1.bf16.msra.mxu1 %v6949_v15  ;;  %2764 = vmatpush1.bf16.msra.mxu0 %v7077_v16  ;;  %v1228_v15 = vld [vmem:[#allocation9 + $0x2e0] sm:$0xff] }
 0x182   : > { %2722 = vmatprep.subr.bf16.mxu1 %v6942_v17  ;;  %2765 = vmatprep.subr.bf16.mxu0 %v7070_v18  ;;  %v1352_v16 = vld [vmem:[#allocation9 + $0x6c0] sm:$0xff]  ;;  %v7013_v18 = vcombine.low %v1232_v6, %v1236_v7  ;;  %v7006_v20 = vcombine.high %v1224_v14, %v1228_v15  ;;  %v7005_v22 = vcombine.low %v1224_v14, %v1228_v15 }
 0x183   : > { %v1356_v17 = vld [vmem:[#allocation9 + $0x6e0] sm:$0xff] }
 0x184   : > { %v7134_v21 = vcombine.high %v1352_v16, %v1356_v17 }
 0x185   : > { %2723 = vmatpush1.bf16.msra.mxu1 %v6941_v23  ;;  %2766 = vmatpush1.bf16.msra.mxu0 %v7069_v24  ;;  %v7133_v23 = vcombine.low %v1352_v16, %v1356_v17  ;;  %v1216_v24 = vld [vmem:[#allocation9 + $0x280] sm:$0xff] }
 0x186   : > { %2724 = vmatprep.subr.bf16.mxu1 %v6934_v25  ;;  %2767 = vmatprep.subr.bf16.mxu0 %v7062_v26  ;;  %v1220_v25 = vld [vmem:[#allocation9 + $0x2a0] sm:$0xff] }
 0x187   : > { %v1344_v26 = vld [vmem:[#allocation9 + $0x680] sm:$0xff]  ;;  %v6998_v27 = vcombine.high %v1216_v24, %v1220_v25  ;;  %v6997_v30 = vcombine.low %v1216_v24, %v1220_v25 }
 0x188   : > { %v7125_v33 = vcombine.low %v1344_v26, %v1348_v28 }
 0x189   : > { %2725 = vmatpush1.bf16.msra.mxu1 %v6933_v34  ;;  %2768 = vmatpush1.bf16.msra.mxu0 %v7061_v35  ;;  %v7126_v34 = vcombine.high %v1344_v26, %v1348_v28  ;;  %v1208_v35 = vld [vmem:[#allocation9 + $0x240] sm:$0xff] }
 0x18a   : > { %2726 = vmatprep.subr.bf16.mxu1 %v6926_v36  ;;  %2769 = vmatprep.subr.bf16.mxu0 %v7054_v37  ;;  %v1212_v36 = vld [vmem:[#allocation9 + $0x260] sm:$0xff] }
 0x18b   : > { %v1336_v37 = vld [vmem:[#allocation9 + $0x640] sm:$0xff]  ;;  %v6990_v38 = vcombine.high %v1208_v35, %v1212_v36  ;;  %v6989_v40 = vcombine.low %v1208_v35, %v1212_v36 }
 0x18c   : > { %v7117_v41 = vcombine.low %v1336_v37, %v1340_v39 }
 0x18d   : > { %2727 = vmatpush1.bf16.msra.mxu1 %v6925_v42  ;;  %2770 = vmatpush1.bf16.msra.mxu0 %v7053_v43  ;;  %v7118_v42 = vcombine.high %v1336_v37, %v1340_v39  ;;  %v1200_v43 = vld [vmem:[#allocation9 + $0x200] sm:$0xff]  ;;  %v1313_v39 = vld [vmem:[#allocation9 + $0x588] sm:$0xff] }
 0x18e   : > { %2728 = vmatprep.subr.bf16.mxu1 %v6918_v44  ;;  %2771 = vmatprep.subr.bf16.mxu0 %v7046_v45  ;;  %v1204_v44 = vld [vmem:[#allocation9 + $0x220] sm:$0xff] }
 0x18f   : > { %v1328_v45 = vld [vmem:[#allocation9 + $0x600] sm:$0xff]  ;;  %v6982_v46 = vcombine.high %v1200_v43, %v1204_v44  ;;  %v6981_v48 = vcombine.low %v1200_v43, %v1204_v44 }
 0x190   : > { %v7109_v49 = vcombine.low %v1328_v45, %v1332_v47 }
 0x191   : > { %2729 = vmatpush1.bf16.msra.mxu1 %v6917_v50  ;;  %2772 = vmatpush1.bf16.msra.mxu0 %v7045_v51  ;;  %v7110_v50 = vcombine.high %v1328_v45, %v1332_v47  ;;  %v9043_v51 = vld [vmem:[#allocation9 + $0x1c8] sm:$0xff] }
 0x192   : > { %2730 = vmatprep.subr.bf16.mxu1 %v7038_v52  ;;  %2773 = vmatprep.subr.bf16.mxu0 %v7166_v53  ;;  %v9045_v52 = vld [vmem:[#allocation9 + $0x1e8] sm:$0xff] }
 0x193   : > { %v9047_v53 = vld [vmem:[#allocation9 + $0x5c8] sm:$0xff]  ;;  %v6976_v54 = vcombine.high %v9043_v51, %v9045_v52  ;;  %v6975_v56 = vcombine.low %v9043_v51, %v9045_v52 }
 0x194   : > { %v7103_v57 = vcombine.low %v9047_v53, %v9051_v55  ;;  %v1181_v47 = vld [vmem:[#allocation9 + $0x168] sm:$0xff] }
 0x195   : > { %2731 = vmatpush2.bf16.msra.mxu1 %v7037_v58  ;;  %2774 = vmatpush2.bf16.msra.mxu0 %v7165_v59  ;;  %v7104_v58 = vcombine.high %v9047_v53, %v9051_v55  ;;  %v680_v59 = vld [vmem:[#allocation7] sm:$0xf] }
 0x196   : > { %2732 = vmatprep.subr.bf16.mxu1 %v7030_v60  ;;  %2775 = vmatprep.subr.bf16.mxu0 %v7158_v61  ;;  %v9060_v60 = vsub.s32 3, %v9033_v29  ;;  %v9063_v61 = vsub.s32 2, %v9033_v29  ;;  %v685_v62 = vrot.slane %v680_v59, %v9036_v31  ;;  %v689_v1 = vrot.slane %v680_v59, %v9039_v32 }
 0x199   : > { %2733 = vmatpush2.bf16.msra.mxu1 %v7029_v2  ;;  %2776 = vmatpush2.bf16.msra.mxu0 %v7157_v3  ;;  %v697_v2 = vrot.slane %v680_v59, %v9060_v60  ;;  %v693_v3 = vrot.slane %v680_v59, %v9063_v61 }
 0x19a   : > { %2734 = vmatprep.subr.bf16.mxu1 %v7022_v4  ;;  %2777 = vmatprep.subr.bf16.mxu0 %v7150_v5 }
 0x19d   : > { %2735 = vmatpush2.bf16.msra.mxu1 %v7021_v10  ;;  %2778 = vmatpush2.bf16.msra.mxu0 %v7149_v11 }
 0x19e   : > { %2736 = vmatprep.subr.bf16.mxu1 %v7014_v12  ;;  %2779 = vmatprep.subr.bf16.mxu0 %v7142_v13 }
 0x1a1   : > { %2737 = vmatpush2.bf16.msra.mxu1 %v7013_v18  ;;  %2780 = vmatpush2.bf16.msra.mxu0 %v7141_v19 }
 0x1a2   : > { %2738 = vmatprep.subr.bf16.mxu1 %v7006_v20  ;;  %2781 = vmatprep.subr.bf16.mxu0 %v7134_v21 }
 0x1a5   : > { %2739 = vmatpush2.bf16.msra.mxu1 %v7005_v22  ;;  %2782 = vmatpush2.bf16.msra.mxu0 %v7133_v23 }
 0x1a6   : > { %2740 = vmatprep.subr.bf16.mxu1 %v6998_v27  ;;  %2783 = vmatprep.subr.bf16.mxu0 %v7126_v34  ;;  %v1189_v34 = vld [vmem:[#allocation9 + $0x1a8] sm:$0xff] }
 0x1a9   : > { %2741 = vmatpush2.bf16.msra.mxu1 %v6997_v30  ;;  %2784 = vmatpush2.bf16.msra.mxu0 %v7125_v33  ;;  %v1185_v33 = vld [vmem:[#allocation9 + $0x188] sm:$0xff] }
 0x1aa   : > { %2742 = vmatprep.subr.bf16.mxu1 %v6990_v38  ;;  %2785 = vmatprep.subr.bf16.mxu0 %v7118_v42  ;;  %v6968_v45 = vcombine.high %v1185_v33, %v1189_v34 }
 0x1ad   : > { %2743 = vmatpush2.bf16.msra.mxu1 %v6989_v40  ;;  %2786 = vmatpush2.bf16.msra.mxu0 %v7117_v41  ;;  %v1317_v40 = vld [vmem:[#allocation9 + $0x5a8] sm:$0xff] }
 0x1ae   : > { %2744 = vmatprep.subr.bf16.mxu1 %v6982_v46  ;;  %2787 = vmatprep.subr.bf16.mxu0 %v7110_v50  ;;  %v1177_v46 = vld [vmem:[#allocation9 + $0x148] sm:$0xff] }
 0x1af   : > { %v1309_v50 = vld [vmem:[#allocation9 + $0x568] sm:$0xff]  ;;  %v6960_v59 = vcombine.high %v1177_v46, %v1181_v47  ;;  %v6959_v51 = vcombine.low %v1177_v46, %v1181_v47 }
 0x1b1   : > { %2745 = vmatpush2.bf16.msra.mxu1 %v6981_v48  ;;  %2788 = vmatpush2.bf16.msra.mxu0 %v7109_v49  ;;  %v7096_v48 = vcombine.high %v1313_v39, %v1317_v40  ;;  %v1305_v49 = vld [vmem:[#allocation9 + $0x548] sm:$0xff] }
 0x1b2   : > { %2800 = vmatprep.subr.bf16.mxu1 %v6976_v54  ;;  %2843 = vmatprep.subr.bf16.mxu0 %v7104_v58  ;;  %v6967_v54 = vcombine.low %v1185_v33, %v1189_v34  ;;  %v7095_v58 = vcombine.low %v1313_v39, %v1317_v40  ;;  %v7087_v52 = vcombine.low %v1305_v49, %v1309_v50  ;;  %v1385_v39 = vld [vmem:[#allocation9 + $0x7c8] sm:$0xff] }
 0x1b3   : > { %v1389_v40 = vld [vmem:[#allocation9 + $0x7e8] sm:$0xff] }
 0x1b4   : > { %v7168_v47 = vcombine.high %v1385_v39, %v1389_v40 }
 0x234   : > { %v1056_v63 = vpop.f32.mrf.mxu1  ;;  %v1099_v0 = vpop.f32.mrf.mxu0 }
 0x235   : > { %v1057_v6 = vadd.f32 %v1056_v63, %v685_v62  ;;  %v1100_v13 = vadd.f32 %v1099_v0, %v693_v3  ;;  %v1169_v63 = vld [vmem:[#allocation9 + $0x108] sm:$0xff] }
 0x236   : > { %v1058_v4 = vpop.f32.mrf.mxu1  ;;  %v1101_v5 = vpop.f32.mrf.mxu0  ;;  %v1173_v0 = vld [vmem:[#allocation9 + $0x128] sm:$0xff] }
 0x237   : > { %v1059_v7 = vadd.f32 %v1058_v4, %v689_v1  ;;  %v1102_v10 = vadd.f32 %v1101_v5, %v697_v2  ;;  %vm1108_vm4 = vcmp.gt.f32.partialorder %v1057_v6, 0.0  ;;  %v1116_v21 = vmul.f32 0.2, %v1057_v6  ;;  %v1293_v4 = vld [vmem:[#allocation9 + $0x4e8] sm:$0xff] }
 0x238   : > { %v1060_v8 = vpop.f32.mrf.mxu1  ;;  %v1103_v9 = vpop.f32.mrf.mxu0  ;;  %v1118_v23 = vmul.f32 0.2, %v1100_v13  ;;  %vm1110_vm10 = vcmp.gt.f32.partialorder %v1100_v13, 0.0  ;;  %v6952_v53 = vcombine.high %v1169_v63, %v1173_v0  ;;  %v6951_v5 = vcombine.low %v1169_v63, %v1173_v0  ;;  %v1241_v0 = vld [vmem:[#allocation9 + $0x348] sm:$0xff] }
 0x239   : > { %v1061_v11 = vadd.f32 %v1060_v8, %v685_v62  ;;  %v1104_v12 = vadd.f32 %v1103_v9, %v693_v3  ;;  %v1117_v16 = vmul.f32 0.2, %v1059_v7  ;;  %vm1109_vm6 = vcmp.gt.f32.partialorder %v1059_v7, 0.0  ;;  %v1289_v3 = vld [vmem:[#allocation9 + $0x4c8] sm:$0xff] }
 0x23a   : > { %v1062_v14 = vpop.f32.mrf.mxu1  ;;  %v1105_v15 = vpop.f32.mrf.mxu0  ;;  %v1119_v22 = vmul.f32 0.2, %v1102_v10  ;;  %vm1111_vm8 = vcmp.gt.f32.partialorder %v1102_v10, 0.0  ;;  %v1124_v35 = vsel %vm1108_vm4, %v1057_v6, %v1116_v21  ;;  %v1126_v41 = vsel %vm1110_vm10, %v1100_v13, %v1118_v23  ;;  %v1153_v9 = vld [vmem:[#allocation9 + $0x88] sm:$0xff] }
 0x23b   : > { %v1120_v17 = vmul.f32 0.2, %v1061_v11  ;;  %vm1112_vm5 = vcmp.gt.f32.partialorder %v1061_v11, 0.0  ;;  %v1122_v18 = vmul.f32 0.2, %v1104_v12  ;;  %v1063_v19 = vadd.f32 %v1062_v14, %v689_v1  ;;  %v1297_v1 = vld [vmem:[#allocation9 + $0x508] sm:$0xff] }
 0x23c   : > { %v1106_v20 = vadd.f32 %v1105_v15, %v697_v2  ;;  %vm1114_vm7 = vcmp.gt.f32.partialorder %v1104_v12, 0.0  ;;  %v1125_v27 = vsel %vm1109_vm6, %v1059_v7, %v1117_v16  ;;  %v1127_v36 = vsel %vm1111_vm8, %v1102_v10, %v1119_v22  ;;  %v1301_v2 = vld [vmem:[#allocation9 + $0x528] sm:$0xff] }
 0x23d   : > { %vm1113_vm9 = vcmp.gt.f32.partialorder %v1063_v19, 0.0  ;;  %v1121_v24 = vmul.f32 0.2, %v1063_v19  ;;  %v1128_v25 = vsel %vm1112_vm5, %v1061_v11, %v1120_v17  ;;  %v1130_v28 = vsel %vm1114_vm7, %v1104_v12, %v1122_v18  ;;  %v1157_v10 = vld [vmem:[#allocation9 + $0xa8] sm:$0xff] }
 0x23e   : > { %vm1115_vm11 = vcmp.gt.f32.partialorder %v1106_v20, 0.0  ;;  %v1123_v26 = vmul.f32 0.2, %v1106_v20  ;;  %v9072_v42 = vpack.c.bf16 %v1128_v25, %v1124_v35  ;;  %v9076_v44 = vpack.c.bf16 %v1130_v28, %v1126_v41  ;;  %v1281_v11 = vld [vmem:[#allocation9 + $0x488] sm:$0xff] }
 0x23f   : > { %v1129_v30 = vsel %vm1113_vm9, %v1063_v19, %v1121_v24  ;;  %v7088_v62 = vcombine.high %v1305_v49, %v1309_v50  ;;  %v7080_v55 = vcombine.high %v1297_v1, %v1301_v2  ;;  %v7079_v6 = vcombine.low %v1297_v1, %v1301_v2  ;;  %v1285_v12 = vld [vmem:[#allocation9 + $0x4a8] sm:$0xff] }
 0x240   : > { %v9070_v37 = vpack.c.bf16 %v1129_v30, %v1125_v27  ;;  %v1131_v38 = vsel %vm1115_vm11, %v1106_v20, %v1123_v26  ;;  %v7072_v8 = vcombine.high %v1289_v3, %v1293_v4  ;;  %v7071_v14 = vcombine.low %v1289_v3, %v1293_v4  ;;  %v1145_v17 = vld [vmem:[#allocation9 + $0x48] sm:$0xff] }
 0x241   : > { %v9074_v43 = vpack.c.bf16 %v1131_v38, %v1127_v36  ;;  %v6936_v15 = vcombine.high %v1153_v9, %v1157_v10  ;;  %v7064_v16 = vcombine.high %v1281_v11, %v1285_v12  ;;  %v1149_v18 = vld [vmem:[#allocation9 + $0x68] sm:$0xff]  ;;  %v6935_v21 = vcombine.low %v1153_v9, %v1157_v10 }
 0x242   : > { %2746 = vmatprep.mubr.bf16.mxu1 %v9070_v37  ;;  %v1273_v19 = vld [vmem:[#allocation9 + $0x448] sm:$0xff]  ;;  %v7063_v22 = vcombine.low %v1281_v11, %v1285_v12  ;;  %v6928_v23 = vcombine.high %v1145_v17, %v1149_v18  ;;  %v6927_v30 = vcombine.low %v1145_v17, %v1149_v18 }
 0x243   : > { %2789 = vmatprep.mubr.bf16.mxu0 %v9074_v43  ;;  %2747 = vmatmul.mubr.bf16.vlgmr.msra.gmra.mxu1 %v9072_v42  ;;  %v1277_v20 = vld [vmem:[#allocation9 + $0x468] sm:$0xff] }
 0x244   : > { %2790 = vmatmul.mubr.bf16.vlgmr.msra.gmra.mxu0 %v9076_v44  ;;  %2801 = vmatpush1.bf16.msra.mxu1 %v6975_v56  ;;  %v1161_v56 = vld [vmem:[#allocation9 + $0xc8] sm:$0xff]  ;;  %v7056_v24 = vcombine.high %v1273_v19, %v1277_v20  ;;  %v7055_v33 = vcombine.low %v1273_v19, %v1277_v20 }
 0x245   : > { %2844 = vmatpush1.bf16.msra.mxu0 %v7103_v57  ;;  %2832 = vmatprep.mubr.bf16.mxu1 %v9070_v37  ;;  %v1165_v57 = vld [vmem:[#allocation9 + $0xe8] sm:$0xff] }
 0x246   : > { %2875 = vmatprep.mubr.bf16.mxu0 %v9074_v43  ;;  %2802 = vmatprep.subr.bf16.mxu1 %v6968_v45  ;;  %v6944_v7 = vcombine.high %v1161_v56, %v1165_v57  ;;  %v6943_v13 = vcombine.low %v1161_v56, %v1165_v57  ;;  %v1137_v25 = vld [vmem:[#allocation9 + $0x8] sm:$0xff] }
 0x247   : > { %2845 = vmatprep.subr.bf16.mxu0 %v7096_v48  ;;  %v1141_v26 = vld [vmem:[#allocation9 + $0x28] sm:$0xff] }
 0x248   : > { %2803 = vmatpush1.bf16.msra.mxu1 %v6967_v54  ;;  %v1265_v27 = vld [vmem:[#allocation9 + $0x408] sm:$0xff]  ;;  %v6920_v34 = vcombine.high %v1137_v25, %v1141_v26  ;;  %v6919_v41 = vcombine.low %v1137_v25, %v1141_v26 }
 0x249   : > { %2846 = vmatpush1.bf16.msra.mxu0 %v7095_v58  ;;  %2804 = vmatprep.subr.bf16.mxu1 %v6960_v59  ;;  %v1269_v28 = vld [vmem:[#allocation9 + $0x428] sm:$0xff]  ;;  %v7167_v59 = vcombine.low %v1385_v39, %v1389_v40 }
 0x24a   : > { %2847 = vmatprep.subr.bf16.mxu0 %v7088_v62  ;;  %v7048_v35 = vcombine.high %v1265_v27, %v1269_v28  ;;  %v1257_v36 = vld [vmem:[#allocation9 + $0x3c8] sm:$0xff]  ;;  %v7047_v45 = vcombine.low %v1265_v27, %v1269_v28 }
 0x24b   : > { %v1261_v38 = vld [vmem:[#allocation9 + $0x3e8] sm:$0xff] }
 0x24c   : > { %2805 = vmatpush1.bf16.msra.mxu1 %v6959_v51  ;;  %v7040_v46 = vcombine.high %v1257_v36, %v1261_v38  ;;  %v1249_v48 = vld [vmem:[#allocation9 + $0x388] sm:$0xff]  ;;  %v7039_v58 = vcombine.low %v1257_v36, %v1261_v38 }
 0x24d   : > { %2848 = vmatpush1.bf16.msra.mxu0 %v7087_v52  ;;  %2806 = vmatprep.subr.bf16.mxu1 %v6952_v53  ;;  %v1253_v49 = vld [vmem:[#allocation9 + $0x3a8] sm:$0xff] }
 0x24e   : > { %2849 = vmatprep.subr.bf16.mxu0 %v7080_v55  ;;  %v1377_v50 = vld [vmem:[#allocation9 + $0x788] sm:$0xff]  ;;  %v7032_v62 = vcombine.high %v1249_v48, %v1253_v49  ;;  %v7031_v52 = vcombine.low %v1249_v48, %v1253_v49  ;;  %v1194_v49 = vld [vmem:[#allocation9 + $0x1d0] sm:$0xff] }
 0x24f   : > { %v1381_v54 = vld [vmem:[#allocation9 + $0x7a8] sm:$0xff] }
 0x250   : > { %2807 = vmatpush1.bf16.msra.mxu1 %v6951_v5  ;;  %v7160_v63 = vcombine.high %v1377_v50, %v1381_v54  ;;  %v1245_v1 = vld [vmem:[#allocation9 + $0x368] sm:$0xff]  ;;  %v7159_v53 = vcombine.low %v1377_v50, %v1381_v54  ;;  %v1198_v50 = vld [vmem:[#allocation9 + $0x1f0] sm:$0xff] }
 0x251   : > { %2850 = vmatpush1.bf16.msra.mxu0 %v7079_v6  ;;  %2808 = vmatprep.subr.bf16.mxu1 %v6944_v7  ;;  %v1369_v2 = vld [vmem:[#allocation9 + $0x748] sm:$0xff]  ;;  %v7024_v55 = vcombine.high %v1241_v0, %v1245_v1  ;;  %v7023_v6 = vcombine.low %v1241_v0, %v1245_v1  ;;  %v1322_v54 = vld [vmem:[#allocation9 + $0x5d0] sm:$0xff] }
 0x252   : > { %2851 = vmatprep.subr.bf16.mxu0 %v7072_v8  ;;  %v1373_v51 = vld [vmem:[#allocation9 + $0x768] sm:$0xff]  ;;  %v1186_v1 = vld [vmem:[#allocation9 + $0x190] sm:$0xff] }
 0x253   : > { %v7152_v56 = vcombine.high %v1369_v2, %v1373_v51  ;;  %v1233_v57 = vld [vmem:[#allocation9 + $0x308] sm:$0xff]  ;;  %v7151_v7 = vcombine.low %v1369_v2, %v1373_v51  ;;  %v1190_v2 = vld [vmem:[#allocation9 + $0x1b0] sm:$0xff]  ;;  %v6977_v51 = vcombine.low %v1194_v49, %v1198_v50 }
 0x254   : > { %2809 = vmatpush1.bf16.msra.mxu1 %v6943_v13  ;;  %v1237_v3 = vld [vmem:[#allocation9 + $0x328] sm:$0xff] }
 0x255   : > { %2852 = vmatpush1.bf16.msra.mxu0 %v7071_v14  ;;  %2810 = vmatprep.subr.bf16.mxu1 %v6936_v15  ;;  %v1361_v4 = vld [vmem:[#allocation9 + $0x708] sm:$0xff]  ;;  %v7016_v8 = vcombine.high %v1233_v57, %v1237_v3  ;;  %v7015_v14 = vcombine.low %v1233_v57, %v1237_v3  ;;  %v1178_v57 = vld [vmem:[#allocation9 + $0x150] sm:$0xff] }
 0x256   : > { %2853 = vmatprep.subr.bf16.mxu0 %v7064_v16  ;;  %v1365_v5 = vld [vmem:[#allocation9 + $0x728] sm:$0xff]  ;;  %v1182_v3 = vld [vmem:[#allocation9 + $0x170] sm:$0xff] }
 0x257   : > { %v7144_v9 = vcombine.high %v1361_v4, %v1365_v5  ;;  %v1225_v10 = vld [vmem:[#allocation9 + $0x2c8] sm:$0xff]  ;;  %v7143_v15 = vcombine.low %v1361_v4, %v1365_v5  ;;  %v1306_v5 = vld [vmem:[#allocation9 + $0x550] sm:$0xff] }
 0x258   : > { %2811 = vmatpush1.bf16.msra.mxu1 %v6935_v21  ;;  %v1229_v11 = vld [vmem:[#allocation9 + $0x2e8] sm:$0xff] }
 0x259   : > { %2854 = vmatpush1.bf16.msra.mxu0 %v7063_v22  ;;  %2812 = vmatprep.subr.bf16.mxu1 %v6928_v23  ;;  %v1353_v12 = vld [vmem:[#allocation9 + $0x6c8] sm:$0xff]  ;;  %v7008_v16 = vcombine.high %v1225_v10, %v1229_v11  ;;  %v7007_v22 = vcombine.low %v1225_v10, %v1229_v11  ;;  %v1170_v11 = vld [vmem:[#allocation9 + $0x110] sm:$0xff] }
 0x25a   : > { %2855 = vmatprep.subr.bf16.mxu0 %v7056_v24  ;;  %v1357_v13 = vld [vmem:[#allocation9 + $0x6e8] sm:$0xff] }
 0x25b   : > { %v7136_v17 = vcombine.high %v1353_v12, %v1357_v13  ;;  %v1217_v18 = vld [vmem:[#allocation9 + $0x288] sm:$0xff]  ;;  %v7135_v23 = vcombine.low %v1353_v12, %v1357_v13  ;;  %v1174_v12 = vld [vmem:[#allocation9 + $0x130] sm:$0xff] }
 0x25c   : > { %2813 = vmatpush1.bf16.msra.mxu1 %v6927_v30  ;;  %v1221_v19 = vld [vmem:[#allocation9 + $0x2a8] sm:$0xff]  ;;  %v1298_v13 = vld [vmem:[#allocation9 + $0x510] sm:$0xff] }
 0x25d   : > { %2856 = vmatpush1.bf16.msra.mxu0 %v7055_v33  ;;  %2814 = vmatprep.subr.bf16.mxu1 %v6920_v34  ;;  %v1345_v20 = vld [vmem:[#allocation9 + $0x688] sm:$0xff]  ;;  %v7000_v24 = vcombine.high %v1217_v18, %v1221_v19  ;;  %v6999_v33 = vcombine.low %v1217_v18, %v1221_v19  ;;  %v1162_v19 = vld [vmem:[#allocation9 + $0xd0] sm:$0xff] }
 0x25e   : > { %2857 = vmatprep.subr.bf16.mxu0 %v7048_v35  ;;  %v1349_v21 = vld [vmem:[#allocation9 + $0x6a8] sm:$0xff] }
 0x25f   : > { %v7128_v25 = vcombine.high %v1345_v20, %v1349_v21  ;;  %v1209_v26 = vld [vmem:[#allocation9 + $0x248] sm:$0xff]  ;;  %v7127_v34 = vcombine.low %v1345_v20, %v1349_v21  ;;  %v1166_v20 = vld [vmem:[#allocation9 + $0xf0] sm:$0xff] }
 0x260   : > { %2815 = vmatpush1.bf16.msra.mxu1 %v6919_v41  ;;  %v1213_v27 = vld [vmem:[#allocation9 + $0x268] sm:$0xff]  ;;  %v1290_v21 = vld [vmem:[#allocation9 + $0x4d0] sm:$0xff] }
 0x261   : > { %2858 = vmatpush1.bf16.msra.mxu0 %v7047_v45  ;;  %2816 = vmatprep.subr.bf16.mxu1 %v7040_v46  ;;  %v1337_v28 = vld [vmem:[#allocation9 + $0x648] sm:$0xff]  ;;  %v6992_v35 = vcombine.high %v1209_v26, %v1213_v27  ;;  %v6991_v45 = vcombine.low %v1209_v26, %v1213_v27  ;;  %v1154_v27 = vld [vmem:[#allocation9 + $0x90] sm:$0xff] }
 0x262   : > { %2859 = vmatprep.subr.bf16.mxu0 %v7168_v47  ;;  %v1341_v30 = vld [vmem:[#allocation9 + $0x668] sm:$0xff] }
 0x263   : > { %v7120_v36 = vcombine.high %v1337_v28, %v1341_v30  ;;  %v1201_v38 = vld [vmem:[#allocation9 + $0x208] sm:$0xff]  ;;  %v7119_v46 = vcombine.low %v1337_v28, %v1341_v30  ;;  %v1158_v28 = vld [vmem:[#allocation9 + $0xb0] sm:$0xff] }
 0x264   : > { %2817 = vmatpush2.bf16.msra.mxu1 %v7039_v58  ;;  %v1205_v39 = vld [vmem:[#allocation9 + $0x228] sm:$0xff]  ;;  %v1326_v58 = vld [vmem:[#allocation9 + $0x5f0] sm:$0xff] }
 0x265   : > { %2860 = vmatpush2.bf16.msra.mxu0 %v7167_v59  ;;  %2818 = vmatprep.subr.bf16.mxu1 %v7032_v62  ;;  %v1329_v40 = vld [vmem:[#allocation9 + $0x608] sm:$0xff]  ;;  %v6984_v47 = vcombine.high %v1201_v38, %v1205_v39  ;;  %v6983_v59 = vcombine.low %v1201_v38, %v1205_v39  ;;  %v7106_v0 = vcombine.high %v1322_v54, %v1326_v58  ;;  %v1282_v30 = vld [vmem:[#allocation9 + $0x490] sm:$0xff] }
 0x266   : > { %2861 = vmatprep.subr.bf16.mxu0 %v7160_v63  ;;  %v1333_v41 = vld [vmem:[#allocation9 + $0x628] sm:$0xff]  ;;  %v6978_v63 = vcombine.high %v1194_v49, %v1198_v50  ;;  %v1146_v39 = vld [vmem:[#allocation9 + $0x50] sm:$0xff] }
 0x267   : > { %v7112_v48 = vcombine.high %v1329_v40, %v1333_v41  ;;  %v7111_v62 = vcombine.low %v1329_v40, %v1333_v41  ;;  %v1150_v40 = vld [vmem:[#allocation9 + $0x70] sm:$0xff] }
 0x268   : > { %2819 = vmatpush2.bf16.msra.mxu1 %v7031_v52  ;;  %v1314_v52 = vld [vmem:[#allocation9 + $0x590] sm:$0xff] }
 0x269   : > { %2862 = vmatpush2.bf16.msra.mxu0 %v7159_v53  ;;  %2820 = vmatprep.subr.bf16.mxu1 %v7024_v55  ;;  %v1318_v53 = vld [vmem:[#allocation9 + $0x5b0] sm:$0xff]  ;;  %v7105_v55 = vcombine.low %v1322_v54, %v1326_v58 }
 0x26a   : > { %2863 = vmatprep.subr.bf16.mxu0 %v7152_v56  ;;  %v6970_v56 = vcombine.high %v1186_v1, %v1190_v2  ;;  %v7098_v4 = vcombine.high %v1314_v52, %v1318_v53  ;;  %v1274_v41 = vld [vmem:[#allocation9 + $0x450] sm:$0xff] }
 0x26b   : > { %v1138_v50 = vld [vmem:[#allocation9 + $0x10] sm:$0xff] }
 0x26c   : > { %2821 = vmatpush2.bf16.msra.mxu1 %v7023_v6  ;;  %v1310_v6 = vld [vmem:[#allocation9 + $0x570] sm:$0xff] }
 0x26d   : > { %2864 = vmatpush2.bf16.msra.mxu0 %v7151_v7  ;;  %2822 = vmatprep.subr.bf16.mxu1 %v7016_v8  ;;  %v6969_v7 = vcombine.low %v1186_v1, %v1190_v2  ;;  %v7097_v8 = vcombine.low %v1314_v52, %v1318_v53  ;;  %v7090_v10 = vcombine.high %v1306_v5, %v1310_v6  ;;  %v1142_v54 = vld [vmem:[#allocation9 + $0x30] sm:$0xff] }
 0x26e   : > { %2865 = vmatprep.subr.bf16.mxu0 %v7144_v9  ;;  %v6962_v9 = vcombine.high %v1178_v57, %v1182_v3  ;;  %v1266_v58 = vld [vmem:[#allocation9 + $0x410] sm:$0xff] }
 0x26f   : > { %v1258_v2 = vld [vmem:[#allocation9 + $0x3d0] sm:$0xff] }
 0x270   : > { %2823 = vmatpush2.bf16.msra.mxu1 %v7015_v14  ;;  %v1302_v14 = vld [vmem:[#allocation9 + $0x530] sm:$0xff] }
 0x271   : > { %2866 = vmatpush2.bf16.msra.mxu0 %v7143_v15  ;;  %2824 = vmatprep.subr.bf16.mxu1 %v7008_v16  ;;  %v6961_v15 = vcombine.low %v1178_v57, %v1182_v3  ;;  %v7089_v16 = vcombine.low %v1306_v5, %v1310_v6  ;;  %v7082_v18 = vcombine.high %v1298_v13, %v1302_v14  ;;  %v1386_v52 = vld [vmem:[#allocation9 + $0x7d0] sm:$0xff] }
 0x272   : > { %2867 = vmatprep.subr.bf16.mxu0 %v7136_v17  ;;  %v6954_v17 = vcombine.high %v1170_v11, %v1174_v12  ;;  %v1390_v53 = vld [vmem:[#allocation9 + $0x7f0] sm:$0xff] }
 0x273   : > { %v7170_v3 = vcombine.high %v1386_v52, %v1390_v53  ;;  %v1254_v5 = vld [vmem:[#allocation9 + $0x3b0] sm:$0xff] }
 0x274   : > { %2825 = vmatpush2.bf16.msra.mxu1 %v7007_v22  ;;  %v1294_v22 = vld [vmem:[#allocation9 + $0x4f0] sm:$0xff] }
 0x275   : > { %2868 = vmatpush2.bf16.msra.mxu0 %v7135_v23  ;;  %2826 = vmatprep.subr.bf16.mxu1 %v7000_v24  ;;  %v6953_v23 = vcombine.low %v1170_v11, %v1174_v12  ;;  %v7081_v24 = vcombine.low %v1298_v13, %v1302_v14  ;;  %v7074_v26 = vcombine.high %v1290_v21, %v1294_v22  ;;  %v1378_v6 = vld [vmem:[#allocation9 + $0x790] sm:$0xff] }
 0x276   : > { %2869 = vmatprep.subr.bf16.mxu0 %v7128_v25  ;;  %v6946_v25 = vcombine.high %v1162_v19, %v1166_v20  ;;  %v1242_v12 = vld [vmem:[#allocation9 + $0x350] sm:$0xff] }
 0x277   : > { %v1246_v13 = vld [vmem:[#allocation9 + $0x370] sm:$0xff] }
 0x278   : > { %2827 = vmatpush2.bf16.msra.mxu1 %v6999_v33  ;;  %v1286_v33 = vld [vmem:[#allocation9 + $0x4b0] sm:$0xff] }
 0x279   : > { %2870 = vmatpush2.bf16.msra.mxu0 %v7127_v34  ;;  %2828 = vmatprep.subr.bf16.mxu1 %v6992_v35  ;;  %v6945_v34 = vcombine.low %v1162_v19, %v1166_v20  ;;  %v7073_v35 = vcombine.low %v1290_v21, %v1294_v22  ;;  %v7066_v38 = vcombine.high %v1282_v30, %v1286_v33  ;;  %v1370_v14 = vld [vmem:[#allocation9 + $0x750] sm:$0xff] }
 0x27a   : > { %2871 = vmatprep.subr.bf16.mxu0 %v7120_v36  ;;  %v6938_v36 = vcombine.high %v1154_v27, %v1158_v28  ;;  %v1234_v20 = vld [vmem:[#allocation9 + $0x310] sm:$0xff] }
 0x27b   : > { %v1238_v21 = vld [vmem:[#allocation9 + $0x330] sm:$0xff] }
 0x27c   : > { %2829 = vmatpush2.bf16.msra.mxu1 %v6991_v45  ;;  %v1278_v45 = vld [vmem:[#allocation9 + $0x470] sm:$0xff] }
 0x27d   : > { %2872 = vmatpush2.bf16.msra.mxu0 %v7119_v46  ;;  %2830 = vmatprep.subr.bf16.mxu1 %v6984_v47  ;;  %v6937_v46 = vcombine.low %v1154_v27, %v1158_v28  ;;  %v7065_v47 = vcombine.low %v1282_v30, %v1286_v33  ;;  %v7058_v49 = vcombine.high %v1274_v41, %v1278_v45  ;;  %v1362_v22 = vld [vmem:[#allocation9 + $0x710] sm:$0xff] }
 0x27e   : > { %2873 = vmatprep.subr.bf16.mxu0 %v7112_v48  ;;  %v6930_v48 = vcombine.high %v1146_v39, %v1150_v40  ;;  %v1226_v28 = vld [vmem:[#allocation9 + $0x2d0] sm:$0xff] }
 0x27f   : > { %v1230_v30 = vld [vmem:[#allocation9 + $0x2f0] sm:$0xff] }
 0x280   : > { %2831 = vmatpush2.bf16.msra.mxu1 %v6983_v59  ;;  %v1270_v59 = vld [vmem:[#allocation9 + $0x430] sm:$0xff] }
 0x281   : > { %2874 = vmatpush2.bf16.msra.mxu0 %v7111_v62  ;;  %2886 = vmatprep.subr.bf16.mxu1 %v6978_v63  ;;  %v6929_v62 = vcombine.low %v1146_v39, %v1150_v40  ;;  %v7057_v63 = vcombine.low %v1274_v41, %v1278_v45  ;;  %v7050_v1 = vcombine.high %v1266_v58, %v1270_v59  ;;  %v1354_v33 = vld [vmem:[#allocation9 + $0x6d0] sm:$0xff] }
 0x282   : > { %2929 = vmatprep.subr.bf16.mxu0 %v7106_v0  ;;  %v6922_v0 = vcombine.high %v1138_v50, %v1142_v54  ;;  %v1218_v40 = vld [vmem:[#allocation9 + $0x290] sm:$0xff] }
 0x283   : > { %2833 = vmatmul.mubr.bf16.vlgmr.msra.gmra.mxu1 %v9072_v42  ;;  %v1222_v41 = vld [vmem:[#allocation9 + $0x2b0] sm:$0xff] }
 0x284   : > { %2876 = vmatmul.mubr.bf16.vlgmr.msra.gmra.mxu0 %v9076_v44  ;;  %2887 = vmatpush1.bf16.msra.mxu1 %v6977_v51  ;;  %v1262_v51 = vld [vmem:[#allocation9 + $0x3f0] sm:$0xff] }
 0x285   : > { %2918 = vmatprep.mubr.bf16.mxu1 %v9070_v37  ;;  %2930 = vmatpush1.bf16.msra.mxu0 %v7105_v55  ;;  %v6921_v55 = vcombine.low %v1138_v50, %v1142_v54  ;;  %v7042_v57 = vcombine.high %v1258_v2, %v1262_v51  ;;  %v1346_v45 = vld [vmem:[#allocation9 + $0x690] sm:$0xff] }
 0x286   : > { %2961 = vmatprep.mubr.bf16.mxu0 %v9074_v43  ;;  %2888 = vmatprep.subr.bf16.mxu1 %v6970_v56  ;;  %v7049_v56 = vcombine.low %v1266_v58, %v1270_v59  ;;  %v1210_v54 = vld [vmem:[#allocation9 + $0x250] sm:$0xff] }
 0x287   : > { %2931 = vmatprep.subr.bf16.mxu0 %v7098_v4  ;;  %v1250_v4 = vld [vmem:[#allocation9 + $0x390] sm:$0xff] }
 0x288   : > { %2889 = vmatpush1.bf16.msra.mxu1 %v6969_v7  ;;  %v1382_v7 = vld [vmem:[#allocation9 + $0x7b0] sm:$0xff] }
 0x289   : > { %2932 = vmatpush1.bf16.msra.mxu0 %v7097_v8  ;;  %2890 = vmatprep.subr.bf16.mxu1 %v6962_v9  ;;  %v7041_v8 = vcombine.low %v1258_v2, %v1262_v51  ;;  %v7169_v9 = vcombine.low %v1386_v52, %v1390_v53  ;;  %v7162_v11 = vcombine.high %v1378_v6, %v1382_v7  ;;  %v1214_v58 = vld [vmem:[#allocation9 + $0x270] sm:$0xff] }
 0x28a   : > { %2933 = vmatprep.subr.bf16.mxu0 %v7090_v10  ;;  %v7034_v10 = vcombine.high %v1250_v4, %v1254_v5  ;;  %v1338_v59 = vld [vmem:[#allocation9 + $0x650] sm:$0xff] }
 0x28b   : > { %v1202_v51 = vld [vmem:[#allocation9 + $0x210] sm:$0xff] }
 0x28c   : > { %2891 = vmatpush1.bf16.msra.mxu1 %v6961_v15  ;;  %v1374_v15 = vld [vmem:[#allocation9 + $0x770] sm:$0xff] }
 0x28d   : > { %2934 = vmatpush1.bf16.msra.mxu0 %v7089_v16  ;;  %2892 = vmatprep.subr.bf16.mxu1 %v6954_v17  ;;  %v7033_v16 = vcombine.low %v1250_v4, %v1254_v5  ;;  %v7161_v17 = vcombine.low %v1378_v6, %v1382_v7  ;;  %v7154_v19 = vcombine.high %v1370_v14, %v1374_v15  ;;  %v1206_v52 = vld [vmem:[#allocation9 + $0x230] sm:$0xff]  ;;  %v1195_v5 = vld [vmem:[#allocation9 + $0x1d8] sm:$0xff] }
 0x28e   : > { %2935 = vmatprep.subr.bf16.mxu0 %v7082_v18  ;;  %v7026_v18 = vcombine.high %v1242_v12, %v1246_v13  ;;  %v1330_v53 = vld [vmem:[#allocation9 + $0x610] sm:$0xff]  ;;  %v1199_v6 = vld [vmem:[#allocation9 + $0x1f8] sm:$0xff] }
 0x28f   : > { %v1323_v7 = vld [vmem:[#allocation9 + $0x5d8] sm:$0xff] }
 0x290   : > { %2893 = vmatpush1.bf16.msra.mxu1 %v6953_v23  ;;  %v1366_v23 = vld [vmem:[#allocation9 + $0x730] sm:$0xff] }
 0x291   : > { %2936 = vmatpush1.bf16.msra.mxu0 %v7081_v24  ;;  %2894 = vmatprep.subr.bf16.mxu1 %v6946_v25  ;;  %v7025_v24 = vcombine.low %v1242_v12, %v1246_v13  ;;  %v7153_v25 = vcombine.low %v1370_v14, %v1374_v15  ;;  %v7146_v27 = vcombine.high %v1362_v22, %v1366_v23  ;;  %v1187_v13 = vld [vmem:[#allocation9 + $0x198] sm:$0xff] }
 0x292   : > { %2937 = vmatprep.subr.bf16.mxu0 %v7074_v26  ;;  %v7018_v26 = vcombine.high %v1234_v20, %v1238_v21  ;;  %v1191_v14 = vld [vmem:[#allocation9 + $0x1b8] sm:$0xff]  ;;  %v6979_v15 = vcombine.low %v1195_v5, %v1199_v6 }
 0x294   : > { %2895 = vmatpush1.bf16.msra.mxu1 %v6945_v34  ;;  %v1358_v34 = vld [vmem:[#allocation9 + $0x6f0] sm:$0xff] }
 0x295   : > { %2938 = vmatpush1.bf16.msra.mxu0 %v7073_v35  ;;  %2896 = vmatprep.subr.bf16.mxu1 %v6938_v36  ;;  %v7017_v35 = vcombine.low %v1234_v20, %v1238_v21  ;;  %v7145_v36 = vcombine.low %v1362_v22, %v1366_v23  ;;  %v7138_v39 = vcombine.high %v1354_v33, %v1358_v34  ;;  %v1179_v20 = vld [vmem:[#allocation9 + $0x158] sm:$0xff] }
 0x296   : > { %2939 = vmatprep.subr.bf16.mxu0 %v7066_v38  ;;  %v7010_v38 = vcombine.high %v1226_v28, %v1230_v30  ;;  %v1183_v21 = vld [vmem:[#allocation9 + $0x178] sm:$0xff] }
 0x297   : > { %v1307_v23 = vld [vmem:[#allocation9 + $0x558] sm:$0xff] }
 0x298   : > { %2897 = vmatpush1.bf16.msra.mxu1 %v6937_v46  ;;  %v1350_v46 = vld [vmem:[#allocation9 + $0x6b0] sm:$0xff] }
 0x299   : > { %2940 = vmatpush1.bf16.msra.mxu0 %v7065_v47  ;;  %2898 = vmatprep.subr.bf16.mxu1 %v6930_v48  ;;  %v7009_v47 = vcombine.low %v1226_v28, %v1230_v30  ;;  %v7137_v48 = vcombine.low %v1354_v33, %v1358_v34  ;;  %v7130_v50 = vcombine.high %v1346_v45, %v1350_v46  ;;  %v1171_v30 = vld [vmem:[#allocation9 + $0x118] sm:$0xff] }
 0x29a   : > { %2941 = vmatprep.subr.bf16.mxu0 %v7058_v49  ;;  %v7002_v49 = vcombine.high %v1218_v40, %v1222_v41  ;;  %v1175_v33 = vld [vmem:[#allocation9 + $0x138] sm:$0xff] }
 0x29b   : > { %v1299_v34 = vld [vmem:[#allocation9 + $0x518] sm:$0xff] }
 0x29c   : > { %2899 = vmatpush1.bf16.msra.mxu1 %v6929_v62  ;;  %v1342_v62 = vld [vmem:[#allocation9 + $0x670] sm:$0xff] }
 0x29d   : > { %2942 = vmatpush1.bf16.msra.mxu0 %v7057_v63  ;;  %2900 = vmatprep.subr.bf16.mxu1 %v6922_v0  ;;  %v7001_v63 = vcombine.low %v1218_v40, %v1222_v41  ;;  %v7129_v0 = vcombine.low %v1346_v45, %v1350_v46  ;;  %v7122_v2 = vcombine.high %v1338_v59, %v1342_v62  ;;  %v1163_v40 = vld [vmem:[#allocation9 + $0xd8] sm:$0xff] }
 0x29e   : > { %2943 = vmatprep.subr.bf16.mxu0 %v7050_v1  ;;  %v6994_v1 = vcombine.high %v1210_v54, %v1214_v58  ;;  %v1167_v41 = vld [vmem:[#allocation9 + $0xf8] sm:$0xff] }
 0x29f   : > { %v1291_v45 = vld [vmem:[#allocation9 + $0x4d8] sm:$0xff] }
 0x2a0   : > { %2901 = vmatpush1.bf16.msra.mxu1 %v6921_v55  ;;  %v1334_v55 = vld [vmem:[#allocation9 + $0x630] sm:$0xff]  ;;  %v1295_v46 = vld [vmem:[#allocation9 + $0x4f8] sm:$0xff] }
 0x2a1   : > { %2944 = vmatpush1.bf16.msra.mxu0 %v7049_v56  ;;  %2902 = vmatprep.subr.bf16.mxu1 %v7042_v57  ;;  %v6993_v56 = vcombine.low %v1210_v54, %v1214_v58  ;;  %v7121_v57 = vcombine.low %v1338_v59, %v1342_v62  ;;  %v7114_v4 = vcombine.high %v1330_v53, %v1334_v55  ;;  %v1159_v54 = vld [vmem:[#allocation9 + $0xb8] sm:$0xff] }
 0x2a2   : > { %2945 = vmatprep.subr.bf16.mxu0 %v7170_v3  ;;  %v6986_v3 = vcombine.high %v1202_v51, %v1206_v52  ;;  %v1283_v58 = vld [vmem:[#allocation9 + $0x498] sm:$0xff]  ;;  %v6947_v62 = vcombine.low %v1163_v40, %v1167_v41 }
 0x2a3   : > { %v1287_v59 = vld [vmem:[#allocation9 + $0x4b8] sm:$0xff] }
 0x2a4   : > { %2903 = vmatpush2.bf16.msra.mxu1 %v7041_v8  ;;  %v1327_v8 = vld [vmem:[#allocation9 + $0x5f8] sm:$0xff] }
 0x2a5   : > { %2946 = vmatpush2.bf16.msra.mxu0 %v7169_v9  ;;  %2904 = vmatprep.subr.bf16.mxu1 %v7034_v10  ;;  %v6985_v9 = vcombine.low %v1202_v51, %v1206_v52  ;;  %v7113_v10 = vcombine.low %v1330_v53, %v1334_v55  ;;  %v7108_v12 = vcombine.high %v1323_v7, %v1327_v8  ;;  %v1151_v51 = vld [vmem:[#allocation9 + $0x78] sm:$0xff] }
 0x2a6   : > { %2947 = vmatprep.subr.bf16.mxu0 %v7162_v11  ;;  %v6980_v11 = vcombine.high %v1195_v5, %v1199_v6  ;;  %v1275_v52 = vld [vmem:[#allocation9 + $0x458] sm:$0xff] }
 0x2a7   : > { %v1279_v53 = vld [vmem:[#allocation9 + $0x478] sm:$0xff] }
 0x2a8   : > { %2905 = vmatpush2.bf16.msra.mxu1 %v7033_v16  ;;  %v1315_v16 = vld [vmem:[#allocation9 + $0x598] sm:$0xff] }
 0x2a9   : > { %2948 = vmatpush2.bf16.msra.mxu0 %v7161_v17  ;;  %2906 = vmatprep.subr.bf16.mxu1 %v7026_v18  ;;  %v1319_v17 = vld [vmem:[#allocation9 + $0x5b8] sm:$0xff]  ;;  %v7107_v18 = vcombine.low %v1323_v7, %v1327_v8 }
 0x2aa   : > { %2949 = vmatprep.subr.bf16.mxu0 %v7154_v19  ;;  %v6972_v19 = vcombine.high %v1187_v13, %v1191_v14  ;;  %v7100_v22 = vcombine.high %v1315_v16, %v1319_v17  ;;  %v1143_v5 = vld [vmem:[#allocation9 + $0x38] sm:$0xff] }
 0x2ab   : > { %v1267_v6 = vld [vmem:[#allocation9 + $0x418] sm:$0xff] }
 0x2ac   : > { %2907 = vmatpush2.bf16.msra.mxu1 %v7025_v24  ;;  %v1311_v24 = vld [vmem:[#allocation9 + $0x578] sm:$0xff] }
 0x2ad   : > { %2950 = vmatpush2.bf16.msra.mxu0 %v7153_v25  ;;  %2908 = vmatprep.subr.bf16.mxu1 %v7018_v26  ;;  %v6971_v25 = vcombine.low %v1187_v13, %v1191_v14  ;;  %v7099_v26 = vcombine.low %v1315_v16, %v1319_v17  ;;  %v7092_v28 = vcombine.high %v1307_v23, %v1311_v24  ;;  %v1271_v7 = vld [vmem:[#allocation9 + $0x438] sm:$0xff] }
 0x2ae   : > { %2951 = vmatprep.subr.bf16.mxu0 %v7146_v27  ;;  %v6964_v27 = vcombine.high %v1179_v20, %v1183_v21  ;;  %v1263_v13 = vld [vmem:[#allocation9 + $0x3f8] sm:$0xff]  ;;  %v7051_v17 = vcombine.low %v1267_v6, %v1271_v7 }
 0x2af   : > { %v1387_v14 = vld [vmem:[#allocation9 + $0x7d8] sm:$0xff] }
 0x2b0   : > { %2909 = vmatpush2.bf16.msra.mxu1 %v7017_v35  ;;  %v1303_v35 = vld [vmem:[#allocation9 + $0x538] sm:$0xff] }
 0x2b1   : > { %2952 = vmatpush2.bf16.msra.mxu0 %v7145_v36  ;;  %2910 = vmatprep.subr.bf16.mxu1 %v7010_v38  ;;  %v6963_v36 = vcombine.low %v1179_v20, %v1183_v21  ;;  %v7091_v38 = vcombine.low %v1307_v23, %v1311_v24  ;;  %v1251_v20 = vld [vmem:[#allocation9 + $0x398] sm:$0xff] }
 0x2b2   : > { %2953 = vmatprep.subr.bf16.mxu0 %v7138_v39  ;;  %v6956_v39 = vcombine.high %v1171_v30, %v1175_v33  ;;  %v1255_v21 = vld [vmem:[#allocation9 + $0x3b8] sm:$0xff] }
 0x2b3   : > { %v1383_v23 = vld [vmem:[#allocation9 + $0x7b8] sm:$0xff] }
 0x2b4   : > { %2911 = vmatpush2.bf16.msra.mxu1 %v7009_v47  ;;  %v7083_v47 = vcombine.low %v1299_v34, %v1303_v35 }
 0x2b5   : > { %2954 = vmatpush2.bf16.msra.mxu0 %v7137_v48  ;;  %2912 = vmatprep.subr.bf16.mxu1 %v7002_v49  ;;  %v6948_v48 = vcombine.high %v1163_v40, %v1167_v41  ;;  %v7076_v49 = vcombine.high %v1291_v45, %v1295_v46  ;;  %v1239_v40 = vld [vmem:[#allocation9 + $0x338] sm:$0xff] }
 0x2b6   : > { %2955 = vmatprep.subr.bf16.mxu0 %v7130_v50  ;;  %v1155_v50 = vld [vmem:[#allocation9 + $0x98] sm:$0xff] }
 0x2b7   : > { %v6939_v55 = vcombine.low %v1155_v50, %v1159_v54  ;;  %v1363_v41 = vld [vmem:[#allocation9 + $0x718] sm:$0xff] }
 0x2b8   : > { %2913 = vmatpush2.bf16.msra.mxu1 %v7001_v63  ;;  %v7075_v63 = vcombine.low %v1291_v45, %v1295_v46  ;;  %v1367_v45 = vld [vmem:[#allocation9 + $0x738] sm:$0xff] }
 0x2b9   : > { %2956 = vmatpush2.bf16.msra.mxu0 %v7129_v0  ;;  %2914 = vmatprep.subr.bf16.mxu1 %v6994_v1  ;;  %v6940_v0 = vcombine.high %v1155_v50, %v1159_v54  ;;  %v7068_v1 = vcombine.high %v1283_v58, %v1287_v59  ;;  %v1231_v50 = vld [vmem:[#allocation9 + $0x2f8] sm:$0xff] }
 0x2ba   : > { %2957 = vmatprep.subr.bf16.mxu0 %v7122_v2  ;;  %v1147_v2 = vld [vmem:[#allocation9 + $0x58] sm:$0xff] }
 0x2bb   : > { %v6931_v8 = vcombine.low %v1147_v2, %v1151_v51  ;;  %v1355_v54 = vld [vmem:[#allocation9 + $0x6d8] sm:$0xff] }
 0x2bc   : > { %2915 = vmatpush2.bf16.msra.mxu1 %v6993_v56  ;;  %v7067_v56 = vcombine.low %v1283_v58, %v1287_v59  ;;  %v1359_v58 = vld [vmem:[#allocation9 + $0x6f8] sm:$0xff] }
 0x2bd   : > { %2958 = vmatpush2.bf16.msra.mxu0 %v7121_v57  ;;  %2916 = vmatprep.subr.bf16.mxu1 %v6986_v3  ;;  %v6932_v57 = vcombine.high %v1147_v2, %v1151_v51  ;;  %v7060_v3 = vcombine.high %v1275_v52, %v1279_v53  ;;  %v1223_v2 = vld [vmem:[#allocation9 + $0x2b8] sm:$0xff] }
 0x2be   : > { %2959 = vmatprep.subr.bf16.mxu0 %v7114_v4  ;;  %v1139_v4 = vld [vmem:[#allocation9 + $0x18] sm:$0xff] }
 0x2bf   : > { %v6923_v16 = vcombine.low %v1139_v4, %v1143_v5  ;;  %v1347_v51 = vld [vmem:[#allocation9 + $0x698] sm:$0xff] }
 0x2c0   : > { %2917 = vmatpush2.bf16.msra.mxu1 %v6985_v9  ;;  %v7059_v9 = vcombine.low %v1275_v52, %v1279_v53  ;;  %v1351_v52 = vld [vmem:[#allocation9 + $0x6b8] sm:$0xff] }
 0x2c1   : > { %2960 = vmatpush2.bf16.msra.mxu0 %v7113_v10  ;;  %2972 = vmatprep.subr.bf16.mxu1 %v6980_v11  ;;  %v6924_v10 = vcombine.high %v1139_v4, %v1143_v5  ;;  %v7052_v11 = vcombine.high %v1267_v6, %v1271_v7  ;;  %v1215_v4 = vld [vmem:[#allocation9 + $0x278] sm:$0xff] }
 0x2c2   : > { %3015 = vmatprep.subr.bf16.mxu0 %v7108_v12  ;;  %v1259_v12 = vld [vmem:[#allocation9 + $0x3d8] sm:$0xff] }
 0x2c3   : > { %2919 = vmatmul.mubr.bf16.vlgmr.msra.gmra.mxu1 %v9072_v42  ;;  %v7043_v24 = vcombine.low %v1259_v12, %v1263_v13  ;;  %v1339_v5 = vld [vmem:[#allocation9 + $0x658] sm:$0xff] }
 0x2c4   : > { %2962 = vmatmul.mubr.bf16.vlgmr.msra.gmra.mxu0 %v9076_v44  ;;  %2973 = vmatpush1.bf16.msra.mxu1 %v6979_v15  ;;  %v1391_v15 = vld [vmem:[#allocation9 + $0x7f8] sm:$0xff] }
 0x2c5   : > { %3004 = vmatprep.mubr.bf16.mxu1 %v9070_v37  ;;  %3016 = vmatpush1.bf16.msra.mxu0 %v7107_v18  ;;  %v7084_v37 = vcombine.high %v1299_v34, %v1303_v35  ;;  %v7044_v18 = vcombine.high %v1259_v12, %v1263_v13  ;;  %v1375_v34 = vld [vmem:[#allocation9 + $0x778] sm:$0xff]  ;;  %v7035_v35 = vcombine.low %v1251_v20, %v1255_v21 }
 0x2c6   : > { %3047 = vmatprep.mubr.bf16.mxu0 %v9074_v43  ;;  %2974 = vmatprep.subr.bf16.mxu1 %v6972_v19  ;;  %v6955_v43 = vcombine.low %v1171_v30, %v1175_v33  ;;  %v7172_v19 = vcombine.high %v1387_v14, %v1391_v15  ;;  %v1247_v30 = vld [vmem:[#allocation9 + $0x378] sm:$0xff] }
 0x2c7   : > { %3017 = vmatprep.subr.bf16.mxu0 %v7100_v22  ;;  %v1379_v22 = vld [vmem:[#allocation9 + $0x798] sm:$0xff] }
 0x2c8   : > { %2975 = vmatpush1.bf16.msra.mxu1 %v6971_v25  ;;  %v7171_v25 = vcombine.low %v1387_v14, %v1391_v15  ;;  %v1371_v33 = vld [vmem:[#allocation9 + $0x758] sm:$0xff] }
 0x2c9   : > { %3018 = vmatpush1.bf16.msra.mxu0 %v7099_v26  ;;  %2976 = vmatprep.subr.bf16.mxu1 %v6964_v27  ;;  %v7036_v26 = vcombine.high %v1251_v20, %v1255_v21  ;;  %v7164_v27 = vcombine.high %v1379_v22, %v1383_v23  ;;  %v1343_v6 = vld [vmem:[#allocation9 + $0x678] sm:$0xff]  ;;  %v7932_v21 = vld [vmem:[#allocation12 + $0x18c] ss:$28 sps:$4 sm:$0xff]  }
 0x2ca   : > { %3019 = vmatprep.subr.bf16.mxu0 %v7092_v28  ;;  %v1243_v28 = vld [vmem:[#allocation9 + $0x358] sm:$0xff] }
 0x2cb   : > { %v7027_v46 = vcombine.low %v1243_v28, %v1247_v30  ;;  %v1207_v12 = vld [vmem:[#allocation9 + $0x238] sm:$0xff] }
 0x2cc   : > { %2977 = vmatpush1.bf16.msra.mxu1 %v6963_v36  ;;  %v7163_v36 = vcombine.low %v1379_v22, %v1383_v23  ;;  %v1331_v13 = vld [vmem:[#allocation9 + $0x618] sm:$0xff]  ;;  %v7947_v22 = vld [vmem:[#allocation12 + $0x50c] ss:$28 sps:$4 sm:$0xff]  }
 0x2cd   : > { %3020 = vmatpush1.bf16.msra.mxu0 %v7091_v38  ;;  %2978 = vmatprep.subr.bf16.mxu1 %v6956_v39  ;;  %v7028_v38 = vcombine.high %v1243_v28, %v1247_v30  ;;  %v7156_v39 = vcombine.high %v1371_v33, %v1375_v34  ;;  %v1335_v14 = vld [vmem:[#allocation9 + $0x638] sm:$0xff]  ;;  %v7930_v23 = vld [vmem:[#allocation12 + $0x188] ss:$28 sps:$4 sm:$0xff]  }
 0x2ce   : > { %3021 = vmatprep.subr.bf16.mxu0 %v7084_v37  ;;  %v1235_v37 = vld [vmem:[#allocation9 + $0x318] sm:$0xff]  ;;  %v7115_v20 = vcombine.low %v1331_v13, %v1335_v14 }
 0x2cf   : > { %v7019_v59 = vcombine.low %v1235_v37, %v1239_v40  ;;  %v7953_v28 = vld [vmem:[#allocation12 + $0x4d4] ss:$28 sps:$4 sm:$0xff]  }
 0x2d0   : > { %2979 = vmatpush1.bf16.msra.mxu1 %v6955_v43  ;;  %v7155_v43 = vcombine.low %v1371_v33, %v1375_v34  ;;  %v7933_v34 = vld [vmem:[#allocation12 + $0x150] ss:$28 sps:$4 sm:$0xff]  }
 0x2d1   : > { %3022 = vmatpush1.bf16.msra.mxu0 %v7083_v47  ;;  %2980 = vmatprep.subr.bf16.mxu1 %v6948_v48  ;;  %v7020_v47 = vcombine.high %v1235_v37, %v1239_v40  ;;  %v7148_v48 = vcombine.high %v1363_v41, %v1367_v45  ;;  %v7959_v40 = vld [vmem:[#allocation12 + $0x49c] ss:$28 sps:$4 sm:$0xff]  }
 0x2d2   : > { %3023 = vmatprep.subr.bf16.mxu0 %v7076_v49  ;;  %v1227_v49 = vld [vmem:[#allocation9 + $0x2d8] sm:$0xff] }
 0x2d3   : > { %v7011_v53 = vcombine.low %v1227_v49, %v1231_v50 }
 0x2d4   : > { %2981 = vmatpush1.bf16.msra.mxu1 %v6947_v62  ;;  %v7147_v62 = vcombine.low %v1363_v41, %v1367_v45  ;;  %v7936_v45 = vld [vmem:[#allocation12 + $0x118] ss:$28 sps:$4 sm:$0xff]  }
 0x2d5   : > { %3024 = vmatpush1.bf16.msra.mxu0 %v7075_v63  ;;  %2982 = vmatprep.subr.bf16.mxu1 %v6940_v0  ;;  %v7012_v63 = vcombine.high %v1227_v49, %v1231_v50  ;;  %v7140_v0 = vcombine.high %v1355_v54, %v1359_v58 }
 0x2d6   : > { %3025 = vmatprep.subr.bf16.mxu0 %v7068_v1  ;;  %v1219_v1 = vld [vmem:[#allocation9 + $0x298] sm:$0xff] }
 0x2d7   : > { %v7003_v7 = vcombine.low %v1219_v1, %v1223_v2 }
 0x2d8   : > { %2983 = vmatpush1.bf16.msra.mxu1 %v6939_v55  ;;  %v7139_v55 = vcombine.low %v1355_v54, %v1359_v58  ;;  %v7939_v54 = vld [vmem:[#allocation12 + $0xe0] ss:$28 sps:$4 sm:$0xff]  }
 0x2d9   : > { %3026 = vmatpush1.bf16.msra.mxu0 %v7067_v56  ;;  %2984 = vmatprep.subr.bf16.mxu1 %v6932_v57  ;;  %v7004_v56 = vcombine.high %v1219_v1, %v1223_v2  ;;  %v7132_v57 = vcombine.high %v1347_v51, %v1351_v52  ;;  %v7942_v2 = vld [vmem:[#allocation12 + $0xa8] ss:$28 sps:$4 sm:$0xff]  }
 0x2da   : > { %3027 = vmatprep.subr.bf16.mxu0 %v7060_v3  ;;  %v1211_v3 = vld [vmem:[#allocation9 + $0x258] sm:$0xff] }
 0x2db   : > { %v6995_v15 = vcombine.low %v1211_v3, %v1215_v4 }
 0x2dc   : > { %2985 = vmatpush1.bf16.msra.mxu1 %v6931_v8  ;;  %v7131_v8 = vcombine.low %v1347_v51, %v1351_v52 }
 0x2dd   : > { %3028 = vmatpush1.bf16.msra.mxu0 %v7059_v9  ;;  %2986 = vmatprep.subr.bf16.mxu1 %v6924_v10  ;;  %v6996_v9 = vcombine.high %v1211_v3, %v1215_v4  ;;  %v7124_v10 = vcombine.high %v1339_v5, %v1343_v6  ;;  %v7948_v3 = vld [vmem:[#allocation12 + $0x70] ss:$28 sps:$4 sm:$0xff]   ;;  %v7956_v4 = vld [vmem:[#allocation12 + $0x3c] ss:$28 sps:$4 sm:$0xff]  }
 0x2de   : > { %3029 = vmatprep.subr.bf16.mxu0 %v7052_v11  ;;  %v1203_v11 = vld [vmem:[#allocation9 + $0x218] sm:$0xff] }
 0x2e0   : > { %2987 = vmatpush1.bf16.msra.mxu1 %v6923_v16  ;;  %v7123_v16 = vcombine.low %v1339_v5, %v1343_v6  ;;  %v7975_v5 = vld [vmem:[#allocation12 + $0x3f0] ss:$28 sps:$4 sm:$0xff]   ;;  %v7983_v6 = vld [vmem:[#allocation12 + $0x3bc] ss:$28 sps:$4 sm:$0xff]  }
 0x2e1   : > { %3030 = vmatpush1.bf16.msra.mxu0 %v7051_v17  ;;  %2988 = vmatprep.subr.bf16.mxu1 %v7044_v18  ;;  %v6988_v17 = vcombine.high %v1203_v11, %v1207_v12  ;;  %v7116_v18 = vcombine.high %v1331_v13, %v1335_v14  ;;  %v7987_v13 = vld [vmem:[#allocation12 + $0x380] ss:$28 sps:$4 sm:$0xff]   ;;  %v7995_v14 = vld [vmem:[#allocation12 + $0x6cc] ss:$28 sps:$4 sm:$0xff]  }
 0x2e2   : > { %3031 = vmatprep.subr.bf16.mxu0 %v7172_v19  ;;  %v6987_v19 = vcombine.low %v1203_v11, %v1207_v12  ;;  %v7960_v11 = vld [vmem:[#allocation12] ss:$28 sps:$4 sm:$0xff]   ;;  %v7968_v12 = vld [vmem:[#allocation12 + $0x34c] ss:$28 sps:$4 sm:$0xff]  }
 0x2e4   : > { %2989 = vmatpush2.bf16.msra.mxu1 %v7043_v24  ;;  %v9098_v24 = vld [vmem:[#allocation10] sm:$0xff] }
 0x2e5   : > { %3032 = vmatpush2.bf16.msra.mxu0 %v7171_v25  ;;  %2990 = vmatprep.subr.bf16.mxu1 %v7036_v26  ;;  %v7935_v25 = vld [vmem:[#allocation12 + $0x154] ss:$28 sps:$4 sm:$0xff]   ;;  %v7945_v26 = vld [vmem:[#allocation12 + $0x508] ss:$28 sps:$4 sm:$0xff]  }
 0x2e6   : > { %3033 = vmatprep.subr.bf16.mxu0 %v7164_v27  ;;  %v1401_v27 = vrot.slane %v9098_v24, %v9039_v32 }
 0x2e8   : > { %2991 = vmatpush2.bf16.msra.mxu1 %v7035_v35 }
 0x2e9   : > { %3034 = vmatpush2.bf16.msra.mxu0 %v7163_v36  ;;  %2992 = vmatprep.subr.bf16.mxu1 %v7028_v38  ;;  %v7938_v36 = vld [vmem:[#allocation12 + $0x11c] ss:$28 sps:$4 sm:$0xff]   ;;  %v7951_v38 = vld [vmem:[#allocation12 + $0x4d0] ss:$28 sps:$4 sm:$0xff]  }
 0x2ea   : > { %3035 = vmatprep.subr.bf16.mxu0 %v7156_v39 }
 0x2ec   : > { %2993 = vmatpush2.bf16.msra.mxu1 %v7027_v46 }
 0x2ed   : > { %3036 = vmatpush2.bf16.msra.mxu0 %v7155_v43  ;;  %2994 = vmatprep.subr.bf16.mxu1 %v7020_v47  ;;  %v7941_v43 = vld [vmem:[#allocation12 + $0xe4] ss:$28 sps:$4 sm:$0xff]   ;;  %v7957_v47 = vld [vmem:[#allocation12 + $0x498] ss:$28 sps:$4 sm:$0xff]  }
 0x2ee   : > { %3037 = vmatprep.subr.bf16.mxu0 %v7148_v48  ;;  %v7965_v48 = vld [vmem:[#allocation12 + $0x464] ss:$28 sps:$4 sm:$0xff]  }
 0x2f0   : > { %2995 = vmatpush2.bf16.msra.mxu1 %v7019_v59 }
 0x2f1   : > { %3038 = vmatpush2.bf16.msra.mxu0 %v7147_v62  ;;  %2996 = vmatprep.subr.bf16.mxu1 %v7012_v63  ;;  %v7944_v62 = vld [vmem:[#allocation12 + $0xac] ss:$28 sps:$4 sm:$0xff]   ;;  %v7963_v63 = vld [vmem:[#allocation12 + $0x460] ss:$28 sps:$4 sm:$0xff]  }
 0x2f2   : > { %3039 = vmatprep.subr.bf16.mxu0 %v7140_v0  ;;  %v7971_v0 = vld [vmem:[#allocation12 + $0x42c] ss:$28 sps:$4 sm:$0xff]  }
 0x2f4   : > { %2997 = vmatpush2.bf16.msra.mxu1 %v7011_v53  ;;  %v7950_v53 = vld [vmem:[#allocation12 + $0x74] ss:$28 sps:$4 sm:$0xff]  }
 0x2f5   : > { %3040 = vmatpush2.bf16.msra.mxu0 %v7139_v55  ;;  %2998 = vmatprep.subr.bf16.mxu1 %v7004_v56  ;;  %v7969_v55 = vld [vmem:[#allocation12 + $0x428] ss:$28 sps:$4 sm:$0xff]  }
 0x2f6   : > { %3041 = vmatprep.subr.bf16.mxu0 %v7132_v57  ;;  %v7977_v57 = vld [vmem:[#allocation12 + $0x3f4] ss:$28 sps:$4 sm:$0xff]  }
 0x2f8   : > { %2999 = vmatpush2.bf16.msra.mxu1 %v7003_v7  ;;  %v7954_v7 = vld [vmem:[#allocation12 + $0x38] ss:$28 sps:$4 sm:$0xff]  }
 0x2f9   : > { %3042 = vmatpush2.bf16.msra.mxu0 %v7131_v8  ;;  %3000 = vmatprep.subr.bf16.mxu1 %v6996_v9  ;;  %v7962_v8 = vld [vmem:[#allocation12 + $0x4] ss:$28 sps:$4 sm:$0xff]   ;;  %v7981_v9 = vld [vmem:[#allocation12 + $0x3b8] ss:$28 sps:$4 sm:$0xff]  }
 0x2fa   : > { %3043 = vmatprep.subr.bf16.mxu0 %v7124_v10  ;;  %v7989_v10 = vld [vmem:[#allocation12 + $0x384] ss:$28 sps:$4 sm:$0xff]  }
 0x2fc   : > { %3001 = vmatpush2.bf16.msra.mxu1 %v6995_v15  ;;  %v7966_v15 = vld [vmem:[#allocation12 + $0x348] ss:$28 sps:$4 sm:$0xff]  }
 0x2fd   : > { %3044 = vmatpush2.bf16.msra.mxu0 %v7123_v16  ;;  %3002 = vmatprep.subr.bf16.mxu1 %v6988_v17  ;;  %v7974_v16 = vld [vmem:[#allocation12 + $0x314] ss:$28 sps:$4 sm:$0xff]   ;;  %v7993_v17 = vld [vmem:[#allocation12 + $0x6c8] ss:$28 sps:$4 sm:$0xff]  }
 0x2fe   : > { %3045 = vmatprep.subr.bf16.mxu0 %v7116_v18  ;;  %v8001_v18 = vld [vmem:[#allocation12 + $0x694] ss:$28 sps:$4 sm:$0xff]  }
 0x300   : > { %3003 = vmatpush2.bf16.msra.mxu1 %v6987_v19  ;;  %v7972_v19 = vld [vmem:[#allocation12 + $0x310] ss:$28 sps:$4 sm:$0xff]  }
 0x301   : > { %3046 = vmatpush2.bf16.msra.mxu0 %v7115_v20  ;;  %5967 = vmatprep.subr.bf16.mxu1 %v7932_v21  ;;  %v7980_v20 = vld [vmem:[#allocation12 + $0x2dc] ss:$28 sps:$4 sm:$0xff]   ;;  %v7999_v21 = vld [vmem:[#allocation12 + $0x690] ss:$28 sps:$4 sm:$0xff]  }
 0x302   : > { %6010 = vmatprep.subr.bf16.mxu0 %v7947_v22  ;;  %v8007_v22 = vld [vmem:[#allocation12 + $0x65c] ss:$28 sps:$4 sm:$0xff]  }
 0x303   : > { %3005 = vmatmul.mubr.bf16.vlgmr.msra.gmra.mxu1 %v9072_v42  ;;  %v9103_v30 = vpop.f32.mrf.mxu1 }
 0x304   : > { %3048 = vmatmul.mubr.bf16.vlgmr.msra.gmra.mxu0 %v9076_v44  ;;  %v9106_v33 = vpop.f32.mrf.mxu0  ;;  %5968 = vmatpush1.bf16.msra.mxu1 %v7930_v23  ;;  %v7978_v23 = vld [vmem:[#allocation12 + $0x2d8] ss:$28 sps:$4 sm:$0xff]  }
 0x305   : > { %v2750_v35 = vpop.f32.mrf.mxu1  ;;  %5969 = vmatprep.subr.bf16.mxu1 %v7935_v25  ;;  %6011 = vmatpush1.bf16.msra.mxu0 %v7945_v26  ;;  %v7986_v25 = vld [vmem:[#allocation12 + $0x2a4] ss:$28 sps:$4 sm:$0xff]   ;;  %v8005_v26 = vld [vmem:[#allocation12 + $0x658] ss:$28 sps:$4 sm:$0xff]  }
 0x306   : > { %v2751_v39 = vadd.f32 %v2750_v35, %v1401_v27  ;;  %v2793_v37 = vpop.f32.mrf.mxu0  ;;  %6012 = vmatprep.subr.bf16.mxu0 %v7953_v28  ;;  %v7984_v28 = vld [vmem:[#allocation12 + $0x2a0] ss:$28 sps:$4 sm:$0xff]  }
 0x307   : > { %v9108_v41 = vpop.f32.mrf.mxu1  ;;  %v8011_v35 = vld [vmem:[#allocation12 + $0x620] ss:$28 sps:$4 sm:$0xff]  }
 0x308   : > { %v9110_v42 = vpop.f32.mrf.mxu0  ;;  %5970 = vmatpush1.bf16.msra.mxu1 %v7933_v34  ;;  %v2794_v44 = vadd.f32 %v2793_v37, %v2751_v39  ;;  %v7992_v34 = vld [vmem:[#allocation12 + $0x26c] ss:$28 sps:$4 sm:$0xff]   ;;  %v7998_v37 = vld [vmem:[#allocation12 + $0x234] ss:$28 sps:$4 sm:$0xff]  }
 0x309   : > { %v2754_v46 = vpop.f32.mrf.mxu1  ;;  %5971 = vmatprep.subr.bf16.mxu1 %v7938_v36  ;;  %6013 = vmatpush1.bf16.msra.mxu0 %v7951_v38  ;;  %v8016_v36 = vld [vmem:[#allocation12 + $0x5ec] ss:$28 sps:$4 sm:$0xff]   ;;  %v1397_v38 = vrot.slane %v9098_v24, %v9036_v31 }
 0x30a   : > { %6014 = vmatprep.subr.bf16.mxu0 %v7959_v40  ;;  %v2755_v49 = vadd.f32 %v2754_v46, %v1401_v27  ;;  %v2797_v50 = vpop.f32.mrf.mxu0  ;;  %v3075_v58 = vmul.f32 0.2, %v2794_v44  ;;  %vm3059_vm12 = vcmp.gt.f32.partialorder %v2794_v44, 0.0  ;;  %v8013_v27 = vld [vmem:[#allocation12 + $0x624] ss:$28 sps:$4 sm:$0xff]  }
 0x30b   : > { %v7990_v39 = vld [vmem:[#allocation12 + $0x268] ss:$28 sps:$4 sm:$0xff]   ;;  %v2749_v46 = vadd.f32 %v9103_v30, %v1397_v38 }
 0x30c   : > { %5972 = vmatpush1.bf16.msra.mxu1 %v7936_v45  ;;  %v2798_v59 = vadd.f32 %v2797_v50, %v2755_v49  ;;  %v3091_v51 = vsel %vm3059_vm12, %v2794_v44, %v3075_v58  ;;  %v8014_v40 = vld [vmem:[#allocation12 + $0x5e8] ss:$28 sps:$4 sm:$0xff]   ;;  %v2753_v45 = vadd.f32 %v9108_v41, %v1397_v38  ;;  %v8019_v44 = vld [vmem:[#allocation12 + $0x5b4] ss:$28 sps:$4 sm:$0xff]   ;;  %v8022_v50 = vld [vmem:[#allocation12 + $0x57c] ss:$28 sps:$4 sm:$0xff]  }
 0x30d   : > { %5973 = vmatprep.subr.bf16.mxu1 %v7941_v43  ;;  %6015 = vmatpush1.bf16.msra.mxu0 %v7957_v47  ;;  %v7996_v43 = vld [vmem:[#allocation12 + $0x230] ss:$28 sps:$4 sm:$0xff]   ;;  %v8004_v47 = vld [vmem:[#allocation12 + $0x1fc] ss:$28 sps:$4 sm:$0xff]   ;;  %v8010_v41 = vld [vmem:[#allocation12 + $0x1c4] ss:$28 sps:$4 sm:$0xff]  }
 0x30e   : > { %6016 = vmatprep.subr.bf16.mxu0 %v7965_v48  ;;  %vm3067_vm13 = vcmp.gt.f32.partialorder %v2798_v59, 0.0  ;;  %v3083_v1 = vmul.f32 0.2, %v2798_v59  ;;  %v8017_v48 = vld [vmem:[#allocation12 + $0x5b0] ss:$28 sps:$4 sm:$0xff]   ;;  %v2796_v49 = vadd.f32 %v9110_v42, %v2753_v45 }
 0x30f   : > { %v8002_v58 = vld [vmem:[#allocation12 + $0x1f8] ss:$28 sps:$4 sm:$0xff]   ;;  %v8025_v30 = vld [vmem:[#allocation12 + $0x544] ss:$28 sps:$4 sm:$0xff]  }
 0x310   : > { %5974 = vmatpush1.bf16.msra.mxu1 %v7939_v54  ;;  %v3099_v52 = vsel %vm3067_vm13, %v2798_v59, %v3083_v1  ;;  %v2792_v54 = vadd.f32 %v9106_v33, %v2749_v46  ;;  %v8020_v59 = vld [vmem:[#allocation12 + $0x578] ss:$28 sps:$4 sm:$0xff]   ;;  %vm3066_vm14 = vcmp.gt.f32.partialorder %v2796_v49, 0.0  ;;  %v8023_v42 = vld [vmem:[#allocation12 + $0x540] ss:$28 sps:$4 sm:$0xff]  }
 0x311   : > { %5975 = vmatprep.subr.bf16.mxu1 %v7944_v62  ;;  %6017 = vmatpush1.bf16.msra.mxu0 %v7963_v63  ;;  %v9112_v56 = vpack.c.bf16 %v3099_v52, %v3091_v51  ;;  %v3082_v62 = vmul.f32 0.2, %v2796_v49  ;;  %v8028_v1 = vld [vmem:[#allocation12 + $0x88c] ss:$28 sps:$4 sm:$0xff]  }
 0x312   : > { %6018 = vmatprep.subr.bf16.mxu0 %v7971_v0  ;;  %v3074_v63 = vmul.f32 0.2, %v2792_v54  ;;  %v8008_v0 = vld [vmem:[#allocation12 + $0x1c0] ss:$28 sps:$4 sm:$0xff]   ;;  %vm3058_vm15 = vcmp.gt.f32.partialorder %v2792_v54, 0.0 }
 0x313   : > { %5999 = vmatprep.mubr.bf16.mxu1 %v9112_v56  ;;  %v8076_v33 = vld [vmem:[#allocation12 + $0xc0c] ss:$28 sps:$4 sm:$0xff]  }
 0x314   : > { %5976 = vmatpush1.bf16.msra.mxu1 %v7942_v2  ;;  %v3098_v2 = vsel %vm3066_vm14, %v2796_v49, %v3082_v62  ;;  %v3090_v51 = vsel %vm3058_vm15, %v2792_v54, %v3074_v63  ;;  %v8026_v52 = vld [vmem:[#allocation12 + $0x888] ss:$28 sps:$4 sm:$0xff]   ;;  %v8046_v49 = vld [vmem:[#allocation12 + $0x73c] ss:$28 sps:$4 sm:$0xff]  }
 0x315   : > { %5977 = vmatprep.subr.bf16.mxu1 %v7950_v53  ;;  %6019 = vmatpush1.bf16.msra.mxu0 %v7969_v55  ;;  %v9121_v53 = vpack.c.bf16 %v3098_v2, %v3090_v51  ;;  %v8031_v55 = vld [vmem:[#allocation12 + $0x854] ss:$28 sps:$4 sm:$0xff]   ;;  %v8038_v38 = vld [vmem:[#allocation12 + $0x7a8] ss:$28 sps:$4 sm:$0xff]   ;;  %v8088_v54 = vld [vmem:[#allocation12 + $0xb9c] ss:$28 sps:$4 sm:$0xff]  }
 0x316   : > { %6020 = vmatprep.subr.bf16.mxu0 %v7977_v57  ;;  %v1405_v57 = vrot.slane %v9098_v24, %v9063_v61  ;;  %v8074_v46 = vld [vmem:[#allocation12 + $0xc08] ss:$28 sps:$4 sm:$0xff]   ;;  %v8055_v2 = vld [vmem:[#allocation12 + $0xa14] ss:$28 sps:$4 sm:$0xff]  }
 0x317   : > { %v8094_v62 = vld [vmem:[#allocation12 + $0xb64] ss:$28 sps:$4 sm:$0xff]   ;;  %v8052_v63 = vld [vmem:[#allocation12 + $0xa4c] ss:$28 sps:$4 sm:$0xff]   ;;  %v8106_v51 = vld [vmem:[#allocation12 + $0xaf4] ss:$28 sps:$4 sm:$0xff]  }
 0x318   : > { %5978 = vmatpush1.bf16.msra.mxu1 %v7948_v3  ;;  %v1409_v3 = vrot.slane %v9098_v24, %v9060_v60 }
 0x319   : > { %5979 = vmatprep.subr.bf16.mxu1 %v7956_v4  ;;  %6021 = vmatpush1.bf16.msra.mxu0 %v7975_v5 }
 0x31a   : > { %6022 = vmatprep.subr.bf16.mxu0 %v7983_v6  ;;  %v8029_v6 = vld [vmem:[#allocation12 + $0x850] ss:$28 sps:$4 sm:$0xff]  }
 0x31c   : > { %5980 = vmatpush1.bf16.msra.mxu1 %v7954_v7 }
 0x31d   : > { %5981 = vmatprep.subr.bf16.mxu1 %v7962_v8  ;;  %6023 = vmatpush1.bf16.msra.mxu0 %v7981_v9  ;;  %v8034_v8 = vld [vmem:[#allocation12 + $0x81c] ss:$28 sps:$4 sm:$0xff]  }
 0x31e   : > { %6024 = vmatprep.subr.bf16.mxu0 %v7989_v10 }
 0x320   : > { %5982 = vmatpush1.bf16.msra.mxu1 %v7960_v11 }
 0x321   : > { %5983 = vmatprep.subr.bf16.mxu1 %v7968_v12  ;;  %6025 = vmatpush1.bf16.msra.mxu0 %v7987_v13 }
 0x322   : > { %6026 = vmatprep.subr.bf16.mxu0 %v7995_v14 }
 0x324   : > { %5984 = vmatpush2.bf16.msra.mxu1 %v7966_v15  ;;  %v8032_v15 = vld [vmem:[#allocation12 + $0x818] ss:$28 sps:$4 sm:$0xff]  }
 0x325   : > { %5985 = vmatprep.subr.bf16.mxu1 %v7974_v16  ;;  %6027 = vmatpush2.bf16.msra.mxu0 %v7993_v17 }
 0x326   : > { %6028 = vmatprep.subr.bf16.mxu0 %v8001_v18  ;;  %v8037_v18 = vld [vmem:[#allocation12 + $0x7e4] ss:$28 sps:$4 sm:$0xff]  }
 0x328   : > { %5986 = vmatpush2.bf16.msra.mxu1 %v7972_v19 }
 0x329   : > { %5987 = vmatprep.subr.bf16.mxu1 %v7980_v20  ;;  %6029 = vmatpush2.bf16.msra.mxu0 %v7999_v21 }
 0x32a   : > { %6030 = vmatprep.subr.bf16.mxu0 %v8007_v22 }
 0x32c   : > { %5988 = vmatpush2.bf16.msra.mxu1 %v7978_v23 }
 0x32d   : > { %5989 = vmatprep.subr.bf16.mxu1 %v7986_v25  ;;  %6031 = vmatpush2.bf16.msra.mxu0 %v8005_v26  ;;  %v8035_v25 = vld [vmem:[#allocation12 + $0x7e0] ss:$28 sps:$4 sm:$0xff]  }
 0x32e   : > { %6032 = vmatprep.subr.bf16.mxu0 %v8013_v27 }
 0x330   : > { %5990 = vmatpush2.bf16.msra.mxu1 %v7984_v28  ;;  %v8040_v28 = vld [vmem:[#allocation12 + $0x7ac] ss:$28 sps:$4 sm:$0xff]  }
 0x331   : > { %5991 = vmatprep.subr.bf16.mxu1 %v7992_v34  ;;  %6033 = vmatpush2.bf16.msra.mxu0 %v8011_v35 }
 0x332   : > { %6034 = vmatprep.subr.bf16.mxu0 %v8016_v36 }
 0x334   : > { %5992 = vmatpush2.bf16.msra.mxu1 %v7990_v39 }
 0x335   : > { %5993 = vmatprep.subr.bf16.mxu1 %v7998_v37  ;;  %6035 = vmatpush2.bf16.msra.mxu0 %v8014_v40  ;;  %v8043_v40 = vld [vmem:[#allocation12 + $0x774] ss:$28 sps:$4 sm:$0xff]  }
 0x336   : > { %6036 = vmatprep.subr.bf16.mxu0 %v8019_v44 }
 0x338   : > { %5994 = vmatpush2.bf16.msra.mxu1 %v7996_v43 }
 0x339   : > { %5995 = vmatprep.subr.bf16.mxu1 %v8004_v47  ;;  %6037 = vmatpush2.bf16.msra.mxu0 %v8017_v48  ;;  %v8082_v47 = vld [vmem:[#allocation12 + $0xbd4] ss:$28 sps:$4 sm:$0xff]  }
 0x33a   : > { %6038 = vmatprep.subr.bf16.mxu0 %v8022_v50  ;;  %v8041_v48 = vld [vmem:[#allocation12 + $0x770] ss:$28 sps:$4 sm:$0xff]  }
 0x33b   : > { %v8080_v50 = vld [vmem:[#allocation12 + $0xbd0] ss:$28 sps:$4 sm:$0xff]  }
 0x33c   : > { %5996 = vmatpush2.bf16.msra.mxu1 %v8002_v58  ;;  %v8044_v58 = vld [vmem:[#allocation12 + $0x738] ss:$28 sps:$4 sm:$0xff]  }
 0x33d   : > { %5997 = vmatprep.subr.bf16.mxu1 %v8010_v41  ;;  %6039 = vmatpush2.bf16.msra.mxu0 %v8020_v59  ;;  %v8049_v41 = vld [vmem:[#allocation12 + $0x704] ss:$28 sps:$4 sm:$0xff]   ;;  %v8086_v59 = vld [vmem:[#allocation12 + $0xb98] ss:$28 sps:$4 sm:$0xff]  }
 0x33e   : > { %6040 = vmatprep.subr.bf16.mxu0 %v8025_v30  ;;  %v8047_v30 = vld [vmem:[#allocation12 + $0x700] ss:$28 sps:$4 sm:$0xff]  }
 0x340   : > { %5998 = vmatpush2.bf16.msra.mxu1 %v8008_v0  ;;  %v8092_v0 = vld [vmem:[#allocation12 + $0xb60] ss:$28 sps:$4 sm:$0xff]  }
 0x341   : > { %6041 = vmatpush2.bf16.msra.mxu0 %v8023_v42  ;;  %6053 = vmatprep.subr.bf16.mxu1 %v8028_v1  ;;  %v8100_v42 = vld [vmem:[#allocation12 + $0xb2c] ss:$28 sps:$4 sm:$0xff]  }
 0x342   : > { %6096 = vmatprep.subr.bf16.mxu0 %v8076_v33  ;;  %v8050_v1 = vld [vmem:[#allocation12 + $0xa48] ss:$28 sps:$4 sm:$0xff]  }
 0x343   : > { %v2834_v4 = vpop.f32.mrf.mxu1  ;;  %6000 = vmatmul.mubr.bf16.vlgmr.msra.gmra.mxu1 %v9121_v53  ;;  %v8098_v33 = vld [vmem:[#allocation12 + $0xb28] ss:$28 sps:$4 sm:$0xff]  }
 0x344   : > { %v2877_v5 = vpop.f32.mrf.mxu0  ;;  %6054 = vmatpush1.bf16.msra.mxu1 %v8026_v52  ;;  %v2835_v9 = vadd.f32 %v2834_v4, %v1405_v57  ;;  %v8053_v52 = vld [vmem:[#allocation12 + $0xa10] ss:$28 sps:$4 sm:$0xff]   ;;  %v8056_v4 = vld [vmem:[#allocation12 + $0x9d8] ss:$28 sps:$4 sm:$0xff]  }
 0x345   : > { %v2836_v7 = vpop.f32.mrf.mxu1  ;;  %6055 = vmatprep.subr.bf16.mxu1 %v8031_v55  ;;  %v8058_v55 = vld [vmem:[#allocation12 + $0x9dc] ss:$28 sps:$4 sm:$0xff]  }
 0x346   : > { %v2837_v10 = vadd.f32 %v2836_v7, %v1409_v3  ;;  %v2879_v11 = vpop.f32.mrf.mxu0  ;;  %v2878_v19 = vadd.f32 %v2877_v5, %v2835_v9  ;;  %v8061_v5 = vld [vmem:[#allocation12 + $0x9a4] ss:$28 sps:$4 sm:$0xff]   ;;  %v8064_v9 = vld [vmem:[#allocation12 + $0x96c] ss:$28 sps:$4 sm:$0xff]  }
 0x347   : > { %v2838_v12 = vpop.f32.mrf.mxu1  ;;  %v8118_v7 = vld [vmem:[#allocation12 + $0xa84] ss:$28 sps:$4 sm:$0xff]  }
 0x348   : > { %v2839_v13 = vadd.f32 %v2838_v12, %v1405_v57  ;;  %v2881_v14 = vpop.f32.mrf.mxu0  ;;  %6056 = vmatpush1.bf16.msra.mxu1 %v8029_v6  ;;  %v2880_v16 = vadd.f32 %v2879_v11, %v2837_v10  ;;  %v3076_v34 = vmul.f32 0.2, %v2878_v19  ;;  %vm3060_vm2 = vcmp.gt.f32.partialorder %v2878_v19, 0.0  ;;  %v8104_v57 = vld [vmem:[#allocation12 + $0xaf0] ss:$28 sps:$4 sm:$0xff]  }
 0x349   : > { %v2840_v17 = vpop.f32.mrf.mxu1  ;;  %6057 = vmatprep.subr.bf16.mxu1 %v8034_v8  ;;  %v8110_v6 = vld [vmem:[#allocation12 + $0xab8] ss:$28 sps:$4 sm:$0xff]   ;;  %v8059_v8 = vld [vmem:[#allocation12 + $0x9a0] ss:$28 sps:$4 sm:$0xff]   ;;  %v8124_v11 = vld [vmem:[#allocation12 + $0xdcc] ss:$28 sps:$4 sm:$0xff]  }
 0x34a   : > { %v2882_v20 = vadd.f32 %v2881_v14, %v2839_v13  ;;  %v2841_v21 = vadd.f32 %v2840_v17, %v1409_v3  ;;  %v2883_v23 = vpop.f32.mrf.mxu0  ;;  %v3077_v26 = vmul.f32 0.2, %v2880_v16  ;;  %vm3061_vm1 = vcmp.gt.f32.partialorder %v2880_v16, 0.0  ;;  %v8112_v3 = vld [vmem:[#allocation12 + $0xabc] ss:$28 sps:$4 sm:$0xff]  }
 0x34b   : > { %v3092_v45 = vsel %vm3060_vm2, %v2878_v19, %v3076_v34  ;;  %v8116_v10 = vld [vmem:[#allocation12 + $0xa80] ss:$28 sps:$4 sm:$0xff]   ;;  %v8062_v12 = vld [vmem:[#allocation12 + $0x968] ss:$28 sps:$4 sm:$0xff]   ;;  %v8067_v13 = vld [vmem:[#allocation12 + $0x934] ss:$28 sps:$4 sm:$0xff]  }
 0x34c   : > { %v3084_v22 = vmul.f32 0.2, %v2882_v20  ;;  %6058 = vmatpush1.bf16.msra.mxu1 %v8032_v15  ;;  %vm3068_vm0 = vcmp.gt.f32.partialorder %v2882_v20, 0.0  ;;  %v2884_v27 = vadd.f32 %v2883_v23, %v2841_v21  ;;  %v3093_v39 = vsel %vm3061_vm1, %v2880_v16, %v3077_v26  ;;  %v8122_v14 = vld [vmem:[#allocation12 + $0xdc8] ss:$28 sps:$4 sm:$0xff]  }
 0x34d   : > { %6059 = vmatprep.subr.bf16.mxu1 %v8037_v18  ;;  %v8130_v15 = vld [vmem:[#allocation12 + $0xd94] ss:$28 sps:$4 sm:$0xff]   ;;  %v8070_v17 = vld [vmem:[#allocation12 + $0x8fc] ss:$28 sps:$4 sm:$0xff]   ;;  %v8073_v21 = vld [vmem:[#allocation12 + $0x8c4] ss:$28 sps:$4 sm:$0xff]  }
 0x34e   : > { %vm3069_vm3 = vcmp.gt.f32.partialorder %v2884_v27, 0.0  ;;  %v3085_v35 = vmul.f32 0.2, %v2884_v27  ;;  %v3100_v36 = vsel %vm3068_vm0, %v2882_v20, %v3084_v22  ;;  %v8065_v16 = vld [vmem:[#allocation12 + $0x930] ss:$28 sps:$4 sm:$0xff]  }
 0x34f   : > { %v9130_v43 = vpack.c.bf16 %v3100_v36, %v3092_v45  ;;  %v8128_v18 = vld [vmem:[#allocation12 + $0xd90] ss:$28 sps:$4 sm:$0xff]   ;;  %v8136_v19 = vld [vmem:[#allocation12 + $0xd5c] ss:$28 sps:$4 sm:$0xff]   ;;  %v8142_v23 = vld [vmem:[#allocation12 + $0xd24] ss:$28 sps:$4 sm:$0xff]  }
 0x350   : > { %6060 = vmatpush1.bf16.msra.mxu1 %v8035_v25  ;;  %v3101_v37 = vsel %vm3069_vm3, %v2884_v27, %v3085_v35  ;;  %v8068_v20 = vld [vmem:[#allocation12 + $0x8f8] ss:$28 sps:$4 sm:$0xff]   ;;  %v8071_v25 = vld [vmem:[#allocation12 + $0x8c0] ss:$28 sps:$4 sm:$0xff]   ;;  %v1412_v27 = vsub.s32 4, %v9033_v29 }
 0x351   : > { %6061 = vmatprep.subr.bf16.mxu1 %v8040_v28  ;;  %v9128_v44 = vpack.c.bf16 %v3101_v37, %v3093_v39  ;;  %v8134_v22 = vld [vmem:[#allocation12 + $0xd58] ss:$28 sps:$4 sm:$0xff]   ;;  %v1416_v28 = vsub.s32 5, %v9033_v29  ;;  %v8140_v34 = vld [vmem:[#allocation12 + $0xd20] ss:$28 sps:$4 sm:$0xff]  }
 0x352   : > { %v8079_v26 = vld [vmem:[#allocation12 + $0x194] ss:$28 sps:$4 sm:$0xff]   ;;  %v8148_v35 = vld [vmem:[#allocation12 + $0xcec] ss:$28 sps:$4 sm:$0xff]   ;;  %v1413_v36 = vrot.slane %v9098_v24, %v1412_v27 }
 0x353   : > { %6042 = vmatprep.mubr.bf16.mxu0 %v9128_v44  ;;  %v8146_v39 = vld [vmem:[#allocation12 + $0xce8] ss:$28 sps:$4 sm:$0xff]  }
 0x354   : > { %6062 = vmatpush1.bf16.msra.mxu1 %v8038_v38  ;;  %6043 = vmatmul.mubr.bf16.vlgmr.msra.gmra.mxu0 %v9130_v43  ;;  %v1417_v38 = vrot.slane %v9098_v24, %v1416_v28 }
 0x355   : > { %6063 = vmatprep.subr.bf16.mxu1 %v8043_v40  ;;  %6097 = vmatpush1.bf16.msra.mxu0 %v8074_v46  ;;  %v8154_v40 = vld [vmem:[#allocation12 + $0xcb4] ss:$28 sps:$4 sm:$0xff]  }
 0x356   : > { %6098 = vmatprep.subr.bf16.mxu0 %v8082_v47 }
 0x358   : > { %6064 = vmatpush1.bf16.msra.mxu1 %v8041_v48 }
 0x359   : > { %6065 = vmatprep.subr.bf16.mxu1 %v8046_v49  ;;  %6099 = vmatpush1.bf16.msra.mxu0 %v8080_v50  ;;  %v8152_v50 = vld [vmem:[#allocation12 + $0xcb0] ss:$28 sps:$4 sm:$0xff]  }
 0x35a   : > { %6100 = vmatprep.subr.bf16.mxu0 %v8088_v54 }
 0x35c   : > { %6066 = vmatpush1.bf16.msra.mxu1 %v8044_v58  ;;  %v8160_v58 = vld [vmem:[#allocation12 + $0xc7c] ss:$28 sps:$4 sm:$0xff]  }
 0x35d   : > { %6067 = vmatprep.subr.bf16.mxu1 %v8049_v41  ;;  %6101 = vmatpush1.bf16.msra.mxu0 %v8086_v59 }
 0x35e   : > { %6102 = vmatprep.subr.bf16.mxu0 %v8094_v62 }
 0x360   : > { %6068 = vmatpush1.bf16.msra.mxu1 %v8047_v30 }
 0x361   : > { %6069 = vmatprep.subr.bf16.mxu1 %v8052_v63  ;;  %6103 = vmatpush1.bf16.msra.mxu0 %v8092_v0 }
 0x362   : > { %6104 = vmatprep.subr.bf16.mxu0 %v8100_v42  ;;  %v8158_v42 = vld [vmem:[#allocation12 + $0xc78] ss:$28 sps:$4 sm:$0xff]  }
 0x364   : > { %6070 = vmatpush2.bf16.msra.mxu1 %v8050_v1 }
 0x365   : > { %6071 = vmatprep.subr.bf16.mxu1 %v8055_v2  ;;  %6105 = vmatpush1.bf16.msra.mxu0 %v8098_v33  ;;  %v8166_v2 = vld [vmem:[#allocation12 + $0xc44] ss:$28 sps:$4 sm:$0xff]  }
 0x366   : > { %6106 = vmatprep.subr.bf16.mxu0 %v8106_v51 }
 0x368   : > { %6072 = vmatpush2.bf16.msra.mxu1 %v8053_v52 }
 0x369   : > { %6073 = vmatprep.subr.bf16.mxu1 %v8058_v55  ;;  %6107 = vmatpush1.bf16.msra.mxu0 %v8104_v57 }
 0x36a   : > { %6108 = vmatprep.subr.bf16.mxu0 %v8112_v3  ;;  %v8164_v3 = vld [vmem:[#allocation12 + $0xc40] ss:$28 sps:$4 sm:$0xff]  }
 0x36c   : > { %6074 = vmatpush2.bf16.msra.mxu1 %v8056_v4 }
 0x36d   : > { %6075 = vmatprep.subr.bf16.mxu1 %v8061_v5  ;;  %6109 = vmatpush1.bf16.msra.mxu0 %v8110_v6  ;;  %v8172_v5 = vld [vmem:[#allocation12 + $0x514] ss:$28 sps:$4 sm:$0xff]  }
 0x36e   : > { %6110 = vmatprep.subr.bf16.mxu0 %v8118_v7 }
 0x370   : > { %6076 = vmatpush2.bf16.msra.mxu1 %v8059_v8 }
 0x371   : > { %6077 = vmatprep.subr.bf16.mxu1 %v8064_v9  ;;  %6111 = vmatpush1.bf16.msra.mxu0 %v8116_v10 }
 0x372   : > { %6112 = vmatprep.subr.bf16.mxu0 %v8124_v11  ;;  %v8077_v11 = vld [vmem:[#allocation12 + $0x190] ss:$28 sps:$4 sm:$0xff]  }
 0x374   : > { %6078 = vmatpush2.bf16.msra.mxu1 %v8062_v12 }
 0x375   : > { %6079 = vmatprep.subr.bf16.mxu1 %v8067_v13  ;;  %6113 = vmatpush2.bf16.msra.mxu0 %v8122_v14  ;;  %v8085_v13 = vld [vmem:[#allocation12 + $0x15c] ss:$28 sps:$4 sm:$0xff]  }
 0x376   : > { %6114 = vmatprep.subr.bf16.mxu0 %v8130_v15  ;;  %v8083_v14 = vld [vmem:[#allocation12 + $0x158] ss:$28 sps:$4 sm:$0xff]   ;;  %v8091_v15 = vld [vmem:[#allocation12 + $0x124] ss:$28 sps:$4 sm:$0xff]  }
 0x378   : > { %6080 = vmatpush2.bf16.msra.mxu1 %v8065_v16  ;;  %v8089_v16 = vld [vmem:[#allocation12 + $0x120] ss:$28 sps:$4 sm:$0xff]  }
 0x379   : > { %6081 = vmatprep.subr.bf16.mxu1 %v8070_v17  ;;  %6115 = vmatpush2.bf16.msra.mxu0 %v8128_v18  ;;  %v8097_v17 = vld [vmem:[#allocation12 + $0xec] ss:$28 sps:$4 sm:$0xff]  }
 0x37a   : > { %6116 = vmatprep.subr.bf16.mxu0 %v8136_v19  ;;  %v8095_v18 = vld [vmem:[#allocation12 + $0xe8] ss:$28 sps:$4 sm:$0xff]   ;;  %v8103_v19 = vld [vmem:[#allocation12 + $0xb4] ss:$28 sps:$4 sm:$0xff]  }
 0x37c   : > { %6082 = vmatpush2.bf16.msra.mxu1 %v8068_v20  ;;  %v8101_v20 = vld [vmem:[#allocation12 + $0xb0] ss:$28 sps:$4 sm:$0xff]  }
 0x37d   : > { %6083 = vmatprep.subr.bf16.mxu1 %v8073_v21  ;;  %6117 = vmatpush2.bf16.msra.mxu0 %v8134_v22  ;;  %v8109_v21 = vld [vmem:[#allocation12 + $0x7c] ss:$28 sps:$4 sm:$0xff]  }
 0x37e   : > { %6118 = vmatprep.subr.bf16.mxu0 %v8142_v23  ;;  %v8107_v22 = vld [vmem:[#allocation12 + $0x78] ss:$28 sps:$4 sm:$0xff]   ;;  %v8115_v23 = vld [vmem:[#allocation12 + $0x44] ss:$28 sps:$4 sm:$0xff]  }
 0x380   : > { %6084 = vmatpush2.bf16.msra.mxu1 %v8071_v25  ;;  %v8113_v25 = vld [vmem:[#allocation12 + $0x40] ss:$28 sps:$4 sm:$0xff]  }
 0x381   : > { %6139 = vmatprep.subr.bf16.mxu1 %v8079_v26  ;;  %6119 = vmatpush2.bf16.msra.mxu0 %v8140_v34  ;;  %v8121_v26 = vld [vmem:[#allocation12 + $0xc] ss:$28 sps:$4 sm:$0xff]  }
 0x382   : > { %6120 = vmatprep.subr.bf16.mxu0 %v8148_v35  ;;  %v8119_v34 = vld [vmem:[#allocation12 + $0x8] ss:$28 sps:$4 sm:$0xff]   ;;  %v8127_v35 = vld [vmem:[#allocation12 + $0x354] ss:$28 sps:$4 sm:$0xff]  }
 0x383   : > { %v2920_v37 = vpop.f32.mrf.mxu1 }
 0x384   : > { %v2963_v45 = vpop.f32.mrf.mxu0  ;;  %v2921_v47 = vadd.f32 %v2920_v37, %v1413_v36  ;;  %v8139_v37 = vld [vmem:[#allocation12 + $0x2e4] ss:$28 sps:$4 sm:$0xff]  }
 0x385   : > { %v2922_v46 = vpop.f32.mrf.mxu1  ;;  %6121 = vmatpush2.bf16.msra.mxu0 %v8146_v39  ;;  %v8131_v39 = vld [vmem:[#allocation12 + $0x318] ss:$28 sps:$4 sm:$0xff]  }
 0x386   : > { %v2923_v48 = vadd.f32 %v2922_v46, %v1417_v38  ;;  %v2965_v49 = vpop.f32.mrf.mxu0  ;;  %6122 = vmatprep.subr.bf16.mxu0 %v8154_v40  ;;  %v2964_v63 = vadd.f32 %v2963_v45, %v2921_v47  ;;  %v8137_v40 = vld [vmem:[#allocation12 + $0x2e0] ss:$28 sps:$4 sm:$0xff]   ;;  %v8145_v45 = vld [vmem:[#allocation12 + $0x2ac] ss:$28 sps:$4 sm:$0xff]   ;;  %v1420_v47 = vsub.s32 6, %v9033_v29 }
 0x387   : > { %v2924_v54 = vpop.f32.mrf.mxu1  ;;  %v8143_v46 = vld [vmem:[#allocation12 + $0x2a8] ss:$28 sps:$4 sm:$0xff]  }
 0x388   : > { %v2925_v41 = vadd.f32 %v2924_v54, %v1413_v36  ;;  %v2967_v59 = vpop.f32.mrf.mxu0  ;;  %v2966_v62 = vadd.f32 %v2965_v49, %v2923_v48  ;;  %v3078_v57 = vmul.f32 0.2, %v2964_v63  ;;  %vm3062_vm6 = vcmp.gt.f32.partialorder %v2964_v63, 0.0  ;;  %v8125_v36 = vld [vmem:[#allocation12 + $0x350] ss:$28 sps:$4 sm:$0xff]  }
 0x389   : > { %v2926_v30 = vpop.f32.mrf.mxu1  ;;  %6123 = vmatpush2.bf16.msra.mxu0 %v8152_v50  ;;  %v1424_v48 = vsub.s32 7, %v9033_v29  ;;  %v8151_v49 = vld [vmem:[#allocation12 + $0x274] ss:$28 sps:$4 sm:$0xff]   ;;  %v1421_v50 = vrot.slane %v9098_v24, %v1420_v47 }
 0x38a   : > { %v2968_v0 = vadd.f32 %v2967_v59, %v2925_v41  ;;  %v2927_v1 = vadd.f32 %v2926_v30, %v1417_v38  ;;  %6124 = vmatprep.subr.bf16.mxu0 %v8160_v58  ;;  %v2969_v51 = vpop.f32.mrf.mxu0  ;;  %v3079_v52 = vmul.f32 0.2, %v2966_v62  ;;  %vm3063_vm5 = vcmp.gt.f32.partialorder %v2966_v62, 0.0  ;;  %v8133_v38 = vld [vmem:[#allocation12 + $0x31c] ss:$28 sps:$4 sm:$0xff]  }
 0x38b   : > { %v3094_v9 = vsel %vm3062_vm6, %v2964_v63, %v3078_v57  ;;  %v8149_v54 = vld [vmem:[#allocation12 + $0x270] ss:$28 sps:$4 sm:$0xff]   ;;  %v1425_v58 = vrot.slane %v9098_v24, %v1424_v48  ;;  %v8157_v59 = vld [vmem:[#allocation12 + $0x23c] ss:$28 sps:$4 sm:$0xff]   ;;  %v8188_v48 = vld [vmem:[#allocation12 + $0x468] ss:$28 sps:$4 sm:$0xff]  }
 0x38c   : > { %v3086_v33 = vmul.f32 0.2, %v2968_v0  ;;  %vm3070_vm4 = vcmp.gt.f32.partialorder %v2968_v0, 0.0  ;;  %v2970_v55 = vadd.f32 %v2969_v51, %v2927_v1  ;;  %v3095_v7 = vsel %vm3063_vm5, %v2966_v62, %v3079_v52  ;;  %v8155_v1 = vld [vmem:[#allocation12 + $0x238] ss:$28 sps:$4 sm:$0xff]  }
 0x38d   : > { %6125 = vmatpush2.bf16.msra.mxu0 %v8158_v42  ;;  %v8161_v24 = vld [vmem:[#allocation12 + $0x200] ss:$28 sps:$4 sm:$0xff]  }
 0x38e   : > { %vm3071_vm7 = vcmp.gt.f32.partialorder %v2970_v55, 0.0  ;;  %v3087_v4 = vmul.f32 0.2, %v2970_v55  ;;  %6126 = vmatprep.subr.bf16.mxu0 %v8166_v2  ;;  %v3102_v6 = vsel %vm3070_vm4, %v2968_v0, %v3086_v33  ;;  %v8163_v33 = vld [vmem:[#allocation12 + $0x204] ss:$28 sps:$4 sm:$0xff]  }
 0x38f   : > { %v9144_v12 = vpack.c.bf16 %v3102_v6, %v3094_v9  ;;  %v8169_v6 = vld [vmem:[#allocation12 + $0x1cc] ss:$28 sps:$4 sm:$0xff]  }
 0x390   : > { %v3103_v8 = vsel %vm3071_vm7, %v2970_v55, %v3087_v4 }
 0x391   : > { %v9142_v10 = vpack.c.bf16 %v3103_v8, %v3095_v7  ;;  %6127 = vmatpush2.bf16.msra.mxu0 %v8164_v3 }
 0x392   : > { %6182 = vmatprep.subr.bf16.mxu0 %v8172_v5 }
 0x393   : > { %6085 = vmatprep.mubr.bf16.mxu1 %v9142_v10 }
 0x394   : > { %6086 = vmatmul.mubr.bf16.vlgmr.msra.gmra.mxu1 %v9144_v12 }
 0x395   : > { %6140 = vmatpush1.bf16.msra.mxu1 %v8077_v11  ;;  %6171 = vmatprep.mubr.bf16.mxu1 %v9112_v56 }
 0x396   : > { %6141 = vmatprep.subr.bf16.mxu1 %v8085_v13 }
 0x399   : > { %6142 = vmatpush1.bf16.msra.mxu1 %v8083_v14  ;;  %v8167_v14 = vld [vmem:[#allocation12 + $0x1c8] ss:$28 sps:$4 sm:$0xff]  }
 0x39a   : > { %6143 = vmatprep.subr.bf16.mxu1 %v8091_v15 }
 0x39d   : > { %6144 = vmatpush1.bf16.msra.mxu1 %v8089_v16  ;;  %v8175_v16 = vld [vmem:[#allocation12 + $0x894] ss:$28 sps:$4 sm:$0xff]  }
 0x39e   : > { %6145 = vmatprep.subr.bf16.mxu1 %v8097_v17 }
 0x3a1   : > { %6146 = vmatpush1.bf16.msra.mxu1 %v8095_v18 }
 0x3a2   : > { %6147 = vmatprep.subr.bf16.mxu1 %v8103_v19 }
 0x3a5   : > { %6148 = vmatpush1.bf16.msra.mxu1 %v8101_v20 }
 0x3a6   : > { %6149 = vmatprep.subr.bf16.mxu1 %v8109_v21 }
 0x3a9   : > { %6150 = vmatpush1.bf16.msra.mxu1 %v8107_v22  ;;  %v8170_v22 = vld [vmem:[#allocation12 + $0x510] ss:$28 sps:$4 sm:$0xff]  }
 0x3aa   : > { %6151 = vmatprep.subr.bf16.mxu1 %v8115_v23  ;;  %v8173_v23 = vld [vmem:[#allocation12 + $0x890] ss:$28 sps:$4 sm:$0xff]  }
 0x3ad   : > { %6152 = vmatpush1.bf16.msra.mxu1 %v8113_v25 }
 0x3ae   : > { %6153 = vmatprep.subr.bf16.mxu1 %v8121_v26  ;;  %v8178_v26 = vld [vmem:[#allocation12 + $0x4dc] ss:$28 sps:$4 sm:$0xff]  }
 0x3b1   : > { %6154 = vmatpush1.bf16.msra.mxu1 %v8119_v34  ;;  %v8181_v34 = vld [vmem:[#allocation12 + $0x85c] ss:$28 sps:$4 sm:$0xff]  }
 0x3b2   : > { %6155 = vmatprep.subr.bf16.mxu1 %v8127_v35  ;;  %v8176_v35 = vld [vmem:[#allocation12 + $0x4d8] ss:$28 sps:$4 sm:$0xff]  }
 0x3b5   : > { %6156 = vmatpush2.bf16.msra.mxu1 %v8125_v36  ;;  %v8179_v36 = vld [vmem:[#allocation12 + $0x858] ss:$28 sps:$4 sm:$0xff]  }
 0x3b6   : > { %6157 = vmatprep.subr.bf16.mxu1 %v8133_v38  ;;  %v8184_v38 = vld [vmem:[#allocation12 + $0x4a4] ss:$28 sps:$4 sm:$0xff]  }
 0x3b9   : > { %6158 = vmatpush2.bf16.msra.mxu1 %v8131_v39  ;;  %v8187_v39 = vld [vmem:[#allocation12 + $0x824] ss:$28 sps:$4 sm:$0xff]  }
 0x3ba   : > { %6159 = vmatprep.subr.bf16.mxu1 %v8139_v37  ;;  %v8182_v37 = vld [vmem:[#allocation12 + $0x4a0] ss:$28 sps:$4 sm:$0xff]  }
 0x3bd   : > { %6160 = vmatpush2.bf16.msra.mxu1 %v8137_v40  ;;  %v8185_v40 = vld [vmem:[#allocation12 + $0x820] ss:$28 sps:$4 sm:$0xff]  }
 0x3be   : > { %6161 = vmatprep.subr.bf16.mxu1 %v8145_v45  ;;  %v8190_v45 = vld [vmem:[#allocation12 + $0x46c] ss:$28 sps:$4 sm:$0xff]  }
 0x3c1   : > { %6162 = vmatpush2.bf16.msra.mxu1 %v8143_v46  ;;  %v8193_v46 = vld [vmem:[#allocation12 + $0x7ec] ss:$28 sps:$4 sm:$0xff]  }
 0x3c2   : > { %6163 = vmatprep.subr.bf16.mxu1 %v8151_v49  ;;  %v8191_v49 = vld [vmem:[#allocation12 + $0x7e8] ss:$28 sps:$4 sm:$0xff]  }
 0x3c3   : > { %v3006_v41 = vpop.f32.mrf.mxu1 }
 0x3c4   : > { %v3049_v62 = vpop.f32.mrf.mxu0  ;;  %v3007_v63 = vadd.f32 %v3006_v41, %v1421_v50  ;;  %v8197_v41 = vld [vmem:[#allocation12 + $0x7b0] ss:$28 sps:$4 sm:$0xff]  }
 0x3c5   : > { %v3008_v30 = vpop.f32.mrf.mxu1  ;;  %6164 = vmatpush2.bf16.msra.mxu1 %v8149_v54  ;;  %v8199_v54 = vld [vmem:[#allocation12 + $0x7b4] ss:$28 sps:$4 sm:$0xff]  }
 0x3c6   : > { %v3009_v0 = vadd.f32 %v3008_v30, %v1425_v58  ;;  %v3051_v42 = vpop.f32.mrf.mxu0  ;;  %6165 = vmatprep.subr.bf16.mxu1 %v8157_v59  ;;  %v3050_v3 = vadd.f32 %v3049_v62, %v3007_v63  ;;  %v8202_v59 = vld [vmem:[#allocation12 + $0x3fc] ss:$28 sps:$4 sm:$0xff]  }
 0x3c7   : > { %v3010_v2 = vpop.f32.mrf.mxu1  ;;  %v8205_v62 = vld [vmem:[#allocation12 + $0x77c] ss:$28 sps:$4 sm:$0xff]  }
 0x3c8   : > { %v3011_v51 = vadd.f32 %v3010_v2, %v1421_v50  ;;  %v3053_v52 = vpop.f32.mrf.mxu0  ;;  %v3052_v55 = vadd.f32 %v3051_v42, %v3009_v0  ;;  %v3080_v13 = vmul.f32 0.2, %v3050_v3  ;;  %vm3064_vm10 = vcmp.gt.f32.partialorder %v3050_v3, 0.0  ;;  %v8196_v50 = vld [vmem:[#allocation12 + $0x434] ss:$28 sps:$4 sm:$0xff]  }
 0x3c9   : > { %v3012_v57 = vpop.f32.mrf.mxu1  ;;  %6166 = vmatpush2.bf16.msra.mxu1 %v8155_v1  ;;  %v8200_v30 = vld [vmem:[#allocation12 + $0x3f8] ss:$28 sps:$4 sm:$0xff]   ;;  %v8208_v0 = vld [vmem:[#allocation12 + $0x3c4] ss:$28 sps:$4 sm:$0xff]  }
 0x3ca   : > { %v3054_v4 = vadd.f32 %v3053_v52, %v3011_v51  ;;  %v3013_v5 = vadd.f32 %v3012_v57, %v1425_v58  ;;  %6167 = vmatprep.subr.bf16.mxu1 %v8163_v33  ;;  %v3055_v8 = vpop.f32.mrf.mxu0  ;;  %v3081_v9 = vmul.f32 0.2, %v3052_v55  ;;  %vm3065_vm9 = vcmp.gt.f32.partialorder %v3052_v55, 0.0  ;;  %v8194_v58 = vld [vmem:[#allocation12 + $0x430] ss:$28 sps:$4 sm:$0xff]  }
 0x3cb   : > { %v3096_v20 = vsel %vm3064_vm10, %v3050_v3, %v3080_v13  ;;  %v8203_v63 = vld [vmem:[#allocation12 + $0x778] ss:$28 sps:$4 sm:$0xff]   ;;  %v8211_v42 = vld [vmem:[#allocation12 + $0x744] ss:$28 sps:$4 sm:$0xff]   ;;  %v8214_v33 = vld [vmem:[#allocation12 + $0x38c] ss:$28 sps:$4 sm:$0xff]  }
 0x3cc   : > { %v3088_v7 = vmul.f32 0.2, %v3054_v4  ;;  %vm3072_vm8 = vcmp.gt.f32.partialorder %v3054_v4, 0.0  ;;  %v3056_v11 = vadd.f32 %v3055_v8, %v3013_v5  ;;  %v3097_v18 = vsel %vm3065_vm9, %v3052_v55, %v3081_v9  ;;  %v8206_v1 = vld [vmem:[#allocation12 + $0x3c0] ss:$28 sps:$4 sm:$0xff]  }
 0x3cd   : > { %6168 = vmatpush2.bf16.msra.mxu1 %v8161_v24  ;;  %v8209_v2 = vld [vmem:[#allocation12 + $0x740] ss:$28 sps:$4 sm:$0xff]   ;;  %v8217_v51 = vld [vmem:[#allocation12 + $0x70c] ss:$28 sps:$4 sm:$0xff]   ;;  %v8220_v57 = vld [vmem:[#allocation12 + $0x6d4] ss:$28 sps:$4 sm:$0xff]  }
 0x3ce   : > { %vm3073_vm11 = vcmp.gt.f32.partialorder %v3056_v11, 0.0  ;;  %v3089_v15 = vmul.f32 0.2, %v3056_v11  ;;  %6169 = vmatprep.subr.bf16.mxu1 %v8169_v6  ;;  %v3104_v17 = vsel %vm3072_vm8, %v3054_v4, %v3088_v7  ;;  %v8212_v52 = vld [vmem:[#allocation12 + $0x388] ss:$28 sps:$4 sm:$0xff]  }
 0x3cf   : > { %v9157_v25 = vpack.c.bf16 %v3104_v17, %v3096_v20  ;;  %v8215_v55 = vld [vmem:[#allocation12 + $0x708] ss:$28 sps:$4 sm:$0xff]   ;;  %v8223_v3 = vld [vmem:[#allocation12 + $0xa54] ss:$28 sps:$4 sm:$0xff]   ;;  %v8226_v5 = vld [vmem:[#allocation12 + $0x69c] ss:$28 sps:$4 sm:$0xff]  }
 0x3d0   : > { %v3105_v19 = vsel %vm3073_vm11, %v3056_v11, %v3089_v15  ;;  %v8218_v4 = vld [vmem:[#allocation12 + $0x6d0] ss:$28 sps:$4 sm:$0xff]   ;;  %v8229_v6 = vld [vmem:[#allocation12 + $0xa1c] ss:$28 sps:$4 sm:$0xff]   ;;  %v8232_v9 = vld [vmem:[#allocation12 + $0x664] ss:$28 sps:$4 sm:$0xff]  }
 0x3d1   : > { %v9155_v21 = vpack.c.bf16 %v3105_v19, %v3097_v18  ;;  %6170 = vmatpush2.bf16.msra.mxu1 %v8167_v14  ;;  %v8221_v24 = vld [vmem:[#allocation12 + $0xa50] ss:$28 sps:$4 sm:$0xff]   ;;  %v8224_v7 = vld [vmem:[#allocation12 + $0x698] ss:$28 sps:$4 sm:$0xff]   ;;  %v8235_v11 = vld [vmem:[#allocation12 + $0x9e4] ss:$28 sps:$4 sm:$0xff]  }
 0x3d2   : > { %6225 = vmatprep.subr.bf16.mxu1 %v8175_v16  ;;  %v8227_v8 = vld [vmem:[#allocation12 + $0xa18] ss:$28 sps:$4 sm:$0xff]   ;;  %v8230_v13 = vld [vmem:[#allocation12 + $0x660] ss:$28 sps:$4 sm:$0xff]   ;;  %v8238_v15 = vld [vmem:[#allocation12 + $0x62c] ss:$28 sps:$4 sm:$0xff]  }
 0x3d3   : > { %6128 = vmatprep.mubr.bf16.mxu0 %v9155_v21  ;;  %v8233_v14 = vld [vmem:[#allocation12 + $0x9e0] ss:$28 sps:$4 sm:$0xff]   ;;  %v8241_v16 = vld [vmem:[#allocation12 + $0x9ac] ss:$28 sps:$4 sm:$0xff]   ;;  %v8244_v19 = vld [vmem:[#allocation12 + $0x5f4] ss:$28 sps:$4 sm:$0xff]  }
 0x3d4   : > { %6172 = vmatmul.mubr.bf16.vlgmr.msra.gmra.mxu1 %v9121_v53  ;;  %6129 = vmatmul.mubr.bf16.vlgmr.msra.gmra.mxu0 %v9157_v25  ;;  %v8236_v17 = vld [vmem:[#allocation12 + $0x628] ss:$28 sps:$4 sm:$0xff]   ;;  %v8247_v20 = vld [vmem:[#allocation12 + $0x974] ss:$28 sps:$4 sm:$0xff]  }
 0x3d5   : > { %6183 = vmatpush1.bf16.msra.mxu0 %v8170_v22  ;;  %6226 = vmatpush1.bf16.msra.mxu1 %v8173_v23  ;;  %v8239_v18 = vld [vmem:[#allocation12 + $0x9a8] ss:$28 sps:$4 sm:$0xff]   ;;  %v8242_v22 = vld [vmem:[#allocation12 + $0x5f0] ss:$28 sps:$4 sm:$0xff]  }
 0x3d6   : > { %6257 = vmatprep.mubr.bf16.mxu1 %v9142_v10  ;;  %6214 = vmatprep.mubr.bf16.mxu0 %v9128_v44  ;;  %v8245_v23 = vld [vmem:[#allocation12 + $0x970] ss:$28 sps:$4 sm:$0xff]  }
 0x3d7   : > { %6184 = vmatprep.subr.bf16.mxu0 %v8178_v26  ;;  %6227 = vmatprep.subr.bf16.mxu1 %v8181_v34  ;;  %v8250_v26 = vld [vmem:[#allocation12 + $0x5bc] ss:$28 sps:$4 sm:$0xff]  }
 0x3d8   : > { %v8253_v34 = vld [vmem:[#allocation12 + $0x93c] ss:$28 sps:$4 sm:$0xff]  }
 0x3d9   : > { %6185 = vmatpush1.bf16.msra.mxu0 %v8176_v35  ;;  %6228 = vmatpush1.bf16.msra.mxu1 %v8179_v36  ;;  %v8248_v35 = vld [vmem:[#allocation12 + $0x5b8] ss:$28 sps:$4 sm:$0xff]  }
 0x3da   : > { %6186 = vmatprep.subr.bf16.mxu0 %v8184_v38  ;;  %6229 = vmatprep.subr.bf16.mxu1 %v8187_v39  ;;  %v8251_v36 = vld [vmem:[#allocation12 + $0x938] ss:$28 sps:$4 sm:$0xff]   ;;  %v8256_v38 = vld [vmem:[#allocation12 + $0x584] ss:$28 sps:$4 sm:$0xff]  }
 0x3db   : > { %v8259_v39 = vld [vmem:[#allocation12 + $0x904] ss:$28 sps:$4 sm:$0xff]  }
 0x3dd   : > { %6187 = vmatpush1.bf16.msra.mxu0 %v8182_v37  ;;  %6230 = vmatpush1.bf16.msra.mxu1 %v8185_v40  ;;  %v8254_v37 = vld [vmem:[#allocation12 + $0x580] ss:$28 sps:$4 sm:$0xff]  }
 0x3de   : > { %6188 = vmatprep.subr.bf16.mxu0 %v8190_v45  ;;  %6231 = vmatprep.subr.bf16.mxu1 %v8193_v46  ;;  %v8257_v40 = vld [vmem:[#allocation12 + $0x900] ss:$28 sps:$4 sm:$0xff]   ;;  %v8262_v45 = vld [vmem:[#allocation12 + $0x54c] ss:$28 sps:$4 sm:$0xff]  }
 0x3df   : > { %v8265_v46 = vld [vmem:[#allocation12 + $0x8cc] ss:$28 sps:$4 sm:$0xff]  }
 0x3e1   : > { %6189 = vmatpush1.bf16.msra.mxu0 %v8188_v48  ;;  %6232 = vmatpush1.bf16.msra.mxu1 %v8191_v49  ;;  %v8260_v48 = vld [vmem:[#allocation12 + $0x548] ss:$28 sps:$4 sm:$0xff]  }
 0x3e2   : > { %6190 = vmatprep.subr.bf16.mxu0 %v8196_v50  ;;  %6233 = vmatprep.subr.bf16.mxu1 %v8199_v54  ;;  %v8263_v49 = vld [vmem:[#allocation12 + $0x8c8] ss:$28 sps:$4 sm:$0xff]   ;;  %v8268_v50 = vld [vmem:[#allocation12 + $0xc14] ss:$28 sps:$4 sm:$0xff]   ;;  %v8271_v54 = vld [vmem:[#allocation12 + $0x19c] ss:$28 sps:$4 sm:$0xff]  }
 0x3e5   : > { %6191 = vmatpush1.bf16.msra.mxu0 %v8194_v58  ;;  %6234 = vmatpush1.bf16.msra.mxu1 %v8197_v41  ;;  %v8266_v58 = vld [vmem:[#allocation12 + $0xc10] ss:$28 sps:$4 sm:$0xff]   ;;  %v8269_v41 = vld [vmem:[#allocation12 + $0x198] ss:$28 sps:$4 sm:$0xff]  }
 0x3e6   : > { %6192 = vmatprep.subr.bf16.mxu0 %v8202_v59  ;;  %6235 = vmatprep.subr.bf16.mxu1 %v8205_v62  ;;  %v8274_v59 = vld [vmem:[#allocation12 + $0xbdc] ss:$28 sps:$4 sm:$0xff]   ;;  %v8277_v62 = vld [vmem:[#allocation12 + $0x164] ss:$28 sps:$4 sm:$0xff]  }
 0x3e9   : > { %6193 = vmatpush1.bf16.msra.mxu0 %v8200_v30  ;;  %6236 = vmatpush1.bf16.msra.mxu1 %v8203_v63  ;;  %v8272_v30 = vld [vmem:[#allocation12 + $0xbd8] ss:$28 sps:$4 sm:$0xff]   ;;  %v8275_v63 = vld [vmem:[#allocation12 + $0x160] ss:$28 sps:$4 sm:$0xff]  }
 0x3ea   : > { %6194 = vmatprep.subr.bf16.mxu0 %v8208_v0  ;;  %6237 = vmatprep.subr.bf16.mxu1 %v8211_v42  ;;  %v8280_v0 = vld [vmem:[#allocation12 + $0xba4] ss:$28 sps:$4 sm:$0xff]   ;;  %v8283_v42 = vld [vmem:[#allocation12 + $0x12c] ss:$28 sps:$4 sm:$0xff]  }
 0x3ed   : > { %6195 = vmatpush1.bf16.msra.mxu0 %v8206_v1  ;;  %6238 = vmatpush1.bf16.msra.mxu1 %v8209_v2  ;;  %v8278_v1 = vld [vmem:[#allocation12 + $0xba0] ss:$28 sps:$4 sm:$0xff]   ;;  %v8281_v2 = vld [vmem:[#allocation12 + $0x128] ss:$28 sps:$4 sm:$0xff]  }
 0x3ee   : > { %6196 = vmatprep.subr.bf16.mxu0 %v8214_v33  ;;  %6239 = vmatprep.subr.bf16.mxu1 %v8217_v51  ;;  %v8286_v33 = vld [vmem:[#allocation12 + $0xb6c] ss:$28 sps:$4 sm:$0xff]   ;;  %v8289_v51 = vld [vmem:[#allocation12 + $0xf4] ss:$28 sps:$4 sm:$0xff]  }
 0x3f1   : > { %6197 = vmatpush1.bf16.msra.mxu0 %v8212_v52  ;;  %6240 = vmatpush1.bf16.msra.mxu1 %v8215_v55  ;;  %v8284_v52 = vld [vmem:[#allocation12 + $0xb68] ss:$28 sps:$4 sm:$0xff]   ;;  %v8287_v55 = vld [vmem:[#allocation12 + $0xf0] ss:$28 sps:$4 sm:$0xff]  }
 0x3f2   : > { %6198 = vmatprep.subr.bf16.mxu0 %v8220_v57  ;;  %6241 = vmatprep.subr.bf16.mxu1 %v8223_v3  ;;  %v8292_v57 = vld [vmem:[#allocation12 + $0xb34] ss:$28 sps:$4 sm:$0xff]   ;;  %v8295_v3 = vld [vmem:[#allocation12 + $0xbc] ss:$28 sps:$4 sm:$0xff]  }
 0x3f5   : > { %6199 = vmatpush2.bf16.msra.mxu0 %v8218_v4  ;;  %6242 = vmatpush2.bf16.msra.mxu1 %v8221_v24  ;;  %v8290_v4 = vld [vmem:[#allocation12 + $0xb30] ss:$28 sps:$4 sm:$0xff]   ;;  %v8293_v24 = vld [vmem:[#allocation12 + $0xb8] ss:$28 sps:$4 sm:$0xff]  }
 0x3f6   : > { %6200 = vmatprep.subr.bf16.mxu0 %v8226_v5  ;;  %6243 = vmatprep.subr.bf16.mxu1 %v8229_v6  ;;  %v8298_v5 = vld [vmem:[#allocation12 + $0xafc] ss:$28 sps:$4 sm:$0xff]   ;;  %v8301_v6 = vld [vmem:[#allocation12 + $0x84] ss:$28 sps:$4 sm:$0xff]  }
 0x3f9   : > { %6201 = vmatpush2.bf16.msra.mxu0 %v8224_v7  ;;  %6244 = vmatpush2.bf16.msra.mxu1 %v8227_v8  ;;  %v8296_v7 = vld [vmem:[#allocation12 + $0xaf8] ss:$28 sps:$4 sm:$0xff]   ;;  %v8299_v8 = vld [vmem:[#allocation12 + $0x80] ss:$28 sps:$4 sm:$0xff]  }
 0x3fa   : > { %6202 = vmatprep.subr.bf16.mxu0 %v8232_v9  ;;  %6245 = vmatprep.subr.bf16.mxu1 %v8235_v11  ;;  %v8304_v9 = vld [vmem:[#allocation12 + $0xac4] ss:$28 sps:$4 sm:$0xff]   ;;  %v8307_v11 = vld [vmem:[#allocation12 + $0x4c] ss:$28 sps:$4 sm:$0xff]  }
 0x3fd   : > { %6203 = vmatpush2.bf16.msra.mxu0 %v8230_v13  ;;  %6246 = vmatpush2.bf16.msra.mxu1 %v8233_v14  ;;  %v8302_v13 = vld [vmem:[#allocation12 + $0xac0] ss:$28 sps:$4 sm:$0xff]   ;;  %v8305_v14 = vld [vmem:[#allocation12 + $0x48] ss:$28 sps:$4 sm:$0xff]  }
 0x3fe   : > { %6204 = vmatprep.subr.bf16.mxu0 %v8238_v15  ;;  %6247 = vmatprep.subr.bf16.mxu1 %v8241_v16  ;;  %v8310_v15 = vld [vmem:[#allocation12 + $0xa8c] ss:$28 sps:$4 sm:$0xff]   ;;  %v8313_v16 = vld [vmem:[#allocation12 + $0x14] ss:$28 sps:$4 sm:$0xff]  }
 0x401   : > { %6205 = vmatpush2.bf16.msra.mxu0 %v8236_v17  ;;  %6248 = vmatpush2.bf16.msra.mxu1 %v8239_v18  ;;  %v8308_v17 = vld [vmem:[#allocation12 + $0xa88] ss:$28 sps:$4 sm:$0xff]   ;;  %v8311_v18 = vld [vmem:[#allocation12 + $0x10] ss:$28 sps:$4 sm:$0xff]  }
 0x402   : > { %6206 = vmatprep.subr.bf16.mxu0 %v8244_v19  ;;  %6249 = vmatprep.subr.bf16.mxu1 %v8247_v20  ;;  %v8316_v19 = vld [vmem:[#allocation12 + $0xdd4] ss:$28 sps:$4 sm:$0xff]   ;;  %v8319_v20 = vld [vmem:[#allocation12 + $0x35c] ss:$28 sps:$4 sm:$0xff]  }
 0x405   : > { %6207 = vmatpush2.bf16.msra.mxu0 %v8242_v22  ;;  %6250 = vmatpush2.bf16.msra.mxu1 %v8245_v23  ;;  %v8314_v22 = vld [vmem:[#allocation12 + $0xdd0] ss:$28 sps:$4 sm:$0xff]   ;;  %v8317_v23 = vld [vmem:[#allocation12 + $0x358] ss:$28 sps:$4 sm:$0xff]  }
 0x406   : > { %6208 = vmatprep.subr.bf16.mxu0 %v8250_v26  ;;  %6251 = vmatprep.subr.bf16.mxu1 %v8253_v34  ;;  %v8322_v26 = vld [vmem:[#allocation12 + $0xd9c] ss:$28 sps:$4 sm:$0xff]   ;;  %v8325_v34 = vld [vmem:[#allocation12 + $0x324] ss:$28 sps:$4 sm:$0xff]  }
 0x409   : > { %6209 = vmatpush2.bf16.msra.mxu0 %v8248_v35  ;;  %6252 = vmatpush2.bf16.msra.mxu1 %v8251_v36  ;;  %v8320_v35 = vld [vmem:[#allocation12 + $0xd98] ss:$28 sps:$4 sm:$0xff]   ;;  %v8323_v36 = vld [vmem:[#allocation12 + $0x320] ss:$28 sps:$4 sm:$0xff]  }
 0x40a   : > { %6210 = vmatprep.subr.bf16.mxu0 %v8256_v38  ;;  %6253 = vmatprep.subr.bf16.mxu1 %v8259_v39  ;;  %v8328_v38 = vld [vmem:[#allocation12 + $0xd64] ss:$28 sps:$4 sm:$0xff]   ;;  %v8331_v39 = vld [vmem:[#allocation12 + $0x2ec] ss:$28 sps:$4 sm:$0xff]  }
 0x40d   : > { %6211 = vmatpush2.bf16.msra.mxu0 %v8254_v37  ;;  %6254 = vmatpush2.bf16.msra.mxu1 %v8257_v40  ;;  %v8326_v37 = vld [vmem:[#allocation12 + $0xd60] ss:$28 sps:$4 sm:$0xff]   ;;  %v8329_v40 = vld [vmem:[#allocation12 + $0x2e8] ss:$28 sps:$4 sm:$0xff]  }
 0x40e   : > { %6212 = vmatprep.subr.bf16.mxu0 %v8262_v45  ;;  %6255 = vmatprep.subr.bf16.mxu1 %v8265_v46  ;;  %v8334_v45 = vld [vmem:[#allocation12 + $0xd2c] ss:$28 sps:$4 sm:$0xff]   ;;  %v8337_v46 = vld [vmem:[#allocation12 + $0x2b4] ss:$28 sps:$4 sm:$0xff]  }
 0x411   : > { %6213 = vmatpush2.bf16.msra.mxu0 %v8260_v48  ;;  %6256 = vmatpush2.bf16.msra.mxu1 %v8263_v49  ;;  %v8332_v48 = vld [vmem:[#allocation12 + $0xd28] ss:$28 sps:$4 sm:$0xff]   ;;  %v8335_v49 = vld [vmem:[#allocation12 + $0x2b0] ss:$28 sps:$4 sm:$0xff]  }
 0x412   : > { %6268 = vmatprep.subr.bf16.mxu0 %v8268_v50  ;;  %6311 = vmatprep.subr.bf16.mxu1 %v8271_v54  ;;  %v8340_v50 = vld [vmem:[#allocation12 + $0xcf4] ss:$28 sps:$4 sm:$0xff]   ;;  %v8343_v54 = vld [vmem:[#allocation12 + $0x27c] ss:$28 sps:$4 sm:$0xff]  }
 0x414   : > { %6215 = vmatmul.mubr.bf16.vlgmr.msra.gmra.mxu0 %v9130_v43  ;;  %6258 = vmatmul.mubr.bf16.vlgmr.msra.gmra.mxu1 %v9144_v12 }
 0x415   : > { %6269 = vmatpush1.bf16.msra.mxu0 %v8266_v58  ;;  %6300 = vmatprep.mubr.bf16.mxu0 %v9155_v21  ;;  %v8338_v58 = vld [vmem:[#allocation12 + $0xcf0] ss:$28 sps:$4 sm:$0xff]  }
 0x416   : > { %6312 = vmatpush1.bf16.msra.mxu1 %v8269_v41  ;;  %6343 = vmatprep.mubr.bf16.mxu1 %v9112_v56  ;;  %v8341_v41 = vld [vmem:[#allocation12 + $0x278] ss:$28 sps:$4 sm:$0xff]  }
 0x417   : > { %6270 = vmatprep.subr.bf16.mxu0 %v8274_v59  ;;  %6313 = vmatprep.subr.bf16.mxu1 %v8277_v62  ;;  %v8346_v59 = vld [vmem:[#allocation12 + $0xcbc] ss:$28 sps:$4 sm:$0xff]   ;;  %v8349_v62 = vld [vmem:[#allocation12 + $0x244] ss:$28 sps:$4 sm:$0xff]  }
 0x419   : > { %6271 = vmatpush1.bf16.msra.mxu0 %v8272_v30  ;;  %v8344_v30 = vld [vmem:[#allocation12 + $0xcb8] ss:$28 sps:$4 sm:$0xff]  }
 0x41a   : > { %6314 = vmatpush1.bf16.msra.mxu1 %v8275_v63  ;;  %6272 = vmatprep.subr.bf16.mxu0 %v8280_v0  ;;  %v8347_v63 = vld [vmem:[#allocation12 + $0x240] ss:$28 sps:$4 sm:$0xff]  }
 0x41b   : > { %6315 = vmatprep.subr.bf16.mxu1 %v8283_v42  ;;  %v8352_v0 = vld [vmem:[#allocation12 + $0xc84] ss:$28 sps:$4 sm:$0xff]   ;;  %v8355_v42 = vld [vmem:[#allocation12 + $0x20c] ss:$28 sps:$4 sm:$0xff]  }
 0x41d   : > { %6273 = vmatpush1.bf16.msra.mxu0 %v8278_v1  ;;  %v8350_v1 = vld [vmem:[#allocation12 + $0xc80] ss:$28 sps:$4 sm:$0xff]  }
 0x41e   : > { %6316 = vmatpush1.bf16.msra.mxu1 %v8281_v2  ;;  %6274 = vmatprep.subr.bf16.mxu0 %v8286_v33  ;;  %v8353_v2 = vld [vmem:[#allocation12 + $0x208] ss:$28 sps:$4 sm:$0xff]  }
 0x41f   : > { %6317 = vmatprep.subr.bf16.mxu1 %v8289_v51  ;;  %v8358_v33 = vld [vmem:[#allocation12 + $0xc4c] ss:$28 sps:$4 sm:$0xff]   ;;  %v8361_v51 = vld [vmem:[#allocation12 + $0x1d4] ss:$28 sps:$4 sm:$0xff]  }
 0x421   : > { %6275 = vmatpush1.bf16.msra.mxu0 %v8284_v52  ;;  %v8356_v52 = vld [vmem:[#allocation12 + $0xc48] ss:$28 sps:$4 sm:$0xff]  }
 0x422   : > { %6318 = vmatpush1.bf16.msra.mxu1 %v8287_v55  ;;  %6276 = vmatprep.subr.bf16.mxu0 %v8292_v57  ;;  %v8359_v55 = vld [vmem:[#allocation12 + $0x1d0] ss:$28 sps:$4 sm:$0xff]   ;;  %v8364_v57 = vld [vmem:[#allocation12 + $0x51c] ss:$28 sps:$4 sm:$0xff]  }
 0x423   : > { %6319 = vmatprep.subr.bf16.mxu1 %v8295_v3  ;;  %v8367_v3 = vld [vmem:[#allocation12 + $0x89c] ss:$28 sps:$4 sm:$0xff]  }
 0x425   : > { %6277 = vmatpush1.bf16.msra.mxu0 %v8290_v4  ;;  %v8362_v4 = vld [vmem:[#allocation12 + $0x518] ss:$28 sps:$4 sm:$0xff]  }
 0x426   : > { %6320 = vmatpush1.bf16.msra.mxu1 %v8293_v24  ;;  %6278 = vmatprep.subr.bf16.mxu0 %v8298_v5  ;;  %v8365_v24 = vld [vmem:[#allocation12 + $0x898] ss:$28 sps:$4 sm:$0xff]   ;;  %v8370_v5 = vld [vmem:[#allocation12 + $0x4e4] ss:$28 sps:$4 sm:$0xff]  }
 0x427   : > { %6321 = vmatprep.subr.bf16.mxu1 %v8301_v6  ;;  %v8373_v6 = vld [vmem:[#allocation12 + $0x864] ss:$28 sps:$4 sm:$0xff]  }
 0x429   : > { %6279 = vmatpush1.bf16.msra.mxu0 %v8296_v7  ;;  %v8368_v7 = vld [vmem:[#allocation12 + $0x4e0] ss:$28 sps:$4 sm:$0xff]  }
 0x42a   : > { %6322 = vmatpush1.bf16.msra.mxu1 %v8299_v8  ;;  %6280 = vmatprep.subr.bf16.mxu0 %v8304_v9  ;;  %v8371_v8 = vld [vmem:[#allocation12 + $0x860] ss:$28 sps:$4 sm:$0xff]   ;;  %v8376_v9 = vld [vmem:[#allocation12 + $0x4ac] ss:$28 sps:$4 sm:$0xff]  }
 0x42b   : > { %6323 = vmatprep.subr.bf16.mxu1 %v8307_v11  ;;  %v8379_v11 = vld [vmem:[#allocation12 + $0x82c] ss:$28 sps:$4 sm:$0xff]  }
 0x42d   : > { %6281 = vmatpush1.bf16.msra.mxu0 %v8302_v13  ;;  %v8374_v13 = vld [vmem:[#allocation12 + $0x4a8] ss:$28 sps:$4 sm:$0xff]  }
 0x42e   : > { %6324 = vmatpush1.bf16.msra.mxu1 %v8305_v14  ;;  %6282 = vmatprep.subr.bf16.mxu0 %v8310_v15  ;;  %v8377_v14 = vld [vmem:[#allocation12 + $0x828] ss:$28 sps:$4 sm:$0xff]   ;;  %v8382_v15 = vld [vmem:[#allocation12 + $0x474] ss:$28 sps:$4 sm:$0xff]  }
 0x42f   : > { %6325 = vmatprep.subr.bf16.mxu1 %v8313_v16  ;;  %v8385_v16 = vld [vmem:[#allocation12 + $0x7f4] ss:$28 sps:$4 sm:$0xff]  }
 0x431   : > { %6283 = vmatpush1.bf16.msra.mxu0 %v8308_v17  ;;  %v8380_v17 = vld [vmem:[#allocation12 + $0x470] ss:$28 sps:$4 sm:$0xff]  }
 0x432   : > { %6326 = vmatpush1.bf16.msra.mxu1 %v8311_v18  ;;  %6284 = vmatprep.subr.bf16.mxu0 %v8316_v19  ;;  %v8383_v18 = vld [vmem:[#allocation12 + $0x7f0] ss:$28 sps:$4 sm:$0xff]   ;;  %v8388_v19 = vld [vmem:[#allocation12 + $0x43c] ss:$28 sps:$4 sm:$0xff]  }
 0x433   : > { %6327 = vmatprep.subr.bf16.mxu1 %v8319_v20  ;;  %v8391_v20 = vld [vmem:[#allocation12 + $0x7bc] ss:$28 sps:$4 sm:$0xff]  }
 0x435   : > { %6285 = vmatpush2.bf16.msra.mxu0 %v8314_v22  ;;  %v8386_v22 = vld [vmem:[#allocation12 + $0x438] ss:$28 sps:$4 sm:$0xff]  }
 0x436   : > { %6328 = vmatpush2.bf16.msra.mxu1 %v8317_v23  ;;  %6286 = vmatprep.subr.bf16.mxu0 %v8322_v26  ;;  %v8389_v23 = vld [vmem:[#allocation12 + $0x7b8] ss:$28 sps:$4 sm:$0xff]   ;;  %v8394_v26 = vld [vmem:[#allocation12 + $0x404] ss:$28 sps:$4 sm:$0xff]  }
 0x437   : > { %6329 = vmatprep.subr.bf16.mxu1 %v8325_v34  ;;  %v8397_v34 = vld [vmem:[#allocation12 + $0x784] ss:$28 sps:$4 sm:$0xff]  }
 0x439   : > { %6287 = vmatpush2.bf16.msra.mxu0 %v8320_v35  ;;  %v8392_v35 = vld [vmem:[#allocation12 + $0x400] ss:$28 sps:$4 sm:$0xff]  }
 0x43a   : > { %6330 = vmatpush2.bf16.msra.mxu1 %v8323_v36  ;;  %6288 = vmatprep.subr.bf16.mxu0 %v8328_v38  ;;  %v8395_v36 = vld [vmem:[#allocation12 + $0x780] ss:$28 sps:$4 sm:$0xff]   ;;  %v8400_v38 = vld [vmem:[#allocation12 + $0x3cc] ss:$28 sps:$4 sm:$0xff]  }
 0x43b   : > { %6331 = vmatprep.subr.bf16.mxu1 %v8331_v39  ;;  %v8403_v39 = vld [vmem:[#allocation12 + $0x74c] ss:$28 sps:$4 sm:$0xff]  }
 0x43d   : > { %6289 = vmatpush2.bf16.msra.mxu0 %v8326_v37  ;;  %v8398_v37 = vld [vmem:[#allocation12 + $0x3c8] ss:$28 sps:$4 sm:$0xff]  }
 0x43e   : > { %6332 = vmatpush2.bf16.msra.mxu1 %v8329_v40  ;;  %6290 = vmatprep.subr.bf16.mxu0 %v8334_v45  ;;  %v8401_v40 = vld [vmem:[#allocation12 + $0x748] ss:$28 sps:$4 sm:$0xff]   ;;  %v8406_v45 = vld [vmem:[#allocation12 + $0x394] ss:$28 sps:$4 sm:$0xff]  }
 0x43f   : > { %6333 = vmatprep.subr.bf16.mxu1 %v8337_v46  ;;  %v8409_v46 = vld [vmem:[#allocation12 + $0x714] ss:$28 sps:$4 sm:$0xff]  }
 0x441   : > { %6291 = vmatpush2.bf16.msra.mxu0 %v8332_v48  ;;  %v8404_v48 = vld [vmem:[#allocation12 + $0x390] ss:$28 sps:$4 sm:$0xff]  }
 0x442   : > { %6334 = vmatpush2.bf16.msra.mxu1 %v8335_v49  ;;  %6292 = vmatprep.subr.bf16.mxu0 %v8340_v50  ;;  %v8407_v49 = vld [vmem:[#allocation12 + $0x710] ss:$28 sps:$4 sm:$0xff]   ;;  %v8412_v50 = vld [vmem:[#allocation12 + $0x6dc] ss:$28 sps:$4 sm:$0xff]  }
 0x443   : > { %6335 = vmatprep.subr.bf16.mxu1 %v8343_v54  ;;  %v8415_v54 = vld [vmem:[#allocation12 + $0xa5c] ss:$28 sps:$4 sm:$0xff]  }
 0x445   : > { %6293 = vmatpush2.bf16.msra.mxu0 %v8338_v58  ;;  %v8410_v58 = vld [vmem:[#allocation12 + $0x6d8] ss:$28 sps:$4 sm:$0xff]  }
 0x446   : > { %6336 = vmatpush2.bf16.msra.mxu1 %v8341_v41  ;;  %6294 = vmatprep.subr.bf16.mxu0 %v8346_v59  ;;  %v8413_v41 = vld [vmem:[#allocation12 + $0xa58] ss:$28 sps:$4 sm:$0xff]   ;;  %v8418_v59 = vld [vmem:[#allocation12 + $0x6a4] ss:$28 sps:$4 sm:$0xff]  }
 0x447   : > { %6337 = vmatprep.subr.bf16.mxu1 %v8349_v62  ;;  %v8421_v62 = vld [vmem:[#allocation12 + $0xa24] ss:$28 sps:$4 sm:$0xff]  }
 0x449   : > { %6295 = vmatpush2.bf16.msra.mxu0 %v8344_v30  ;;  %v8416_v30 = vld [vmem:[#allocation12 + $0x6a0] ss:$28 sps:$4 sm:$0xff]  }
 0x44a   : > { %6338 = vmatpush2.bf16.msra.mxu1 %v8347_v63  ;;  %6296 = vmatprep.subr.bf16.mxu0 %v8352_v0  ;;  %v8419_v63 = vld [vmem:[#allocation12 + $0xa20] ss:$28 sps:$4 sm:$0xff]   ;;  %v8424_v0 = vld [vmem:[#allocation12 + $0x66c] ss:$28 sps:$4 sm:$0xff]  }
 0x44b   : > { %6339 = vmatprep.subr.bf16.mxu1 %v8355_v42  ;;  %v8427_v42 = vld [vmem:[#allocation12 + $0x9ec] ss:$28 sps:$4 sm:$0xff]  }
 0x44d   : > { %6297 = vmatpush2.bf16.msra.mxu0 %v8350_v1  ;;  %v8422_v1 = vld [vmem:[#allocation12 + $0x668] ss:$28 sps:$4 sm:$0xff]  }
 0x44e   : > { %6340 = vmatpush2.bf16.msra.mxu1 %v8353_v2  ;;  %6298 = vmatprep.subr.bf16.mxu0 %v8358_v33  ;;  %v8425_v2 = vld [vmem:[#allocation12 + $0x9e8] ss:$28 sps:$4 sm:$0xff]   ;;  %v8430_v33 = vld [vmem:[#allocation12 + $0x634] ss:$28 sps:$4 sm:$0xff]  }
 0x44f   : > { %6341 = vmatprep.subr.bf16.mxu1 %v8361_v51  ;;  %v8433_v51 = vld [vmem:[#allocation12 + $0x9b4] ss:$28 sps:$4 sm:$0xff]  }
 0x451   : > { %6299 = vmatpush2.bf16.msra.mxu0 %v8356_v52  ;;  %v6001_v52 = vpop.f32.mrf.mxu1 }
 0x452   : > { %6342 = vmatpush2.bf16.msra.mxu1 %v8359_v55  ;;  %6354 = vmatprep.subr.bf16.mxu0 %v8364_v57  ;;  %v8428_v55 = vld [vmem:[#allocation12 + $0x630] ss:$28 sps:$4 sm:$0xff]  }
 0x453   : > { %6397 = vmatprep.subr.bf16.mxu1 %v8367_v3  ;;  %v8431_v57 = vld [vmem:[#allocation12 + $0x9b0] ss:$28 sps:$4 sm:$0xff]   ;;  %v8436_v3 = vld [vmem:[#allocation12 + $0x5fc] ss:$28 sps:$4 sm:$0xff]  }
 0x454   : > { %6301 = vmatmul.mubr.bf16.vlgmr.msra.gmra.mxu0 %v9157_v25 }
 0x455   : > { %6344 = vmatmul.mubr.bf16.vlgmr.msra.gmra.mxu1 %v9121_v53  ;;  %6355 = vmatpush1.bf16.msra.mxu0 %v8362_v4  ;;  %v8439_v4 = vld [vmem:[#allocation12 + $0x97c] ss:$28 sps:$4 sm:$0xff]  }
 0x456   : > { %6386 = vmatprep.mubr.bf16.mxu0 %v9128_v44  ;;  %6398 = vmatpush1.bf16.msra.mxu1 %v8365_v24  ;;  %v6003_v24 = vpop.f32.mrf.mxu1 }
 0x457   : > { %6429 = vmatprep.mubr.bf16.mxu1 %v9142_v10  ;;  %6356 = vmatprep.subr.bf16.mxu0 %v8370_v5  ;;  %v8434_v5 = vld [vmem:[#allocation12 + $0x5f8] ss:$28 sps:$4 sm:$0xff]  }
 0x458   : > { %6399 = vmatprep.subr.bf16.mxu1 %v8373_v6  ;;  %v8437_v6 = vld [vmem:[#allocation12 + $0x978] ss:$28 sps:$4 sm:$0xff]  }
 0x459   : > { %6357 = vmatpush1.bf16.msra.mxu0 %v8368_v7  ;;  %v8442_v7 = vld [vmem:[#allocation12 + $0x5c4] ss:$28 sps:$4 sm:$0xff]  }
 0x45a   : > { %6400 = vmatpush1.bf16.msra.mxu1 %v8371_v8  ;;  %6358 = vmatprep.subr.bf16.mxu0 %v8376_v9  ;;  %v8445_v8 = vld [vmem:[#allocation12 + $0x944] ss:$28 sps:$4 sm:$0xff]   ;;  %v6005_v9 = vpop.f32.mrf.mxu1 }
 0x45b   : > { %6401 = vmatprep.subr.bf16.mxu1 %v8379_v11  ;;  %v8440_v11 = vld [vmem:[#allocation12 + $0x5c0] ss:$28 sps:$4 sm:$0xff]  }
 0x45d   : > { %6359 = vmatpush1.bf16.msra.mxu0 %v8374_v13  ;;  %v6044_v13 = vpop.f32.mrf.mxu0 }
 0x45e   : > { %6402 = vmatpush1.bf16.msra.mxu1 %v8377_v14  ;;  %6360 = vmatprep.subr.bf16.mxu0 %v8382_v15  ;;  %v8443_v14 = vld [vmem:[#allocation12 + $0x940] ss:$28 sps:$4 sm:$0xff]   ;;  %v8448_v15 = vld [vmem:[#allocation12 + $0x58c] ss:$28 sps:$4 sm:$0xff]  }
 0x45f   : > { %6403 = vmatprep.subr.bf16.mxu1 %v8385_v16  ;;  %v8451_v16 = vld [vmem:[#allocation12 + $0x90c] ss:$28 sps:$4 sm:$0xff]  }
 0x461   : > { %6361 = vmatpush1.bf16.msra.mxu0 %v8380_v17  ;;  %v9172_v17 = vld [vmem:[#allocation13] sm:$0xff] }
 0x462   : > { %6404 = vmatpush1.bf16.msra.mxu1 %v8383_v18  ;;  %6362 = vmatprep.subr.bf16.mxu0 %v8388_v19  ;;  %v6007_v18 = vpop.f32.mrf.mxu1  ;;  %v8446_v19 = vld [vmem:[#allocation12 + $0x588] ss:$28 sps:$4 sm:$0xff]  }
 0x463   : > { %6405 = vmatprep.subr.bf16.mxu1 %v8391_v20  ;;  %v6046_v20 = vpop.f32.mrf.mxu0 }
 0x465   : > { %6363 = vmatpush1.bf16.msra.mxu0 %v8386_v22  ;;  %v6087_v22 = vpop.f32.mrf.mxu1 }
 0x466   : > { %6406 = vmatpush1.bf16.msra.mxu1 %v8389_v23  ;;  %6364 = vmatprep.subr.bf16.mxu0 %v8394_v26  ;;  %v8449_v23 = vld [vmem:[#allocation12 + $0x908] ss:$28 sps:$4 sm:$0xff]   ;;  %v8454_v26 = vld [vmem:[#allocation12 + $0x554] ss:$28 sps:$4 sm:$0xff]  }
 0x467   : > { %6407 = vmatprep.subr.bf16.mxu1 %v8397_v34  ;;  %v3631_v34 = vrot.slane %v9172_v17, %v9036_v31  ;;  %v8458_v31 = vld [vmem:[#allocation12 + $0xc18] ss:$28 sps:$4 sm:$0xff]  }
 0x469   : > { %6365 = vmatpush1.bf16.msra.mxu0 %v8392_v35  ;;  %v8457_v35 = vld [vmem:[#allocation12 + $0x8d4] ss:$28 sps:$4 sm:$0xff]  }
 0x46a   : > { %6408 = vmatpush1.bf16.msra.mxu1 %v8395_v36  ;;  %6366 = vmatprep.subr.bf16.mxu0 %v8400_v38  ;;  %v3635_v36 = vrot.slane %v9172_v17, %v9039_v32  ;;  %v8452_v38 = vld [vmem:[#allocation12 + $0x550] ss:$28 sps:$4 sm:$0xff]   ;;  %v8462_v32 = vld [vmem:[#allocation12 + $0x1a0] ss:$28 sps:$4 sm:$0xff]  }
 0x46b   : > { %6409 = vmatprep.subr.bf16.mxu1 %v8403_v39  ;;  %v6048_v39 = vpop.f32.mrf.mxu0 }
 0x46d   : > { %6367 = vmatpush1.bf16.msra.mxu0 %v8398_v37  ;;  %v6089_v37 = vpop.f32.mrf.mxu1 }
 0x46e   : > { %6410 = vmatpush1.bf16.msra.mxu1 %v8401_v40  ;;  %6368 = vmatprep.subr.bf16.mxu0 %v8406_v45  ;;  %v8455_v40 = vld [vmem:[#allocation12 + $0x8d0] ss:$28 sps:$4 sm:$0xff]   ;;  %v8460_v45 = vld [vmem:[#allocation12 + $0xc1c] ss:$28 sps:$4 sm:$0xff]  }
 0x46f   : > { %6411 = vmatprep.subr.bf16.mxu1 %v8409_v46  ;;  %v6002_v46 = vadd.f32 %v6001_v52, %v3631_v34 }
 0x471   : > { %6369 = vmatpush1.bf16.msra.mxu0 %v8404_v48  ;;  %v8461_v48 = vld [vmem:[#allocation12 + $0x360] ss:$28 sps:$4 sm:$0xff]  }
 0x472   : > { %6412 = vmatpush1.bf16.msra.mxu1 %v8407_v49  ;;  %6370 = vmatprep.subr.bf16.mxu0 %v8412_v50  ;;  %v6004_v49 = vadd.f32 %v6003_v24, %v3635_v36  ;;  %v6045_v50 = vadd.f32 %v6044_v13, %v6002_v46 }
 0x473   : > { %6413 = vmatprep.subr.bf16.mxu1 %v8415_v54  ;;  %v6050_v54 = vpop.f32.mrf.mxu0 }
 0x475   : > { %6371 = vmatpush2.bf16.msra.mxu0 %v8410_v58  ;;  %v6091_v58 = vpop.f32.mrf.mxu1 }
 0x476   : > { %6414 = vmatpush2.bf16.msra.mxu1 %v8413_v41  ;;  %6372 = vmatprep.subr.bf16.mxu0 %v8418_v59  ;;  %v6006_v41 = vadd.f32 %v6005_v9, %v3631_v34  ;;  %v6047_v59 = vadd.f32 %v6046_v20, %v6004_v49  ;;  %v8480_v20 = vld [vmem:[#allocation12 + $0xb3c] ss:$28 sps:$4 sm:$0xff]   ;;  %v8485_v34 = vld [vmem:[#allocation12 + $0xb04] ss:$28 sps:$4 sm:$0xff]  }
 0x477   : > { %6415 = vmatprep.subr.bf16.mxu1 %v8421_v62  ;;  %v6088_v62 = vadd.f32 %v6087_v22, %v6045_v50  ;;  %v6093_v52 = vpop.f32.mrf.mxu1  ;;  %v8481_v22 = vld [vmem:[#allocation12 + $0x280] ss:$28 sps:$4 sm:$0xff]   ;;  %v8492_v50 = vld [vmem:[#allocation12 + $0x50] ss:$28 sps:$4 sm:$0xff]  }
 0x479   : > { %6373 = vmatpush2.bf16.msra.mxu0 %v8416_v30  ;;  %v8465_v30 = vld [vmem:[#allocation12 + $0xbe4] ss:$28 sps:$4 sm:$0xff]  }
 0x47a   : > { %6416 = vmatpush2.bf16.msra.mxu1 %v8419_v63  ;;  %6374 = vmatprep.subr.bf16.mxu0 %v8424_v0  ;;  %v6008_v63 = vadd.f32 %v6007_v18, %v3635_v36  ;;  %v8473_v18 = vld [vmem:[#allocation12 + $0xb70] ss:$28 sps:$4 sm:$0xff]  }
 0x47b   : > { %6417 = vmatprep.subr.bf16.mxu1 %v8427_v42  ;;  %v8466_v42 = vld [vmem:[#allocation12 + $0x328] ss:$28 sps:$4 sm:$0xff]  }
 0x47d   : > { %6375 = vmatpush2.bf16.msra.mxu0 %v8422_v1  ;;  %v6049_v1 = vadd.f32 %v6048_v39, %v6006_v41  ;;  %v8500_v41 = vld [vmem:[#allocation12 + $0xddc] ss:$28 sps:$4 sm:$0xff]  }
 0x47e   : > { %6418 = vmatpush2.bf16.msra.mxu1 %v8425_v2  ;;  %6376 = vmatprep.subr.bf16.mxu0 %v8430_v33  ;;  %v6090_v2 = vadd.f32 %v6089_v37, %v6047_v59  ;;  %v8487_v37 = vld [vmem:[#allocation12 + $0x88] ss:$28 sps:$4 sm:$0xff]   ;;  %v8501_v59 = vld [vmem:[#allocation12 + $0xa60] ss:$28 sps:$4 sm:$0xff]  }
 0x47f   : > { %6419 = vmatprep.subr.bf16.mxu1 %v8433_v51  ;;  %v8463_v51 = vld [vmem:[#allocation12 + $0xbe0] ss:$28 sps:$4 sm:$0xff]   ;;  %v6092_v24 = vadd.f32 %v6091_v58, %v6049_v1  ;;  %v8493_v58 = vld [vmem:[#allocation12 + $0xa90] ss:$28 sps:$4 sm:$0xff]   ;;  %v8507_v1 = vld [vmem:[#allocation12 + $0x868] ss:$28 sps:$4 sm:$0xff]  }
 0x481   : > { %6377 = vmatpush2.bf16.msra.mxu0 %v8428_v55 }
 0x482   : > { %6420 = vmatpush2.bf16.msra.mxu1 %v8431_v57  ;;  %6378 = vmatprep.subr.bf16.mxu0 %v8436_v3  ;;  %v8467_v57 = vld [vmem:[#allocation12 + $0x168] ss:$28 sps:$4 sm:$0xff]  }
 0x483   : > { %6421 = vmatprep.subr.bf16.mxu1 %v8439_v4  ;;  %v8470_v3 = vld [vmem:[#allocation12 + $0xbac] ss:$28 sps:$4 sm:$0xff]   ;;  %v6051_v4 = vadd.f32 %v6050_v54, %v6008_v63  ;;  %v8496_v54 = vld [vmem:[#allocation12 + $0x1d8] ss:$28 sps:$4 sm:$0xff]   ;;  %v8505_v63 = vld [vmem:[#allocation12 + $0xda4] ss:$28 sps:$4 sm:$0xff]  }
 0x485   : > { %6379 = vmatpush2.bf16.msra.mxu0 %v8434_v5 }
 0x486   : > { %6422 = vmatpush2.bf16.msra.mxu1 %v8437_v6  ;;  %6380 = vmatprep.subr.bf16.mxu0 %v8442_v7  ;;  %v8471_v6 = vld [vmem:[#allocation12 + $0x2f0] ss:$28 sps:$4 sm:$0xff]  }
 0x487   : > { %6423 = vmatprep.subr.bf16.mxu1 %v8445_v8  ;;  %v6094_v8 = vadd.f32 %v6093_v52, %v6051_v4  ;;  %v8512_v52 = vld [vmem:[#allocation12 + $0x830] ss:$28 sps:$4 sm:$0xff]   ;;  %v8520_v4 = vld [vmem:[#allocation12 + $0xcfc] ss:$28 sps:$4 sm:$0xff]  }
 0x489   : > { %6381 = vmatpush2.bf16.msra.mxu0 %v8440_v11  ;;  %v8468_v11 = vld [vmem:[#allocation12 + $0xba8] ss:$28 sps:$4 sm:$0xff]  }
 0x48a   : > { %6424 = vmatpush2.bf16.msra.mxu1 %v8443_v14  ;;  %6382 = vmatprep.subr.bf16.mxu0 %v8448_v15  ;;  %v8472_v14 = vld [vmem:[#allocation12 + $0x130] ss:$28 sps:$4 sm:$0xff]  }
 0x48b   : > { %6425 = vmatprep.subr.bf16.mxu1 %v8451_v16  ;;  %v8475_v15 = vld [vmem:[#allocation12 + $0xb74] ss:$28 sps:$4 sm:$0xff]  }
 0x48d   : > { %6383 = vmatpush2.bf16.msra.mxu0 %v8446_v19  ;;  %v8477_v19 = vld [vmem:[#allocation12 + $0xf8] ss:$28 sps:$4 sm:$0xff]  }
 0x48e   : > { %6426 = vmatpush2.bf16.msra.mxu1 %v8449_v23  ;;  %6384 = vmatprep.subr.bf16.mxu0 %v8454_v26  ;;  %v8478_v23 = vld [vmem:[#allocation12 + $0xb38] ss:$28 sps:$4 sm:$0xff]   ;;  %v8482_v26 = vld [vmem:[#allocation12 + $0xc0] ss:$28 sps:$4 sm:$0xff]  }
 0x48f   : > { %6427 = vmatprep.subr.bf16.mxu1 %v8457_v35  ;;  %v8486_v35 = vld [vmem:[#allocation12 + $0x248] ss:$28 sps:$4 sm:$0xff]  }
 0x491   : > { %6385 = vmatpush2.bf16.msra.mxu0 %v8452_v38  ;;  %v8483_v38 = vld [vmem:[#allocation12 + $0xb00] ss:$28 sps:$4 sm:$0xff]  }
 0x492   : > { %6428 = vmatpush2.bf16.msra.mxu1 %v8455_v40  ;;  %6440 = vmatprep.subr.bf16.mxu0 %v8460_v45  ;;  %v8490_v40 = vld [vmem:[#allocation12 + $0xacc] ss:$28 sps:$4 sm:$0xff]  }
 0x493   : > { %7623 = vmatprep.subr.bf16.mxu1 %v8461_v48  ;;  %v8491_v45 = vld [vmem:[#allocation12 + $0x210] ss:$28 sps:$4 sm:$0xff]   ;;  %v8488_v48 = vld [vmem:[#allocation12 + $0xac8] ss:$28 sps:$4 sm:$0xff]  }
 0x494   : > { %6387 = vmatmul.mubr.bf16.vlgmr.msra.gmra.mxu0 %v9130_v43  ;;  %v6130_v0 = vpop.f32.mrf.mxu0 }
 0x495   : > { %6430 = vmatmul.mubr.bf16.vlgmr.msra.gmra.mxu1 %v9144_v12  ;;  %v6131_v33 = vadd.f32 %v6130_v0, %v6088_v62  ;;  %6441 = vmatpush1.bf16.msra.mxu0 %v8458_v31  ;;  %v8495_v31 = vld [vmem:[#allocation12 + $0xa94] ss:$28 sps:$4 sm:$0xff]   ;;  %v8506_v0 = vld [vmem:[#allocation12 + $0xa28] ss:$28 sps:$4 sm:$0xff]  }
 0x496   : > { %6472 = vmatprep.mubr.bf16.mxu0 %v9155_v21  ;;  %7624 = vmatpush3.bf16.msra.mxu1 %v8462_v32  ;;  %v6132_v55 = vpop.f32.mrf.mxu0  ;;  %v8497_v32 = vld [vmem:[#allocation12 + $0x18] ss:$28 sps:$4 sm:$0xff]  }
 0x497   : > { %8570 = vtanh.f32 %v6131_v33  ;;  %6515 = vmatprep.mubr.bf16.mxu1 %v9112_v56  ;;  %v6133_v5 = vadd.f32 %v6132_v55, %v6090_v2  ;;  %6442 = vmatprep.subr.bf16.mxu0 %v8465_v30  ;;  %v8476_v56 = vld [vmem:[#allocation12 + $0x2b8] ss:$28 sps:$4 sm:$0xff]   ;;  %v8502_v30 = vld [vmem:[#allocation12 + $0x8a0] ss:$28 sps:$4 sm:$0xff]   ;;  %v8510_v2 = vld [vmem:[#allocation12 + $0xd6c] ss:$28 sps:$4 sm:$0xff]  }
 0x498   : > { %7625 = vmatprep.subr.bf16.mxu1 %v8466_v42  ;;  %v6134_v7 = vpop.f32.mrf.mxu0  ;;  %v8498_v62 = vld [vmem:[#allocation12 + $0xdd8] ss:$28 sps:$4 sm:$0xff]   ;;  %v8503_v42 = vld [vmem:[#allocation12 + $0xda0] ss:$28 sps:$4 sm:$0xff]   ;;  %v8511_v33 = vld [vmem:[#allocation12 + $0x9f0] ss:$28 sps:$4 sm:$0xff]  }
 0x499   : > { %8572 = vtanh.f32 %v6133_v5  ;;  %v6135_v9 = vadd.f32 %v6134_v7, %v6092_v24  ;;  %6443 = vmatpush1.bf16.msra.mxu0 %v8463_v51  ;;  %v8508_v51 = vld [vmem:[#allocation12 + $0xd68] ss:$28 sps:$4 sm:$0xff]   ;;  %v8515_v55 = vld [vmem:[#allocation12 + $0xd34] ss:$28 sps:$4 sm:$0xff]   ;;  %v8522_v5 = vld [vmem:[#allocation12 + $0x7c0] ss:$28 sps:$4 sm:$0xff]  }
 0x49a   : > { %7626 = vmatpush3.bf16.msra.mxu1 %v8467_v57  ;;  %v6136_v13 = vpop.f32.mrf.mxu0  ;;  %6444 = vmatprep.subr.bf16.mxu0 %v8470_v3  ;;  %v8516_v57 = vld [vmem:[#allocation12 + $0x9b8] ss:$28 sps:$4 sm:$0xff]   ;;  %v8526_v7 = vld [vmem:[#allocation12 + $0x948] ss:$28 sps:$4 sm:$0xff]  }
 0x49b   : > { %8574 = vtanh.f32 %v6135_v9  ;;  %v6137_v16 = vadd.f32 %v6136_v13, %v6094_v8  ;;  %7627 = vmatprep.subr.bf16.mxu1 %v8471_v6  ;;  %v8517_v3 = vld [vmem:[#allocation12 + $0x7f8] ss:$28 sps:$4 sm:$0xff]   ;;  %v8525_v6 = vld [vmem:[#allocation12 + $0xcc4] ss:$28 sps:$4 sm:$0xff]   ;;  %v8531_v13 = vld [vmem:[#allocation12 + $0x910] ss:$28 sps:$4 sm:$0xff]  }
 0x49c   : > { %v8518_v24 = vld [vmem:[#allocation12 + $0xcf8] ss:$28 sps:$4 sm:$0xff]   ;;  %v8523_v8 = vld [vmem:[#allocation12 + $0xcc0] ss:$28 sps:$4 sm:$0xff]   ;;  %v8527_v9 = vld [vmem:[#allocation12 + $0x788] ss:$28 sps:$4 sm:$0xff]  }
 0x49d   : > { %8576 = vtanh.f32 %v6137_v16  ;;  %6445 = vmatpush1.bf16.msra.mxu0 %v8468_v11  ;;  %v8530_v11 = vld [vmem:[#allocation12 + $0xc8c] ss:$28 sps:$4 sm:$0xff]   ;;  %v8535_v16 = vld [vmem:[#allocation12 + $0xc54] ss:$28 sps:$4 sm:$0xff]  }
 0x49e   : > { %7628 = vmatpush3.bf16.msra.mxu1 %v8472_v14  ;;  %6446 = vmatprep.subr.bf16.mxu0 %v8475_v15  ;;  %v8528_v14 = vld [vmem:[#allocation12 + $0xc88] ss:$28 sps:$4 sm:$0xff]   ;;  %v8532_v15 = vld [vmem:[#allocation12 + $0x750] ss:$28 sps:$4 sm:$0xff]  }
 0x49f   : > { %7629 = vmatprep.subr.bf16.mxu1 %v8476_v56  ;;  %v8536_v56 = vld [vmem:[#allocation12 + $0x8d8] ss:$28 sps:$4 sm:$0xff]  }
 0x4a1   : > { %6447 = vmatpush1.bf16.msra.mxu0 %v8473_v18  ;;  %v8533_v18 = vld [vmem:[#allocation12 + $0xc50] ss:$28 sps:$4 sm:$0xff]  }
 0x4a2   : > { %7630 = vmatpush3.bf16.msra.mxu1 %v8477_v19  ;;  %6448 = vmatprep.subr.bf16.mxu0 %v8480_v20  ;;  %v8537_v19 = vld [vmem:[#allocation12 + $0x718] ss:$28 sps:$4 sm:$0xff]   ;;  %v8538_v20 = vld [vmem:[#allocation12 + $0x6e0] ss:$28 sps:$4 sm:$0xff]  }
 0x4a3   : > { %7631 = vmatprep.subr.bf16.mxu1 %v8481_v22  ;;  %v8539_v22 = vld [vmem:[#allocation12 + $0x520] ss:$28 sps:$4 sm:$0xff]  }
 0x4a4   : > { %v8571_v36 = vpop.eup %8570 }
 0x4a5   : > { %6661 = vst [vmem:[%s9186_s18] sm:$0xff] %v8571_v36  ;;  %6449 = vmatpush1.bf16.msra.mxu0 %v8478_v23  ;;  %v8540_v23 = vld [vmem:[#allocation12 + $0x6a8] ss:$28 sps:$4 sm:$0xff]   ;;  %v8544_v36 = vld [vmem:[#allocation12 + $0x638] ss:$28 sps:$4 sm:$0xff]  }
 0x4a6   : > { %v8573_v39 = vpop.eup %8572  ;;  %7632 = vmatpush3.bf16.msra.mxu1 %v8482_v26  ;;  %6450 = vmatprep.subr.bf16.mxu0 %v8485_v34  ;;  %v8541_v26 = vld [vmem:[#allocation12 + $0x4e8] ss:$28 sps:$4 sm:$0xff]   ;;  %v8542_v34 = vld [vmem:[#allocation12 + $0x670] ss:$28 sps:$4 sm:$0xff]  }
 0x4a7   : > { %6662 = vst [vmem:[%s9186_s18 + $0x8] sm:$0xff] %v8573_v39  ;;  %7633 = vmatprep.subr.bf16.mxu1 %v8486_v35  ;;  %v8543_v35 = vld [vmem:[#allocation12 + $0x4b0] ss:$28 sps:$4 sm:$0xff]   ;;  %v8546_v39 = vld [vmem:[#allocation12 + $0x600] ss:$28 sps:$4 sm:$0xff]  }
 0x4a8   : > { %v8575_v46 = vpop.eup %8574 }
 0x4a9   : > { %6668 = vst [vmem:[%s9186_s18 + $0x38] sm:$0xff] %v8575_v46  ;;  %6451 = vmatpush1.bf16.msra.mxu0 %v8483_v38  ;;  %v8545_v38 = vld [vmem:[#allocation12 + $0x478] ss:$28 sps:$4 sm:$0xff]  }
 0x4aa   : > { %v8577_v49 = vpop.eup %8576  ;;  %7634 = vmatpush3.bf16.msra.mxu1 %v8487_v37  ;;  %6452 = vmatprep.subr.bf16.mxu0 %v8490_v40  ;;  %v8547_v37 = vld [vmem:[#allocation12 + $0x440] ss:$28 sps:$4 sm:$0xff]   ;;  %v8548_v40 = vld [vmem:[#allocation12 + $0x5c8] ss:$28 sps:$4 sm:$0xff]   ;;  %v8552_v46 = vld [vmem:[#allocation12 + $0x558] ss:$28 sps:$4 sm:$0xff]  }
 0x4ab   : > { %6669 = vst [vmem:[%s9186_s18 + $0x40] sm:$0xff] %v8577_v49  ;;  %7635 = vmatprep.subr.bf16.mxu1 %v8491_v45  ;;  %v8550_v45 = vld [vmem:[#allocation12 + $0x590] ss:$28 sps:$4 sm:$0xff]   ;;  %v8554_v49 = vld [vmem:[#allocation12 + $0xde0] ss:$28 sps:$4 sm:$0xff]  }
 0x4ad   : > { %6453 = vmatpush1.bf16.msra.mxu0 %v8488_v48  ;;  %v8553_v48 = vld [vmem:[#allocation12 + $0x398] ss:$28 sps:$4 sm:$0xff]  }
 0x4ae   : > { %7636 = vmatpush3.bf16.msra.mxu1 %v8492_v50  ;;  %6454 = vmatprep.subr.bf16.mxu0 %v8495_v31  ;;  %v8555_v50 = vld [vmem:[#allocation12 + $0xc20] ss:$28 sps:$4 sm:$0xff]   ;;  %v8556_v31 = vld [vmem:[#allocation12 + $0xda8] ss:$28 sps:$4 sm:$0xff]  }
 0x4af   : > { %7637 = vmatprep.subr.bf16.mxu1 %v8496_v54  ;;  %v8557_v54 = vld [vmem:[#allocation12 + $0xbe8] ss:$28 sps:$4 sm:$0xff]  }
 0x4b1   : > { %6455 = vmatpush1.bf16.msra.mxu0 %v8493_v58  ;;  %v8558_v58 = vld [vmem:[#allocation12 + $0xd70] ss:$28 sps:$4 sm:$0xff]  }
 0x4b2   : > { %7638 = vmatpush3.bf16.msra.mxu1 %v8497_v32  ;;  %6456 = vmatprep.subr.bf16.mxu0 %v8500_v41  ;;  %v8559_v32 = vld [vmem:[#allocation12 + $0xbb0] ss:$28 sps:$4 sm:$0xff]   ;;  %v8560_v41 = vld [vmem:[#allocation12 + $0xd38] ss:$28 sps:$4 sm:$0xff]  }
 0x4b3   : > { %7667 = vmatprep.subr.bf16.mxu1 %v8501_v59  ;;  %v8561_v59 = vld [vmem:[#allocation12 + $0xb78] ss:$28 sps:$4 sm:$0xff]  }
 0x4b5   : > { %6516 = vmatmul.mubr.bf16.vlgmr.msra.gmra.mxu1 %v9121_v53  ;;  %6457 = vmatpush2.bf16.msra.mxu0 %v8498_v62  ;;  %v8513_v53 = vld [vmem:[#allocation12 + $0xd30] ss:$28 sps:$4 sm:$0xff]   ;;  %v6173_v62 = vpop.f32.mrf.mxu1 }
 0x4b6   : > { %7668 = vmatpush3.bf16.msra.mxu1 %v8502_v30  ;;  %6597 = vmatprep.mubr.bf16.mxu1 %v9142_v10  ;;  %v8521_v10 = vld [vmem:[#allocation12 + $0x980] ss:$28 sps:$4 sm:$0xff]  }
 0x4b7   : > { %6458 = vmatprep.subr.bf16.mxu0 %v8505_v63  ;;  %7669 = vmatprep.subr.bf16.mxu1 %v8506_v0  ;;  %v8562_v30 = vld [vmem:[#allocation12 + $0xd00] ss:$28 sps:$4 sm:$0xff]   ;;  %v6175_v0 = vpop.f32.mrf.mxu1 }
 0x4b8   : > { %v8563_v63 = vld [vmem:[#allocation12 + $0xb40] ss:$28 sps:$4 sm:$0xff]  }
 0x4b9   : > { %6459 = vmatpush2.bf16.msra.mxu0 %v8503_v42  ;;  %v8565_v42 = vld [vmem:[#allocation12 + $0xb08] ss:$28 sps:$4 sm:$0xff]  }
 0x4ba   : > { %7670 = vmatpush3.bf16.msra.mxu1 %v8507_v1  ;;  %6460 = vmatprep.subr.bf16.mxu0 %v8510_v2  ;;  %v8566_v2 = vld [vmem:[#allocation12 + $0xc90] ss:$28 sps:$4 sm:$0xff]  }
 0x4bb   : > { %7671 = vmatprep.subr.bf16.mxu1 %v8511_v33  ;;  %v3639_v33 = vrot.slane %v9172_v17, %v9063_v61 }
 0x4bd   : > { %6461 = vmatpush2.bf16.msra.mxu0 %v8508_v51  ;;  %v8567_v51 = vld [vmem:[#allocation12 + $0xad0] ss:$28 sps:$4 sm:$0xff]  }
 0x4be   : > { %7672 = vmatpush3.bf16.msra.mxu1 %v8512_v52  ;;  %6462 = vmatprep.subr.bf16.mxu0 %v8515_v55 }
 0x4bf   : > { %7673 = vmatprep.subr.bf16.mxu1 %v8516_v57  ;;  %v8568_v57 = vld [vmem:[#allocation12 + $0xc58] ss:$28 sps:$4 sm:$0xff]  }
 0x4c1   : > { %6463 = vmatpush2.bf16.msra.mxu0 %v8513_v53  ;;  %v3643_v53 = vrot.slane %v9172_v17, %v9060_v60 }
 0x4c2   : > { %7674 = vmatpush3.bf16.msra.mxu1 %v8517_v3  ;;  %6464 = vmatprep.subr.bf16.mxu0 %v8520_v4  ;;  %v6174_v4 = vadd.f32 %v6173_v62, %v3639_v33 }
 0x4c3   : > { %7675 = vmatprep.subr.bf16.mxu1 %v8521_v10  ;;  %v8569_v10 = vld [vmem:[#allocation12 + $0xa98] ss:$28 sps:$4 sm:$0xff]  }
 0x4c5   : > { %6465 = vmatpush2.bf16.msra.mxu0 %v8518_v24 }
 0x4c6   : > { %7676 = vmatpush3.bf16.msra.mxu1 %v8522_v5  ;;  %6466 = vmatprep.subr.bf16.mxu0 %v8525_v6  ;;  %v6176_v5 = vadd.f32 %v6175_v0, %v3643_v53 }
 0x4c7   : > { %7677 = vmatprep.subr.bf16.mxu1 %v8526_v7 }
 0x4c9   : > { %6467 = vmatpush2.bf16.msra.mxu0 %v8523_v8 }
 0x4ca   : > { %7678 = vmatpush3.bf16.msra.mxu1 %v8527_v9  ;;  %6468 = vmatprep.subr.bf16.mxu0 %v8530_v11 }
 0x4cb   : > { %7679 = vmatprep.subr.bf16.mxu1 %v8531_v13 }
 0x4cd   : > { %6469 = vmatpush2.bf16.msra.mxu0 %v8528_v14 }
 0x4ce   : > { %7680 = vmatpush3.bf16.msra.mxu1 %v8532_v15  ;;  %6470 = vmatprep.subr.bf16.mxu0 %v8535_v16 }
 0x4cf   : > { %7681 = vmatprep.subr.bf16.mxu1 %v8536_v56 }
 0x4d1   : > { %6471 = vmatpush2.bf16.msra.mxu0 %v8533_v18 }
 0x4d2   : > { %7682 = vmatpush3.bf16.msra.mxu1 %v8537_v19  ;;  %7645 = vmatprep.subr.bf16.mxu0 %v8538_v20 }
 0x4d4   : > { %6473 = vmatmul.mubr.bf16.vlgmr.msra.gmra.mxu0 %v9157_v25  ;;  %v6216_v1 = vpop.f32.mrf.mxu0 }
 0x4d5   : > { %6598 = vmatmul.mubr.bf16.vlgmr.msra.gmra.mxu1 %v9144_v12  ;;  %7646 = vmatpush3.bf16.msra.mxu0 %v8539_v22  ;;  %v8549_v12 = vld [vmem:[#allocation12 + $0x408] ss:$28 sps:$4 sm:$0xff]   ;;  %v6217_v6 = vadd.f32 %v6216_v1, %v6174_v4 }
 0x4d6   : > { %6556 = vmatprep.mubr.bf16.mxu0 %v9128_v44  ;;  %7647 = vmatprep.subr.bf16.mxu0 %v8540_v23  ;;  %v8551_v44 = vld [vmem:[#allocation12 + $0x3d0] ss:$28 sps:$4 sm:$0xff]   ;;  %v6218_v55 = vpop.f32.mrf.mxu0 }
 0x4d7   : > { %v6219_v61 = vadd.f32 %v6218_v55, %v6176_v5 }
 0x4d8   : > { %v6220_v24 = vpop.f32.mrf.mxu0 }
 0x4d9   : > { %7648 = vmatpush3.bf16.msra.mxu0 %v8541_v26 }
 0x4da   : > { %7649 = vmatprep.subr.bf16.mxu0 %v8542_v34  ;;  %v6222_v9 = vpop.f32.mrf.mxu0 }
 0x4dd   : > { %7650 = vmatpush3.bf16.msra.mxu0 %v8543_v35 }
 0x4de   : > { %7651 = vmatprep.subr.bf16.mxu0 %v8544_v36 }
 0x4e1   : > { %7652 = vmatpush3.bf16.msra.mxu0 %v8545_v38 }
 0x4e2   : > { %7653 = vmatprep.subr.bf16.mxu0 %v8546_v39 }
 0x4e5   : > { %7654 = vmatpush3.bf16.msra.mxu0 %v8547_v37 }
 0x4e6   : > { %7655 = vmatprep.subr.bf16.mxu0 %v8548_v40 }
 0x4e9   : > { %7656 = vmatpush3.bf16.msra.mxu0 %v8549_v12 }
 0x4ea   : > { %7657 = vmatprep.subr.bf16.mxu0 %v8550_v45 }
 0x4ed   : > { %7658 = vmatpush3.bf16.msra.mxu0 %v8551_v44 }
 0x4ee   : > { %7659 = vmatprep.subr.bf16.mxu0 %v8552_v46 }
 0x4f1   : > { %7660 = vmatpush3.bf16.msra.mxu0 %v8553_v48  ;;  %v3647_v48 = vrot.slane %v9172_v17, %v1412_v27 }
 0x4f2   : > { %7689 = vmatprep.subr.bf16.mxu0 %v8554_v49 }
 0x4f4   : > { %6557 = vmatmul.mubr.bf16.vlgmr.msra.gmra.mxu0 %v9130_v43  ;;  %v8564_v43 = vld [vmem:[#allocation12 + $0xcc8] ss:$28 sps:$4 sm:$0xff]  }
 0x4f5   : > { %7690 = vmatpush3.bf16.msra.mxu0 %v8555_v50  ;;  %6638 = vmatprep.mubr.bf16.mxu0 %v9155_v21  ;;  %v6177_v21 = vpop.f32.mrf.mxu1 }
 0x4f6   : > { %7691 = vmatprep.subr.bf16.mxu0 %v8556_v31  ;;  %v6178_v8 = vadd.f32 %v6177_v21, %v3639_v33  ;;  %v3651_v31 = vrot.slane %v9172_v17, %v1416_v28 }
 0x4f7   : > { %v6179_v52 = vpop.f32.mrf.mxu1 }
 0x4f8   : > { %v6180_v11 = vadd.f32 %v6179_v52, %v3643_v53  ;;  %v6221_v14 = vadd.f32 %v6220_v24, %v6178_v8 }
 0x4f9   : > { %7692 = vmatpush3.bf16.msra.mxu0 %v8557_v54  ;;  %v6259_v3 = vpop.f32.mrf.mxu1 }
 0x4fa   : > { %7693 = vmatprep.subr.bf16.mxu0 %v8558_v58  ;;  %v6260_v13 = vadd.f32 %v6259_v3, %v6217_v6  ;;  %v6223_v56 = vadd.f32 %v6222_v9, %v6180_v11 }
 0x4fb   : > { %v6261_v7 = vpop.f32.mrf.mxu1 }
 0x4fc   : > { %v6262_v60 = vadd.f32 %v6261_v7, %v6219_v61 }
 0x4fd   : > { %7694 = vmatpush3.bf16.msra.mxu0 %v8559_v32  ;;  %v6263_v15 = vpop.f32.mrf.mxu1 }
 0x4fe   : > { %7695 = vmatprep.subr.bf16.mxu0 %v8560_v41  ;;  %v6264_v20 = vadd.f32 %v6263_v15, %v6221_v14 }
 0x4ff   : > { %v6265_v23 = vpop.f32.mrf.mxu1 }
 0x500   : > { %v6266_v34 = vadd.f32 %v6265_v23, %v6223_v56  ;;  %v3655_v56 = vrot.slane %v9172_v17, %v1420_v47 }
 0x501   : > { %7696 = vmatpush3.bf16.msra.mxu0 %v8561_v59 }
 0x502   : > { %7697 = vmatprep.subr.bf16.mxu0 %v8562_v30 }
 0x505   : > { %7698 = vmatpush3.bf16.msra.mxu0 %v8563_v63 }
 0x506   : > { %7699 = vmatprep.subr.bf16.mxu0 %v8564_v43 }
 0x509   : > { %7700 = vmatpush3.bf16.msra.mxu0 %v8565_v42 }
 0x50a   : > { %7701 = vmatprep.subr.bf16.mxu0 %v8566_v2 }
 0x50d   : > { %7702 = vmatpush3.bf16.msra.mxu0 %v8567_v51 }
 0x50e   : > { %7703 = vmatprep.subr.bf16.mxu0 %v8568_v57 }
 0x511   : > { %7704 = vmatpush3.bf16.msra.mxu0 %v8569_v10 }
 0x514   : > { %v6302_v16 = vpop.f32.mrf.mxu0  ;;  %6639 = vmatmul.mubr.bf16.vlgmr.msra.gmra.mxu0 %v9157_v25 }
 0x515   : > { %v6303_v18 = vadd.f32 %v6302_v16, %v6260_v13  ;;  %v6345_v12 = vpop.f32.mrf.mxu1 }
 0x516   : > { %v6304_v19 = vpop.f32.mrf.mxu0  ;;  %v6346_v58 = vadd.f32 %v6345_v12, %v3647_v48 }
 0x517   : > { %8578 = vtanh.f32 %v6303_v18  ;;  %v6305_v22 = vadd.f32 %v6304_v19, %v6262_v60  ;;  %v6347_v45 = vpop.f32.mrf.mxu1 }
 0x518   : > { %v6306_v26 = vpop.f32.mrf.mxu0  ;;  %v6348_v41 = vadd.f32 %v6347_v45, %v3651_v31 }
 0x519   : > { %8580 = vtanh.f32 %v6305_v22  ;;  %v6307_v35 = vadd.f32 %v6306_v26, %v6264_v20  ;;  %v6349_v44 = vpop.f32.mrf.mxu1 }
 0x51a   : > { %v6308_v36 = vpop.f32.mrf.mxu0  ;;  %v6350_v30 = vadd.f32 %v6349_v44, %v3647_v48 }
 0x51b   : > { %8582 = vtanh.f32 %v6307_v35  ;;  %v6309_v38 = vadd.f32 %v6308_v36, %v6266_v34  ;;  %v6351_v49 = vpop.f32.mrf.mxu1 }
 0x51c   : > { %v6352_v43 = vadd.f32 %v6351_v49, %v3651_v31 }
 0x51d   : > { %8584 = vtanh.f32 %v6309_v38 }
 0x524   : > { %v8579_v25 = vpop.eup %8578 }
 0x525   : > { %6663 = vst [vmem:[%s9186_s18 + $0x10] sm:$0xff] %v8579_v25 }
 0x526   : > { %v8581_v39 = vpop.eup %8580 }
 0x527   : > { %6664 = vst [vmem:[%s9186_s18 + $0x18] sm:$0xff] %v8581_v39 }
 0x528   : > { %v8583_v37 = vpop.eup %8582 }
 0x529   : > { %6670 = vst [vmem:[%s9186_s18 + $0x48] sm:$0xff] %v8583_v37 }
 0x52a   : > { %v8585_v40 = vpop.eup %8584 }
 0x52b   : > { %6671 = vst [vmem:[%s9186_s18 + $0x50] sm:$0xff] %v8585_v40 }
 0x554   : > { %v6388_v46 = vpop.f32.mrf.mxu0 }
 0x555   : > { %v6431_v54 = vpop.f32.mrf.mxu1  ;;  %v6389_v59 = vadd.f32 %v6388_v46, %v6346_v58 }
 0x556   : > { %v6390_v50 = vpop.f32.mrf.mxu0 }
 0x557   : > { %v6433_v62 = vpop.f32.mrf.mxu1  ;;  %v6391_v63 = vadd.f32 %v6390_v50, %v6348_v41  ;;  %v6432_v42 = vadd.f32 %v6431_v54, %v6389_v59 }
 0x558   : > { %v6392_v32 = vpop.f32.mrf.mxu0 }
 0x559   : > { %v6393_v21 = vadd.f32 %v6392_v32, %v6350_v30  ;;  %v6435_v1 = vpop.f32.mrf.mxu1  ;;  %v6434_v2 = vadd.f32 %v6433_v62, %v6391_v63 }
 0x55a   : > { %v6394_v0 = vpop.f32.mrf.mxu0 }
 0x55b   : > { %v6395_v33 = vadd.f32 %v6394_v0, %v6352_v43  ;;  %v6436_v28 = vadd.f32 %v6435_v1, %v6393_v21  ;;  %v6437_v57 = vpop.f32.mrf.mxu1 }
 0x55d   : > { %v6438_v3 = vadd.f32 %v6437_v57, %v6395_v33 }
 0x575   : > { %v7639_v61 = vpop.f32.mrf.mxu1 }
 0x577   : > { %v7640_v9 = vpop.f32.mrf.mxu1 }
 0x578   : > { %v7641_v18 = vadd.f32 %v7640_v9, %v7639_v61 }
 0x579   : > { %v7642_v11 = vpop.f32.mrf.mxu1 }
 0x57a   : > { %v6518_v23 = vadd.f32 %v7641_v18, %v3655_v56 }
 0x57b   : > { %v7643_v14 = vpop.f32.mrf.mxu1 }
 0x57c   : > { %v7644_v26 = vadd.f32 %v7643_v14, %v7642_v11 }
 0x57e   : > { %v6521_v25 = vadd.f32 %v7644_v26, %v3655_v56 }
 0x594   : > { %v6474_v27 = vpop.f32.mrf.mxu0 }
 0x595   : > { %v6475_v51 = vadd.f32 %v6474_v27, %v6432_v42  ;;  %v7683_v16 = vpop.f32.mrf.mxu1 }
 0x596   : > { %v6476_v52 = vpop.f32.mrf.mxu0 }
 0x597   : > { %8586 = vtanh.f32 %v6475_v51  ;;  %v6477_v55 = vadd.f32 %v6476_v52, %v6434_v2  ;;  %v7684_v19 = vpop.f32.mrf.mxu1 }
 0x598   : > { %v6478_v53 = vpop.f32.mrf.mxu0  ;;  %v7685_v39 = vadd.f32 %v7684_v19, %v7683_v16 }
 0x599   : > { %8588 = vtanh.f32 %v6477_v55  ;;  %v6479_v4 = vadd.f32 %v6478_v53, %v6436_v28  ;;  %v7686_v34 = vpop.f32.mrf.mxu1 }
 0x59a   : > { %v6480_v10 = vpop.f32.mrf.mxu0 }
 0x59b   : > { %8590 = vtanh.f32 %v6479_v4  ;;  %v6481_v24 = vadd.f32 %v6480_v10, %v6438_v3  ;;  %v7687_v37 = vpop.f32.mrf.mxu1 }
 0x59c   : > { %v7688_v17 = vadd.f32 %v7687_v37, %v7686_v34 }
 0x59d   : > { %8592 = vtanh.f32 %v6481_v24 }
 0x5a4   : > { %v8587_v5 = vpop.eup %8586 }
 0x5a5   : > { %6665 = vst [vmem:[%s9186_s18 + $0x20] sm:$0xff] %v8587_v5 }
 0x5a6   : > { %v8589_v6 = vpop.eup %8588 }
 0x5a7   : > { %6666 = vst [vmem:[%s9186_s18 + $0x28] sm:$0xff] %v8589_v6 }
 0x5a8   : > { %v8591_v7 = vpop.eup %8590 }
 0x5a9   : > { %6672 = vst [vmem:[%s9186_s18 + $0x58] sm:$0xff] %v8591_v7 }
 0x5aa   : > { %v8593_v8 = vpop.eup %8592 }
 0x5ab   : > { %6673 = vst [vmem:[%s9186_s18 + $0x60] sm:$0xff] %v8593_v8 }
 0x5b4   : > { %v7661_v13 = vpop.f32.mrf.mxu0 }
 0x5b6   : > { %v7662_v15 = vpop.f32.mrf.mxu0 }
 0x5b7   : > { %v7663_v20 = vadd.f32 %v7662_v15, %v7661_v13 }
 0x5b8   : > { %v7664_v60 = vpop.f32.mrf.mxu0 }
 0x5b9   : > { %v6559_v35 = vadd.f32 %v7663_v20, %v6518_v23 }
 0x5ba   : > { %v7665_v22 = vpop.f32.mrf.mxu0 }
 0x5bb   : > { %v7666_v36 = vadd.f32 %v7665_v22, %v7664_v60  ;;  %v6600_v29 = vadd.f32 %v7685_v39, %v6559_v35 }
 0x5bd   : > { %v6562_v12 = vadd.f32 %v7666_v36, %v6521_v25 }
 0x5bf   : > { %v6603_v48 = vadd.f32 %v7688_v17, %v6562_v12 }
 0x5d4   : > { %v7705_v38 = vpop.f32.mrf.mxu0 }
 0x5d6   : > { %v7706_v40 = vpop.f32.mrf.mxu0 }
 0x5d7   : > { %v7707_v45 = vadd.f32 %v7706_v40, %v7705_v38 }
 0x5d8   : > { %v7708_v47 = vpop.f32.mrf.mxu0 }
 0x5d9   : > { %v6641_v44 = vadd.f32 %v7707_v45, %v6600_v29 }
 0x5da   : > { %v7709_v46 = vpop.f32.mrf.mxu0 }
 0x5db   : > { %8594 = vtanh.f32 %v6641_v44  ;;  %v7710_v49 = vadd.f32 %v7709_v46, %v7708_v47 }
 0x5dd   : > { %v6644_v50 = vadd.f32 %v7710_v49, %v6603_v48 }
 0x5df   : > { %8596 = vtanh.f32 %v6644_v50 }
 0x5e8   : > { %v8595_v31 = vpop.eup %8594 }
 0x5e9   : > { %6667 = vst [vmem:[%s9186_s18 + $0x30] sm:$0xff] %v8595_v31 }
 0x5ec   : > { %v8597_v54 = vpop.eup %8596 }
 0x5ed   : > { %6674 = vst [vmem:[%s9186_s18 + $0x68] sm:$0xff] %v8597_v54 }
 0x5ee PF: > { %s24_s30 = sadd.s32 1, %s8832_s30  }
 0x5ef   : > { %p21_p6 = scmp.ge.s32.totalorder %s24_s30, 4  }
 0x5f1   :  { %23 = sbr.rel (!%p21_p6) target bundleno = 5 (0x5), region = 119 }
 0x5f6   :  { %6699 = vsyncpa [#allocation3], 1 }
 0x5f7   :  { %6701 = vsyncpa [#allocation3 + $0x1], 1 }
 0x5f8   :  { %6702 = vsyncpa [#allocation5], 1 }
 0x5f9   :  { %6703 = vsyncpa [#allocation8], 1 }
 0x5fa   :  { %6704 = vsyncpa [#allocation11], 1 }
 0x5fb   :  { %6705 = vsyncpa [#allocation14], 1 }

</bundles_post_ra>
